<compile_context>
chip_gen: v5e
topology: v5e:2x2
jax: 0.10.0
libtpu: 0.0.40
codegen_flags: <defaults>
</compile_context>

<pallas_src>
import jax
import jax.numpy as jnp
from jax.experimental import pallas as pl
from jax.experimental.pallas import tpu as pltpu


def _reg_head_kernel(reps_ref, mask_ref, w1_ref, b1_ref, w2_ref, b2_ref,
                     out_ref, acc_ref, len_ref):
    l = pl.program_id(1)

    @pl.when(l == 0)
    def _init():
        acc_ref[...] = jnp.zeros_like(acc_ref)
        len_ref[...] = jnp.zeros_like(len_ref)

    # bf16 stream -> f32 accumulation. mask is (bB, tL, 1): sequence on sublanes like
    # reps, broadcast along lanes is free.
    reps = reps_ref[...].astype(jnp.float32)          # (bB, tL, Hp)
    mask = mask_ref[...].astype(jnp.float32)          # (bB, tL, 1)  (BOS + pad are 0)

    acc_ref[...] += jnp.sum(reps * mask, axis=1)      # (bB, Hp)
    len_ref[...] += jnp.sum(mask, axis=1)             # (bB, 1)

    @pl.when(l == pl.num_programs(1) - 1)
    def _finalize():
        # Exact divide: runs once per batch block, negligible vs. the streaming phase.
        lengths = jnp.maximum(len_ref[...], 1e-6)                       # (bB, 1)
        pooled = acc_ref[...] / lengths                                  # (bB, Hp)

        # Linear(H,H) -> ReLU on the MXU.
        h = jnp.dot(pooled, w1_ref[...],
                    preferred_element_type=jnp.float32) + b1_ref[...]
        h = jnp.maximum(h, 0.0)

        # Linear(H,1) as a VPU multiply + lane reduce (avoids a 1-column MXU matvec).
        pred = jnp.sum(h * w2_ref[...], axis=-1, keepdims=True) + b2_ref[0, 0]
        out_ref[...] = pred.astype(out_ref.dtype)                        # (bB, 1)


def reg_head_forward(reps_blh, mask, w1, b1, w2, b2, *, block_b=8, block_l=512):
    """Masked-mean-pool + MLP regression head.

    reps_blh: (B, L+1, H) backbone features, BOS at sequence position 0 (lane-dense H).
    mask:     (B, L) validity mask for the L residues (BOS excluded).
    w1: (H, H), b1: (H,), w2: (H, 1), b2: (1,)   -- head parameters.
    Returns (B,) predictions.
    """
    B, Lp1, H = reps_blh.shape
    L = Lp1 - 1
    assert mask.shape == (B, L)

    # Lane-dense hidden axis (also handles small demo H by zero-padding to 128).
    H_pad = pl.cdiv(H, 128) * 128

    # Batch block: multiple of 8 sublanes; keep >=2 batch blocks when B allows so the
    # "parallel" batch axis can be sharded across v7x's two TensorCores.
    bB = max(8, (min(block_b, max(B, 8)) // 8) * 8)
    if B >= 16 and B // bB < 2:
        bB = max(8, ((B // 2) // 8) * 8)
    B_pad = pl.cdiv(B, bB) * bB

    # Sequence tile: large to amortize per-step pipeline overhead, clamped to the
    # 8-aligned sequence so short inputs are not over-padded.
    block_l = min(block_l, pl.cdiv(Lp1, 8) * 8)
    block_l = max(8, (block_l // 8) * 8)
    L_pad = pl.cdiv(Lp1, block_l) * block_l

    # Single fused pad of the bf16 stream; zero padding covers batch/sequence/hidden
    # tails. No host-side transpose (backbone already emits (B, L+1, H)).
    reps_p = jnp.pad(reps_blh.astype(jnp.bfloat16),
                     ((0, B_pad - B), (0, L_pad - Lp1), (0, H_pad - H)))

    # Leading zero drops the BOS column via the existing multiply (no in-kernel slice);
    # trailing zeros cover tile padding. Shape (B, L_pad, 1): sequence on sublanes.
    mask_p = jnp.pad(mask.astype(jnp.bfloat16),
                     ((0, B_pad - B), (1, L_pad - Lp1)))[..., None]

    # Head weights: f32, zero-padded to H_pad (padding lanes stay exactly zero
    # through the matmul / ReLU / reduce, so results are unchanged).
    w1_p = jnp.pad(w1.astype(jnp.float32), ((0, H_pad - H), (0, H_pad - H)))
    b1_p = jnp.pad(jnp.reshape(b1, (1, -1)).astype(jnp.float32),
                   ((0, 0), (0, H_pad - H)))
    w2_p = jnp.pad(jnp.reshape(w2, (1, -1)).astype(jnp.float32),
                   ((0, 0), (0, H_pad - H)))
    b2_s = jnp.reshape(b2, (1, 1)).astype(jnp.float32)

    grid = (B_pad // bB, L_pad // block_l)

    # VMEM budget derived from actual tiles (reps/mask double-buffered, weights
    # single-buffered) + slack; fits comfortably on v7x's 64 MiB.
    reps_tile = bB * block_l * H_pad * 2
    mask_tile = bB * block_l * 1 * 2
    weight_bytes = (H_pad * H_pad + 2 * H_pad) * 4
    scratch_bytes = bB * (H_pad + 1) * 4
    vmem_limit = int(min(2 * (reps_tile + mask_tile) + weight_bytes + scratch_bytes
                         + (4 << 20), 48 << 20))

    cost = pl.CostEstimate(
        flops=int(2 * B_pad * L_pad * H_pad        # masked partial sums
                  + B_pad * L_pad                  # mask-length reduction
                  + 2 * B_pad * H_pad * H_pad      # Linear(H,H)
                  + 3 * B_pad * H_pad),            # ReLU + Linear(H,1)
        transcendentals=0,
        bytes_accessed=int(2 * (reps_p.size + mask_p.size)
                           + 4 * (w1_p.size + b1_p.size + w2_p.size + b2_s.size)
                           + 4 * B_pad),
    )

    out = pl.pallas_call(
        _reg_head_kernel,
        out_shape=jax.ShapeDtypeStruct((B_pad, 1), jnp.float32),
        grid_spec=pltpu.PrefetchScalarGridSpec(
            num_scalar_prefetch=0,
            grid=grid,
            in_specs=[
                # Streamed inputs (double-buffered by default).
                pl.BlockSpec((bB, block_l, H_pad), lambda b, l: (b, l, 0)),  # reps
                pl.BlockSpec((bB, block_l, 1), lambda b, l: (b, l, 0)),      # mask
                # Constant-index-map weights: fetched once, single-buffered.
                pl.BlockSpec((H_pad, H_pad), lambda b, l: (0, 0),
                             pipeline_mode=pl.Buffered(1)),                  # W1
                pl.BlockSpec((1, H_pad), lambda b, l: (0, 0),
                             pipeline_mode=pl.Buffered(1)),                  # b1
                pl.BlockSpec((1, H_pad), lambda b, l: (0, 0),
                             pipeline_mode=pl.Buffered(1)),                  # W2 row
                pl.BlockSpec(memory_space=pltpu.MemorySpace.SMEM),           # b2 scalar
            ],
            out_specs=pl.BlockSpec((bB, 1), lambda b, l: (b, 0)),
            scratch_shapes=[
                pltpu.VMEM((bB, H_pad), jnp.float32),   # masked-sum accumulator
                pltpu.VMEM((bB, 1), jnp.float32),       # valid-length accumulator
            ],
        ),
        compiler_params=pltpu.CompilerParams(
            dimension_semantics=("parallel", "arbitrary"),
            vmem_limit_bytes=vmem_limit,
        ),
        cost_estimate=cost,
    )(reps_p, mask_p, w1_p, b1_p, w2_p, b2_s)

    return out[:B, 0]                                                        # (B,)


if __name__ == "__main__":
    key = jax.random.PRNGKey(0)
    B, L, H = 2, 200, 32
    k_coords, k_mask, k_enc, k_bos, k_w1, k_b1, k_w2, k_b2 = jax.random.split(key, 8)

    # Module inputs: coords (B, L, 3, 3), mask (B, L).
    coords = jax.random.normal(k_coords, (B, L, 3, 3), dtype=jnp.float32)
    mask_bool = jax.random.uniform(k_mask, (B, L)) > 0.3
    mask_bool = mask_bool.at[:, 0].set(True)        # ensure >=1 valid residue per row
    mask = mask_bool.astype(jnp.float32)

    # TODO(synk): the frozen ESM-IF GVP-transformer backbone + alphabet batch
    # tokenization have no clean Pallas equivalent; replaced by a deterministic frozen
    # linear stub mapping per-residue coords (9 dims) -> hidden features, emitted
    # directly in the (B, L+1, H) lane-dense layout the head streams (BOS prepended).
    w_enc = jax.random.normal(k_enc, (9, H), dtype=jnp.float32) * 0.1
    bos = jax.random.normal(k_bos, (H,), dtype=jnp.float32) * 0.1
    feats = jnp.einsum("bld,dh->blh", coords.reshape(B, L, 9), w_enc)        # (B, L, H)
    reps_blh = jnp.concatenate(
        [jnp.broadcast_to(bos[None, None, :], (B, 1, H)), feats], axis=1)    # (B, L+1, H)

    # Regression head params (nn.Linear default init: U(+-1/sqrt(fan_in))).
    lim = 1.0 / (H ** 0.5)
    w1 = jax.random.uniform(k_w1, (H, H), minval=-lim, maxval=lim, dtype=jnp.float32)
    b1 = jax.random.uniform(k_b1, (H,), minval=-lim, maxval=lim, dtype=jnp.float32)
    w2 = jax.random.uniform(k_w2, (H, 1), minval=-lim, maxval=lim, dtype=jnp.float32)
    b2 = jax.random.uniform(k_b2, (1,), minval=-lim, maxval=lim, dtype=jnp.float32)

    pred = reg_head_forward(reps_blh, mask, w1, b1, w2, b2)    # (B,)
    jax.block_until_ready(pred)

    # Pure-JAX f32 reference. The kernel uses an exact divide; the only approximation
    # left is the intentional bf16 streaming of reps, hence the ~1e-2 tolerance.
    reps_nob = reps_blh[:, 1:, :]
    lengths = jnp.maximum(mask.sum(-1, keepdims=True), 1e-6)
    pooled = (reps_nob * mask[:, :, None]).sum(1) / lengths
    ref = (jnp.maximum(pooled @ w1 + b1[None, :], 0.0) @ w2 + b2)[:, 0]
    assert pred.shape == (B,)
    assert jnp.allclose(pred, ref, atol=2e-2, rtol=2e-2), (pred, ref)

    print("KERNEL_OK")
</pallas_src>

<mosaic_0001>
module attributes {stable_mosaic.version = 11 : i64} {
  func.func @_reg_head_kernel(%arg0: i32, %arg1: i32, %arg2: memref<8x208x128xbf16, #tpu.memory_space<vmem>>, %arg3: memref<8x208x1xbf16, #tpu.memory_space<vmem>>, %arg4: memref<128x128xf32, #tpu.memory_space<vmem>>, %arg5: memref<1x128xf32, #tpu.memory_space<vmem>>, %arg6: memref<1x128xf32, #tpu.memory_space<vmem>>, %arg7: memref<1x1xf32, #tpu.memory_space<smem>>, %arg8: memref<8x1xf32, #tpu.memory_space<vmem>>, %arg9: memref<8x128xf32, #tpu.memory_space<vmem>>, %arg10: memref<8x1xf32, #tpu.memory_space<vmem>>) attributes {dimension_semantics = [#tpu.dimension_semantics<parallel>, #tpu.dimension_semantics<arbitrary>], iteration_bounds = array<i64: 1, 1>, scalar_prefetch = 0 : i64, scratch_operands = 2 : i64, tpu.core_type = #tpu.core_type<tc>, window_params = [{transform_indices = @transform_0, window_bounds = array<i64: 8, 208, 128>}, {transform_indices = @transform_1, window_bounds = array<i64: 8, 208, 1>}, {pipeline_mode = #tpu.pipeline_mode<synchronous>, transform_indices = @transform_2, window_bounds = array<i64: 128, 128>}, {pipeline_mode = #tpu.pipeline_mode<synchronous>, transform_indices = @transform_3, window_bounds = array<i64: 1, 128>}, {pipeline_mode = #tpu.pipeline_mode<synchronous>, transform_indices = @transform_4, window_bounds = array<i64: 1, 128>}, {transform_indices = @transform_5, window_bounds = array<i64: 1, 1>}, {transform_indices = @transform_6, window_bounds = array<i64: 8, 1>}]} {
    %c0_i32 = arith.constant 0 : i32
    %0 = arith.cmpi eq, %arg1, %c0_i32 : i32
    %1 = arith.extui %0 : i1 to i32
    %c0_i32_0 = arith.constant 0 : i32
    %2 = arith.cmpi ne, %1, %c0_i32_0 : i32
    scf.if %2 {
      %cst_17 = arith.constant 0.000000e+00 : f32
      %20 = vector.broadcast %cst_17 : f32 to vector<8x128xf32>
      %c0_18 = arith.constant 0 : index
      %c0_19 = arith.constant 0 : index
      %21 = vector.load %arg9[%c0_18, %c0_19] : memref<8x128xf32, #tpu.memory_space<vmem>>, vector<8x128xf32>
      tpu.vector_store %arg9[%c0_18, %c0_19], %20 {strides = array<i32>} : memref<8x128xf32, #tpu.memory_space<vmem>>, vector<8x128xf32>,
      %cst_20 = arith.constant 0.000000e+00 : f32
      %22 = vector.broadcast %cst_20 : f32 to vector<8x1xf32>
      %c0_21 = arith.constant 0 : index
      %c0_22 = arith.constant 0 : index
      %23 = vector.load %arg10[%c0_21, %c0_22] : memref<8x1xf32, #tpu.memory_space<vmem>>, vector<8x1xf32>
      tpu.vector_store %arg10[%c0_21, %c0_22], %22 {strides = array<i32>} : memref<8x1xf32, #tpu.memory_space<vmem>>, vector<8x1xf32>,
    } else {
    }
    %c0 = arith.constant 0 : index
    %c0_1 = arith.constant 0 : index
    %c0_2 = arith.constant 0 : index
    %3 = vector.load %arg2[%c0, %c0_1, %c0_2] : memref<8x208x128xbf16, #tpu.memory_space<vmem>>, vector<8x208x128xbf16>
    %4 = arith.extf %3 : vector<8x208x128xbf16> to vector<8x208x128xf32>
    %c0_3 = arith.constant 0 : index
    %c0_4 = arith.constant 0 : index
    %c0_5 = arith.constant 0 : index
    %5 = vector.load %arg3[%c0_3, %c0_4, %c0_5] : memref<8x208x1xbf16, #tpu.memory_space<vmem>>, vector<8x208x1xbf16>
    %6 = arith.extf %5 : vector<8x208x1xbf16> to vector<8x208x1xf32>
    %c0_6 = arith.constant 0 : index
    %c0_7 = arith.constant 0 : index
    %7 = vector.load %arg9[%c0_6, %c0_7] : memref<8x128xf32, #tpu.memory_space<vmem>>, vector<8x128xf32>
    %8 = vector.broadcast %6 : vector<8x208x1xf32> to vector<8x208x128xf32>
    %9 = arith.mulf %4, %8 : vector<8x208x128xf32>
    %cst = arith.constant dense<0.000000e+00> : vector<8x128xf32>
    %10 = vector.multi_reduction <add>, %9, %cst [1] : vector<8x208x128xf32> to vector<8x128xf32>
    %11 = arith.addf %7, %10 : vector<8x128xf32>
    %c0_8 = arith.constant 0 : index
    %c0_9 = arith.constant 0 : index
    %12 = vector.load %arg9[%c0_8, %c0_9] : memref<8x128xf32, #tpu.memory_space<vmem>>, vector<8x128xf32>
    tpu.vector_store %arg9[%c0_8, %c0_9], %11 {strides = array<i32>} : memref<8x128xf32, #tpu.memory_space<vmem>>, vector<8x128xf32>,
    %c0_10 = arith.constant 0 : index
    %c0_11 = arith.constant 0 : index
    %13 = vector.load %arg10[%c0_10, %c0_11] : memref<8x1xf32, #tpu.memory_space<vmem>>, vector<8x1xf32>
    %cst_12 = arith.constant dense<0.000000e+00> : vector<8x1xf32>
    %14 = vector.multi_reduction <add>, %6, %cst_12 [1] : vector<8x208x1xf32> to vector<8x1xf32>
    %15 = arith.addf %13, %14 : vector<8x1xf32>
    %c0_13 = arith.constant 0 : index
    %c0_14 = arith.constant 0 : index
    %16 = vector.load %arg10[%c0_13, %c0_14] : memref<8x1xf32, #tpu.memory_space<vmem>>, vector<8x1xf32>
    tpu.vector_store %arg10[%c0_13, %c0_14], %15 {strides = array<i32>} : memref<8x1xf32, #tpu.memory_space<vmem>>, vector<8x1xf32>,
    %c0_i32_15 = arith.constant 0 : i32
    %17 = arith.cmpi eq, %arg1, %c0_i32_15 : i32
    %18 = arith.extui %17 : i1 to i32
    %c0_i32_16 = arith.constant 0 : i32
    %19 = arith.cmpi ne, %18, %c0_i32_16 : i32
    scf.if %19 {
      %c0_17 = arith.constant 0 : index
      %c0_18 = arith.constant 0 : index
      %20 = vector.load %arg10[%c0_17, %c0_18] : memref<8x1xf32, #tpu.memory_space<vmem>>, vector<8x1xf32>
      %cst_19 = arith.constant 9.99999997E-7 : f32
      %21 = vector.broadcast %cst_19 : f32 to vector<8x1xf32>
      %22 = arith.maximumf %20, %21 : vector<8x1xf32>
      %c0_20 = arith.constant 0 : index
      %c0_21 = arith.constant 0 : index
      %23 = vector.load %arg9[%c0_20, %c0_21] : memref<8x128xf32, #tpu.memory_space<vmem>>, vector<8x128xf32>
      %24 = vector.broadcast %22 : vector<8x1xf32> to vector<8x128xf32>
      %25 = arith.divf %23, %24 : vector<8x128xf32>
      %c0_22 = arith.constant 0 : index
      %c0_23 = arith.constant 0 : index
      %26 = vector.load %arg4[%c0_22, %c0_23] : memref<128x128xf32, #tpu.memory_space<vmem>>, vector<128x128xf32>
      %cst_24 = arith.constant dense<0.000000e+00> : vector<8x128xf32>
      %27 = tpu.matmul %25, %26, %cst_24 {dimension_numbers = #tpu.dot_dimension_numbers<[1], [0], [0], [1], [0, 0, 1, 1], [], []>} : vector<8x128xf32>, vector<128x128xf32>, vector<8x128xf32> -> vector<8x128xf32>
      %c0_25 = arith.constant 0 : index
      %c0_26 = arith.constant 0 : index
      %28 = vector.load %arg5[%c0_25, %c0_26] : memref<1x128xf32, #tpu.memory_space<vmem>>, vector<1x128xf32>
      %29 = vector.broadcast %28 : vector<1x128xf32> to vector<8x128xf32>
      %30 = arith.addf %27, %29 : vector<8x128xf32>
      %cst_27 = arith.constant 0.000000e+00 : f32
      %31 = vector.broadcast %cst_27 : f32 to vector<8x128xf32>
      %32 = arith.maximumf %30, %31 : vector<8x128xf32>
      %c0_28 = arith.constant 0 : index
      %c0_29 = arith.constant 0 : index
      %33 = vector.load %arg6[%c0_28, %c0_29] : memref<1x128xf32, #tpu.memory_space<vmem>>, vector<1x128xf32>
      %34 = vector.broadcast %33 : vector<1x128xf32> to vector<8x128xf32>
      %35 = arith.mulf %32, %34 : vector<8x128xf32>
      %cst_30 = arith.constant dense<0.000000e+00> : vector<8xf32>
      %36 = vector.multi_reduction <add>, %35, %cst_30 [1] : vector<8x128xf32> to vector<8xf32>
      %37 = vector.shape_cast %36 : vector<8xf32> to vector<8x1xf32>
      %c0_31 = arith.constant 0 : index
      %c0_32 = arith.constant 0 : index
      %38 = memref.load %arg7[%c0_31, %c0_32] : memref<1x1xf32, #tpu.memory_space<smem>>
      %39 = vector.broadcast %38 : f32 to vector<8x1xf32>
      %40 = arith.addf %37, %39 : vector<8x1xf32>
      %c0_33 = arith.constant 0 : index
      %c0_34 = arith.constant 0 : index
      %41 = vector.load %arg8[%c0_33, %c0_34] : memref<8x1xf32, #tpu.memory_space<vmem>>, vector<8x1xf32>
      tpu.vector_store %arg8[%c0_33, %c0_34], %40 {strides = array<i32>} : memref<8x1xf32, #tpu.memory_space<vmem>>, vector<8x1xf32>,
    } else {
    }
    return
  }
  func.func @transform_0(%arg0: i32, %arg1: i32) -> (i32, i32, i32) {
    %c0_i32 = arith.constant 0 : i32
    %c0_i32_0 = arith.constant 0 : i32
    return %arg0, %arg1, %c0_i32 : i32, i32, i32
  }
  func.func @transform_1(%arg0: i32, %arg1: i32) -> (i32, i32, i32) {
    %c0_i32 = arith.constant 0 : i32
    %c0_i32_0 = arith.constant 0 : i32
    return %arg0, %arg1, %c0_i32 : i32, i32, i32
  }
  func.func @transform_2(%arg0: i32, %arg1: i32) -> (i32, i32) {
    %c0_i32 = arith.constant 0 : i32
    %c0_i32_0 = arith.constant 0 : i32
    %c0_i32_1 = arith.constant 0 : i32
    return %c0_i32, %c0_i32_0 : i32, i32
  }
  func.func @transform_3(%arg0: i32, %arg1: i32) -> (i32, i32) {
    %c0_i32 = arith.constant 0 : i32
    %c0_i32_0 = arith.constant 0 : i32
    %c0_i32_1 = arith.constant 0 : i32
    return %c0_i32, %c0_i32_0 : i32, i32
  }
  func.func @transform_4(%arg0: i32, %arg1: i32) -> (i32, i32) {
    %c0_i32 = arith.constant 0 : i32
    %c0_i32_0 = arith.constant 0 : i32
    %c0_i32_1 = arith.constant 0 : i32
    return %c0_i32, %c0_i32_0 : i32, i32
  }
  func.func @transform_5(%arg0: i32, %arg1: i32) -> (i32, i32) {
    %c0_i32 = arith.constant 0 : i32
    %c0_i32_0 = arith.constant 0 : i32
    %c0_i32_1 = arith.constant 0 : i32
    return %c0_i32, %c0_i32_0 : i32, i32
  }
  func.func @transform_6(%arg0: i32, %arg1: i32) -> (i32, i32) {
    %c0_i32 = arith.constant 0 : i32
    %c0_i32_0 = arith.constant 0 : i32
    return %arg0, %c0_i32 : i32, i32
  }
}

</mosaic_0001>

<bundles_post_ra>
// kernel: tpu_custom_call.1
= control target key start
LH: loop header
LB: loop body
LE: loop exit
PB: predicated region body
PF: predicated region fallthrough
CT: control target
= control target key end

     0   :  { %12 = vsyncpa [#allocation6], 0  ;;  %s4556_s24 = smov [#allocation5]   ;;  %s4557_s26 = smov 128   ;;  %s6270_s0 = inlined_call_operand.vmem [shape: bf16[8,208,128], index: 0, kind: input, shape index: {}]   ;;  %s6271_s1 = inlined_call_operand.vmem [shape: bf16[8,208,1], index: 1, kind: input, shape index: {}]   ;;  %s6272_s2 = inlined_call_operand.hbm [shape: f32[128,128], index: 2, kind: input, shape index: {}]   ;;  %s6273_s3 = inlined_call_operand.vmem [shape: f32[1,128], index: 3, kind: input, shape index: {}]   ;;  %s6274_s4 = inlined_call_operand.vmem [shape: f32[1,128], index: 4, kind: input, shape index: {}]   ;;  %s6275_s5 = inlined_call_operand.<no memory space> [shape: f32[1,1], index: 5, kind: input, shape index: {}]   ;;  %s6276_s6 = inlined_call_operand.vmem [shape: f32[8,1], index: 6, kind: output, shape index: {}]  }
   0x1   :  { %s21_s23 = sshll.u32 %s6272_s2, 4  ;;  %s23_s25 = sshll.u32 %s4556_s24, 4  ;;  %s22_s23 = int_to_ptr.hbm [resolvable:$true] %s21_s23  ;;  %s24_s25 = int_to_ptr.vmem [resolvable:$true] %s23_s25 }
   0x2   :  { %s4558_s27 = smov 8  }
   0x3   :  { %29 = dma.hbm_to_vmem [thread:$0]  %s22_s23, 2048, %s24_s25, [#allocation6], %s4557_s26, %s4557_s26, %s4558_s27  }
   0x4   :  { %4554 = dma.done.wait [#allocation6], 2048  }
   0x5   :  { %4555 = vsyncadd [#allocation6], 4294965248  ;;  %v4559_v0 = vmov 0   ;;  %vm45_vm0 = vcmask 7168   ;;  %v4602_v1 = vld [vmem:[%s6271_s1 + $0x20] sm:$0xff]   ;;  %v3896_v2 = vld [vmem:[%s6271_s1 + $0x10] sm:$0xff]  }
   0x6   :  { %4025 = vset.pattern.permute.xlu2 %v4559_v0  ;;  %4014 = vset.pattern.permute.xlu1 %v4559_v0  ;;  %v3377_v3 = vld [vmem:[%s6271_s1] sm:$0xff]   ;;  %v3394_v4 = vunpack.c.l.bf16 %v4602_v1  ;;  %v3395_v5 = vunpack.c.h.bf16 %v4602_v1  ;;  %v3386_v6 = vunpack.c.l.bf16 %v3896_v2  ;;  %v3387_v7 = vunpack.c.h.bf16 %v3896_v2  ;;  %v4615_v10 = vld [vmem:[%s6271_s1 + $0x28] sm:$0xff]   ;;  %v3897_v12 = vld [vmem:[%s6271_s1 + $0x18] sm:$0xff]  }
   0x7   :  { %4003 = vset.pattern.permute.xlu0 %v4559_v0  ;;  %v3378_v8 = vunpack.c.l.bf16 %v3377_v3  ;;  %v3379_v9 = vunpack.c.h.bf16 %v3377_v3  ;;  %v3895_v13 = vld [vmem:[%s6271_s1 + $0x8] sm:$0xff]   ;;  %v3398_v18 = vunpack.c.l.bf16 %v4615_v10  ;;  %v3399_v19 = vunpack.c.h.bf16 %v4615_v10  ;;  %v4635_v32 = vld [vmem:[%s6271_s1 + $0x40] sm:$0xff]   ;;  %v4640_v33 = vld [vmem:[%s6271_s1 + $0x38] sm:$0xff]  }
   0x8   :  { %v4026_v11 = vpack.i.bf16 %v3395_v5, %v3394_v4  ;;  %v4015_v14 = vpack.i.bf16 %v3387_v7, %v3386_v6  ;;  %v3390_v21 = vunpack.c.l.bf16 %v3897_v12  ;;  %v3391_v22 = vunpack.c.h.bf16 %v3897_v12  ;;  %v3900_v35 = vld [vmem:[%s6271_s1 + $0x30] sm:$0xff]   ;;  %v3907_v46 = vld [vmem:[%s6271_s1 + $0x68] sm:$0xff]   ;;  %v4665_v51 = vld [vmem:[%s6271_s1 + $0x58] sm:$0xff]  }
   0x9   :  { %v2404_v15 = vsel %vm45_vm0, %v3379_v9, 0.0  ;;  %v4004_v16 = vpack.i.bf16 %v3379_v9, %v3378_v8  ;;  %v2403_v17 = vsel %vm45_vm0, %v3378_v8, 0.0  ;;  %v3382_v23 = vunpack.c.l.bf16 %v3895_v13  ;;  %v3908_v48 = vld [vmem:[%s6271_s1 + $0x70] sm:$0xff]   ;;  %v4677_v59 = vld [vmem:[%s6271_s1 + $0x48] sm:$0xff]   ;;  %v4702_v10 = vld [vmem:[%s6271_s1 + $0x60] sm:$0xff]  }
   0xa   :  { %4027 = vperm.xlu2 %4025, %v4026_v11   ;;  %4016 = vperm.xlu1 %4014, %v4015_v14   ;;  %v2405_v20 = vadd.f32 %v2404_v15, %v2403_v17  ;;  %v3383_v24 = vunpack.c.h.bf16 %v3895_v13  ;;  %v4031_v26 = vpack.i.bf16 %v3399_v19, %v3398_v18  ;;  %v2410_v29 = vsel %vm45_vm0, %v3386_v6, 0.0  ;;  %v4671_v55 = vld [vmem:[%s6271_s1 + $0x50] sm:$0xff]  }
   0xb   :  { %4005 = vperm.xlu0 %4003, %v4004_v16   ;;  %v2406_v25 = vsel %vm45_vm0, %v3382_v23, 0.0  ;;  %v4020_v30 = vpack.i.bf16 %v3391_v22, %v3390_v21  ;;  %v2412_v36 = vsel %vm45_vm0, %v3387_v7, 0.0  ;;  %v3410_v38 = vunpack.c.l.bf16 %v4635_v32 }
   0xc   :  { %v2408_v27 = vsel %vm45_vm0, %v3383_v24, 0.0  ;;  %v2407_v28 = vadd.f32 %v2406_v25, %v2405_v20  ;;  %v4009_v31 = vpack.i.bf16 %v3383_v24, %v3382_v23  ;;  %v3411_v39 = vunpack.c.h.bf16 %v4635_v32 }
   0xd   :  { %v3406_v40 = vunpack.c.l.bf16 %v4640_v33  ;;  %v2414_v41 = vsel %vm45_vm0, %v3390_v21, 0.0  ;;  %v3407_v42 = vunpack.c.h.bf16 %v4640_v33  ;;  %v3402_v43 = vunpack.c.l.bf16 %v3900_v35  ;;  %v3911_v33 = vld [vmem:[%s6271_s1 + $0x88] sm:$0xff]  }
   0xe   :  { %v2409_v34 = vadd.f32 %v2408_v27, %v2407_v28  ;;  %v3403_v44 = vunpack.c.h.bf16 %v3900_v35  ;;  %v2416_v47 = vsel %vm45_vm0, %v3391_v22, 0.0  ;;  %v4046_v50 = vpack.i.bf16 %v3411_v39, %v3410_v38  ;;  %v3909_v27 = vld [vmem:[%s6271_s1 + $0x78] sm:$0xff]  }
   0xf   :  { %v2418_v52 = vsel %vm45_vm0, %v3394_v4, 0.0  ;;  %v4041_v53 = vpack.i.bf16 %v3407_v42, %v3406_v40  ;;  %v3430_v56 = vunpack.c.l.bf16 %v3907_v46  ;;  %v2420_v57 = vsel %vm45_vm0, %v3395_v5, 0.0 }
  0x10   :  { %v2411_v37 = vadd.f32 %v2410_v29, %v2409_v34  ;;  %v4036_v54 = vpack.i.bf16 %v3403_v44, %v3402_v43  ;;  %v3434_v60 = vunpack.c.l.bf16 %v3908_v48  ;;  %v3431_v61 = vunpack.c.h.bf16 %v3907_v46 }
  0x11   :  { %v2422_v62 = vsel %vm45_vm0, %v3398_v18, 0.0  ;;  %v3422_v63 = vunpack.c.l.bf16 %v4665_v51  ;;  %v3423_v0 = vunpack.c.h.bf16 %v4665_v51  ;;  %v2460_v1 = vsel %vm45_vm0, %v3430_v56, 0.0  ;;  %v3916_v51 = vld [vmem:[%s6271_s1 + $0xb0] sm:$0xff]  }
  0x12   :  { %4032 = vperm.xlu2 %4025, %v4031_v26   ;;  %4021 = vperm.xlu1 %4014, %v4020_v30   ;;  %v2413_v45 = vadd.f32 %v2412_v36, %v2411_v37  ;;  %v3418_v3 = vunpack.c.l.bf16 %v4671_v55  ;;  %v2463_v4 = vsel %vm45_vm0, %v3434_v60, 0.0  ;;  %v2461_v5 = vsel %vm45_vm0, %v3431_v61, 0.0  ;;  %v3910_v37 = vld [vmem:[%s6271_s1 + $0x80] sm:$0xff]  }
  0x13   :  { %4010 = vperm.xlu0 %4003, %v4009_v31   ;;  %v3419_v6 = vunpack.c.h.bf16 %v4671_v55  ;;  %v3414_v7 = vunpack.c.l.bf16 %v4677_v59  ;;  %v3415_v8 = vunpack.c.h.bf16 %v4677_v59  ;;  %v2462_v9 = vadd.f32 %v2461_v5, %v2460_v1 }
  0x14   :  { %v2415_v49 = vadd.f32 %v2414_v41, %v2413_v45  ;;  %v2424_v12 = vsel %vm45_vm0, %v3399_v19, 0.0  ;;  %v4061_v15 = vpack.i.bf16 %v3423_v0, %v3422_v63  ;;  %v2426_v16 = vsel %vm45_vm0, %v3402_v43, 0.0 }
  0x15   :  { %v2464_v13 = vadd.f32 %v2463_v4, %v2462_v9  ;;  %v4056_v17 = vpack.i.bf16 %v3419_v6, %v3418_v3  ;;  %v4051_v18 = vpack.i.bf16 %v3415_v8, %v3414_v7  ;;  %v2428_v19 = vsel %vm45_vm0, %v3403_v44, 0.0  ;;  %v3912_v9 = vld [vmem:[%s6271_s1 + $0x90] sm:$0xff]  }
  0x16   :  { %v2417_v58 = vadd.f32 %v2416_v47, %v2415_v49  ;;  %v3435_v22 = vunpack.c.h.bf16 %v3908_v48  ;;  %v2430_v23 = vsel %vm45_vm0, %v3406_v40, 0.0  ;;  %v3426_v24 = vunpack.c.l.bf16 %v4702_v10  ;;  %v4733_v47 = vld [vmem:[%s6271_s1 + $0xd0] sm:$0xff]  }
  0x17   :  { %v3427_v25 = vunpack.c.h.bf16 %v4702_v10  ;;  %v2432_v28 = vsel %vm45_vm0, %v3407_v42, 0.0  ;;  %v2434_v34 = vsel %vm45_vm0, %v3410_v38, 0.0  ;;  %v4071_v35 = vpack.i.bf16 %v3431_v61, %v3430_v56 }
  0x18   :  { %v2419_v2 = vadd.f32 %v2418_v52, %v2417_v58  ;;  %v2465_v30 = vsel %vm45_vm0, %v3435_v22, 0.0  ;;  %v4076_v31 = vpack.i.bf16 %v3435_v22, %v3434_v60  ;;  %v3438_v40 = vunpack.c.l.bf16 %v3909_v27 }
  0x19   :  { %v4066_v36 = vpack.i.bf16 %v3427_v25, %v3426_v24  ;;  %v2436_v41 = vsel %vm45_vm0, %v3411_v39, 0.0  ;;  %v3439_v43 = vunpack.c.h.bf16 %v3909_v27  ;;  %v3446_v44 = vunpack.c.l.bf16 %v3911_v33 }
  0x1a   :  { %4047 = vperm.xlu2 %4025, %v4046_v50   ;;  %4042 = vperm.xlu1 %4014, %v4041_v53   ;;  %v2421_v11 = vadd.f32 %v2420_v57, %v2419_v2  ;;  %v3447_v45 = vunpack.c.h.bf16 %v3911_v33  ;;  %v2466_v38 = vadd.f32 %v2465_v30, %v2464_v13  ;;  %v2467_v46 = vsel %vm45_vm0, %v3438_v40, 0.0  ;;  %v3914_v2 = vld [vmem:[%s6271_s1 + $0xa0] sm:$0xff]  }
  0x1b   :  { %4037 = vperm.xlu0 %4003, %v4036_v54   ;;  %v3442_v49 = vunpack.c.l.bf16 %v3910_v37  ;;  %v2469_v50 = vsel %vm45_vm0, %v3439_v43, 0.0  ;;  %v2438_v32 = vsel %vm45_vm0, %v3414_v7, 0.0  ;;  %v3443_v39 = vunpack.c.h.bf16 %v3910_v37 }
  0x1c   :  { %v2423_v14 = vadd.f32 %v2422_v62, %v2421_v11  ;;  %v2468_v52 = vadd.f32 %v2467_v46, %v2466_v38  ;;  %v3482_v56 = vunpack.c.l.bf16 %v4733_v47  ;;  %v3483_v57 = vunpack.c.h.bf16 %v4733_v47 }
  0x1d   :  { %v2471_v54 = vsel %vm45_vm0, %v3442_v49, 0.0  ;;  %v2442_v58 = vsel %vm45_vm0, %v3418_v3, 0.0  ;;  %v2440_v59 = vsel %vm45_vm0, %v3415_v8, 0.0  ;;  %v4091_v60 = vpack.i.bf16 %v3447_v45, %v3446_v44 }
  0x1e   :  { %v2425_v20 = vadd.f32 %v2424_v12, %v2423_v14  ;;  %v2470_v61 = vadd.f32 %v2469_v50, %v2468_v52  ;;  %v2473_v1 = vsel %vm45_vm0, %v3443_v39, 0.0  ;;  %v2518_v4 = vsel %vm45_vm0, %v3483_v57, 0.0  ;;  %v3913_v14 = vld [vmem:[%s6271_s1 + $0x98] sm:$0xff]  }
  0x1f   :  { %v2517_v5 = vsel %vm45_vm0, %v3482_v56, 0.0  ;;  %v4086_v3 = vpack.i.bf16 %v3443_v39, %v3442_v49  ;;  %v4081_v7 = vpack.i.bf16 %v3439_v43, %v3438_v40  ;;  %v2475_v13 = vsel %vm45_vm0, %v3446_v44, 0.0 }
  0x20   :  { %v2427_v21 = vadd.f32 %v2426_v16, %v2425_v20  ;;  %v2472_v8 = vadd.f32 %v2471_v54, %v2470_v61  ;;  %v4755_v11 = vadd.f32 %v2518_v4, %v2517_v5  ;;  %v2444_v16 = vsel %vm45_vm0, %v3419_v6, 0.0  ;;  %v4799_v61 = vld [vmem:[%s6271_s1 + $0xc8] sm:$0xff]   ;;  %v3922_v5 = vld [vmem:[%s6271_s1 + $0xe0] sm:$0xff]  }
  0x21   :  { %v3450_v22 = vunpack.c.l.bf16 %v3912_v9  ;;  %v3451_v27 = vunpack.c.h.bf16 %v3912_v9  ;;  %v2448_v55 = vsel %vm45_vm0, %v3423_v0, 0.0  ;;  %v2452_v43 = vsel %vm45_vm0, %v3427_v25, 0.0 }
  0x22   :  { %4062 = vperm.xlu2 %4025, %v4061_v15   ;;  %4057 = vperm.xlu1 %4014, %v4056_v17   ;;  %v2429_v26 = vadd.f32 %v2428_v19, %v2427_v21  ;;  %v2446_v15 = vsel %vm45_vm0, %v3422_v63, 0.0  ;;  %v2474_v17 = vadd.f32 %v2473_v1, %v2472_v8  ;;  %v2477_v19 = vsel %vm45_vm0, %v3447_v45, 0.0 }
  0x23   :  { %4052 = vperm.xlu0 %4003, %v4051_v18   ;;  %v3458_v18 = vunpack.c.l.bf16 %v3914_v2  ;;  %v3459_v21 = vunpack.c.h.bf16 %v3914_v2  ;;  %v2479_v63 = vsel %vm45_vm0, %v3450_v22, 0.0  ;;  %v2481_v33 = vsel %vm45_vm0, %v3451_v27, 0.0  ;;  %v3918_v2 = vld [vmem:[%s6271_s1 + $0xc0] sm:$0xff]  }
  0x24   :  { %v2431_v29 = vadd.f32 %v2430_v23, %v2429_v26  ;;  %v3454_v23 = vunpack.c.l.bf16 %v3913_v14  ;;  %v3455_v26 = vunpack.c.h.bf16 %v3913_v14  ;;  %v4096_v37 = vpack.i.bf16 %v3451_v27, %v3450_v22  ;;  %v3923_v22 = vld [vmem:[%s6271_s1 + $0xe8] sm:$0xff]  }
  0x25   :  { %v3467_v50 = vunpack.c.h.bf16 %v3916_v51  ;;  %v2487_v10 = vsel %vm45_vm0, %v3458_v18, 0.0  ;;  %v3474_v14 = vunpack.c.l.bf16 %v3918_v2  ;;  %v4136_v27 = vpack.i.bf16 %v3483_v57, %v3482_v56 }
  0x26   :  { %v2433_v42 = vadd.f32 %v2432_v28, %v2431_v29  ;;  %v2476_v28 = vadd.f32 %v2475_v13, %v2474_v17  ;;  %v2485_v38 = vsel %vm45_vm0, %v3455_v26, 0.0  ;;  %v3479_v13 = vunpack.c.h.bf16 %v4799_v61 }
  0x27   :  { %v3490_v17 = vunpack.c.l.bf16 %v3922_v5  ;;  %v3495_v57 = vunpack.c.h.bf16 %v3923_v22  ;;  %vm2384_vm1 = vcmask 1041409   ;;  %vm2386_vm2 = vcmask 1042434  }
  0x28   :  { %v2435_v48 = vadd.f32 %v2434_v34, %v2433_v42  ;;  %v2478_v6 = vadd.f32 %v2477_v19, %v2476_v28  ;;  %v4776_v34 = vld [vmem:[%s6271_s1 + $0xb8] sm:$0xff]   ;;  %v3915_v42 = vld [vmem:[%s6271_s1 + $0xa8] sm:$0xff]   ;;  %v2497_v19 = vsel %vm45_vm0, %v3467_v50, 0.0  ;;  %v3491_v28 = vunpack.c.h.bf16 %v3922_v5 }
  0x29   :  { %v3471_v46 = vunpack.c.h.bf16 %v4776_v34  ;;  %v3463_v39 = vunpack.c.h.bf16 %v3915_v42  ;;  %vm2388_vm3 = vcmask 1043459   ;;  %vm2390_vm4 = vcmask 1044484  }
  0x2a   :  { %4077 = vperm.xlu2 %4025, %v4076_v31   ;;  %4072 = vperm.xlu1 %4014, %v4071_v35   ;;  %v2437_v53 = vadd.f32 %v2436_v41, %v2435_v48  ;;  %v4106_v31 = vpack.i.bf16 %v3459_v21, %v3458_v18  ;;  %v2450_v35 = vsel %vm45_vm0, %v3426_v24, 0.0  ;;  %v2480_v40 = vadd.f32 %v2479_v63, %v2478_v6 }
  0x2b   :  { %4067 = vperm.xlu0 %4003, %v4066_v36   ;;  %v4101_v36 = vpack.i.bf16 %v3455_v26, %v3454_v23  ;;  %v2483_v41 = vsel %vm45_vm0, %v3454_v23, 0.0  ;;  %v3470_v24 = vunpack.c.l.bf16 %v4776_v34  ;;  %v3466_v48 = vunpack.c.l.bf16 %v3916_v51 }
  0x2c   :  { %v2439_v62 = vadd.f32 %v2438_v32, %v2437_v53  ;;  %v2482_v44 = vadd.f32 %v2481_v33, %v2480_v40  ;;  %v3462_v32 = vunpack.c.l.bf16 %v3915_v42  ;;  %v2489_v53 = vsel %vm45_vm0, %v3459_v21, 0.0 }
  0x2d   :  { %v4121_v54 = vpack.i.bf16 %v3471_v46, %v3470_v24  ;;  %v3494_v33 = vunpack.c.l.bf16 %v3923_v22  ;;  %v2526_v34 = vsel %vm45_vm0, %v3491_v28, 0.0  ;;  %v2501_v56 = vsel %vm45_vm0, %v3471_v46, 0.0 }
  0x2e   :  { %v2441_v12 = vadd.f32 %v2440_v59, %v2439_v62  ;;  %v2484_v49 = vadd.f32 %v2483_v41, %v2482_v44  ;;  %v4111_v59 = vpack.i.bf16 %v3463_v39, %v3462_v32  ;;  %v4804_v62 = vld [vmem:[%s6271_s1 + $0xd8] sm:$0xff]   ;;  %v2491_v1 = vsel %vm45_vm0, %v3462_v32, 0.0 }
  0x2f   :  { %v3486_v8 = vunpack.c.l.bf16 %v4804_v62  ;;  %v3487_v9 = vunpack.c.h.bf16 %v4804_v62  ;;  %v2530_v41 = vsel %vm45_vm0, %v3495_v57, 0.0  ;;  %v3929_v62 = vld [vmem:[%s6271_s1 + $0x118] sm:$0xff]   ;;  %vm2392_vm5 = vcmask 1045509  }
  0x30   :  { %v2443_v20 = vadd.f32 %v2442_v58, %v2441_v12  ;;  %v2486_v25 = vadd.f32 %v2485_v38, %v2484_v49  ;;  %v4116_v58 = vpack.i.bf16 %v3467_v50, %v3466_v48  ;;  %v3925_v38 = vld [vmem:[%s6271_s1 + $0xf8] sm:$0xff]   ;;  %v4151_v49 = vpack.i.bf16 %v3495_v57, %v3494_v33 }
  0x31   :  { %v2522_v18 = vsel %vm45_vm0, %v3487_v9, 0.0  ;;  %vm2394_vm6 = vcmask 1046534   ;;  %vm2396_vm7 = vcmask 1047559  }
  0x32   :  { %4092 = vperm.xlu2 %4025, %v4091_v60   ;;  %4087 = vperm.xlu1 %4014, %v4086_v3   ;;  %v2445_v29 = vadd.f32 %v2444_v16, %v2443_v20  ;;  %v2488_v60 = vadd.f32 %v2487_v10, %v2486_v25  ;;  %v2493_v3 = vsel %vm45_vm0, %v3463_v39, 0.0  ;;  %v2495_v16 = vsel %vm45_vm0, %v3466_v48, 0.0 }
  0x33   :  { %4082 = vperm.xlu0 %4003, %v4081_v7   ;;  %v3478_v7 = vunpack.c.l.bf16 %v4799_v61  ;;  %v2520_v20 = vsel %vm45_vm0, %v3486_v8, 0.0  ;;  %v4141_v10 = vpack.i.bf16 %v3487_v9, %v3486_v8  ;;  %v3927_v9 = vld [vmem:[%s6271_s1 + $0x108] sm:$0xff]  }
  0x34   :  { %v2447_v30 = vadd.f32 %v2446_v15, %v2445_v29  ;;  %v2490_v4 = vadd.f32 %v2489_v53, %v2488_v60  ;;  %v3475_v15 = vunpack.c.h.bf16 %v3918_v2  ;;  %v2521_v23 = vadd.f32 %v2520_v20, %v4755_v11 }
  0x35   :  { %v2524_v29 = vsel %vm45_vm0, %v3490_v17, 0.0  ;;  %v2509_v2 = vsel %vm45_vm0, %v3479_v13, 0.0  ;;  %v3510_v22 = vunpack.c.l.bf16 %v3927_v9 }
  0x36   :  { %v2449_v0 = vadd.f32 %v2448_v55, %v2447_v30  ;;  %v2492_v12 = vadd.f32 %v2491_v1, %v2490_v4  ;;  %v4131_v55 = vpack.i.bf16 %v3479_v13, %v3478_v7  ;;  %v4126_v6 = vpack.i.bf16 %v3475_v15, %v3474_v14 }
  0x37   :  { %v2523_v30 = vadd.f32 %v2522_v18, %v2521_v23  ;;  %v2505_v44 = vsel %vm45_vm0, %v3475_v15, 0.0  ;;  %v3503_v4 = vunpack.c.h.bf16 %v3925_v38  ;;  %v3518_v13 = vunpack.c.l.bf16 %v3929_v62 }
  0x38   :  { %v2451_v45 = vadd.f32 %v2450_v35, %v2449_v0  ;;  %v2494_v21 = vadd.f32 %v2493_v3, %v2492_v12  ;;  %v2503_v0 = vsel %vm45_vm0, %v3474_v14, 0.0  ;;  %v3928_v3 = vld [vmem:[%s6271_s1 + $0x110] sm:$0xff]   ;;  %v3519_v15 = vunpack.c.h.bf16 %v3929_v62 }
  0x39   :  { %v2525_v11 = vadd.f32 %v2524_v29, %v2523_v30  ;;  %v2538_v14 = vsel %vm45_vm0, %v3503_v4, 0.0  ;;  %v3514_v18 = vunpack.c.l.bf16 %v3928_v3  ;;  %v3515_v20 = vunpack.c.h.bf16 %v3928_v3  ;;  %v4917_v3 = vld [vmem:[%s6271_s1 + $0x160] sm:$0xff]  }
  0x3a   :  { %4107 = vperm.xlu2 %4025, %v4106_v31   ;;  %4102 = vperm.xlu1 %4014, %v4101_v36   ;;  %v2453_v52 = vadd.f32 %v2452_v43, %v2451_v45  ;;  %v2496_v63 = vadd.f32 %v2495_v16, %v2494_v21  ;;  %v2499_v31 = vsel %vm45_vm0, %v3470_v24, 0.0  ;;  %v3924_v36 = vld [vmem:[%s6271_s1 + $0xf0] sm:$0xff]   ;;  %v2507_v43 = vsel %vm45_vm0, %v3478_v7, 0.0  ;;  %v3926_v45 = vld [vmem:[%s6271_s1 + $0x100] sm:$0xff]  }
  0x3b   :  { %4097 = vperm.xlu0 %4003, %v4096_v37   ;;  %v2528_v37 = vsel %vm45_vm0, %v3494_v33, 0.0  ;;  %v2527_v51 = vadd.f32 %v2526_v34, %v2525_v11  ;;  %v3498_v42 = vunpack.c.l.bf16 %v3924_v36  ;;  %v3499_v50 = vunpack.c.h.bf16 %v3924_v36  ;;  %v3932_v33 = vld [vmem:[%s6271_s1 + $0x130] sm:$0xff]  }
  0x3c   :  { %v2454_v26 = vrot.slane %v2453_v52, 4  ;;  %v2498_v35 = vadd.f32 %v2497_v19, %v2496_v63  ;;  %v3506_v53 = vunpack.c.l.bf16 %v3926_v45  ;;  %v3511_v23 = vunpack.c.h.bf16 %v3927_v9 }
  0x3d   :  { %v2529_v46 = vadd.f32 %v2528_v37, %v2527_v51  ;;  %v2532_v32 = vsel %vm45_vm0, %v3498_v42, 0.0  ;;  %v4176_v30 = vpack.i.bf16 %v3515_v20, %v3514_v18  ;;  %v2544_v36 = vsel %vm45_vm0, %v3510_v22, 0.0  ;;  %v3931_v51 = vld [vmem:[%s6271_s1 + $0x128] sm:$0xff]  }
  0x3e   :  { %v2455_v47 = vadd.f32 %v2454_v26, %v2453_v52  ;;  %v2500_v40 = vadd.f32 %v2499_v31, %v2498_v35  ;;  %v4146_v52 = vpack.i.bf16 %v3491_v28, %v3490_v17  ;;  %v2540_v21 = vsel %vm45_vm0, %v3506_v53, 0.0 }
  0x3f   :  { %v2531_v25 = vadd.f32 %v2530_v41, %v2529_v46  ;;  %v4156_v28 = vpack.i.bf16 %v3499_v50, %v3498_v42  ;;  %v4868_v35 = vsel %vm45_vm0, %v3519_v15, 0.0  ;;  %v4171_v11 = vpack.i.bf16 %v3511_v23, %v3510_v22 }
  0x40   :  { %v2502_v24 = vadd.f32 %v2501_v56, %v2500_v40  ;;  %v2456_v48 = vrot.slane %v2455_v47, 2  ;;  %v2552_v57 = vsel %vm45_vm0, %v3518_v13, 0.0  ;;  %v2550_v37 = vsel %vm45_vm0, %v3515_v20, 0.0 }
  0x41   :  { %v2533_v61 = vadd.f32 %v2532_v32, %v2531_v25  ;;  %v2548_v41 = vsel %vm45_vm0, %v3514_v18, 0.0  ;;  %v2546_v42 = vsel %vm45_vm0, %v3511_v23, 0.0  ;;  %v3527_v32 = vunpack.c.h.bf16 %v3931_v51  ;;  %v3930_v25 = vld [vmem:[%s6271_s1 + $0x120] sm:$0xff]   ;;  %v3936_v18 = vld [vmem:[%s6271_s1 + $0x150] sm:$0xff]  }
  0x42   :  { %4122 = vperm.xlu2 %4025, %v4121_v54   ;;  %4117 = vperm.xlu1 %4014, %v4116_v58   ;;  %v2504_v39 = vadd.f32 %v2503_v0, %v2502_v24  ;;  %v3507_v54 = vunpack.c.h.bf16 %v3926_v45  ;;  %v3502_v58 = vunpack.c.l.bf16 %v3925_v38  ;;  %v2457_v1 = vadd.f32 %v2456_v48, %v2455_v47  ;;  %v4874_v47 = vld [vmem:[%s6270_s0 + $0x20] sm:$0xff]   ;;  %v4891_v24 = vld [vmem:[%s6271_s1 + $0x138] sm:$0xff]  }
  0x43   :  { %4112 = vperm.xlu0 %4003, %v4111_v59   ;;  %v2534_v59 = vsel %vm45_vm0, %v3499_v50, 0.0  ;;  %v4884_v0 = vld [vmem:[%s6271_s1 + $0x140] sm:$0xff]   ;;  %v2978_v46 = vunpack.c.l.bf16 %v4874_v47  ;;  %v2979_v48 = vunpack.c.h.bf16 %v4874_v47  ;;  %v3526_v50 = vunpack.c.l.bf16 %v3931_v51  ;;  %v3944_v47 = vld [vmem:[%s6271_s1 + $0x190] sm:$0xff]  }
  0x44   :  { %v2506_v60 = vadd.f32 %v2505_v44, %v2504_v39  ;;  %v2536_v5 = vsel %vm45_vm0, %v3502_v58, 0.0  ;;  %v2535_v8 = vadd.f32 %v2534_v59, %v2533_v61  ;;  %v4166_v12 = vpack.i.bf16 %v3507_v54, %v3506_v53 }
  0x45   :  { %v2458_v19 = vrot.slane %v2457_v1, 1  ;;  %v2542_v63 = vsel %vm45_vm0, %v3507_v54, 0.0  ;;  %v3531_v44 = vunpack.c.h.bf16 %v3932_v33  ;;  %v3538_v39 = vunpack.c.l.bf16 %v4884_v0 }
  0x46   :  { %v2508_v7 = vadd.f32 %v2507_v43, %v2506_v60  ;;  %v2537_v17 = vadd.f32 %v2536_v5, %v2535_v8  ;;  %v3530_v43 = vunpack.c.l.bf16 %v3932_v33  ;;  %v3534_v53 = vunpack.c.l.bf16 %v4891_v24  ;;  %v3935_v60 = vld [vmem:[%s6271_s1 + $0x148] sm:$0xff]  }
  0x47   :  { %v2459_v34 = vadd.f32 %v2458_v19, %v2457_v1  ;;  %v3535_v54 = vunpack.c.h.bf16 %v4891_v24  ;;  %v3539_v61 = vunpack.c.h.bf16 %v4884_v0  ;;  %v2577_v62 = vsel %vm45_vm0, %v3538_v39, 0.0  ;;  %v4950_v0 = vld [vmem:[%s6270_s0 + $0x28] sm:$0xff]  }
  0x48   :  { %v2510_v16 = vadd.f32 %v2509_v2, %v2508_v7  ;;  %v2539_v29 = vadd.f32 %v2538_v14, %v2537_v17  ;;  %v4905_v59 = vsel %vm45_vm0, %v3530_v43, 0.0  ;;  %v2574_v5 = vsel %vm45_vm0, %v3534_v53, 0.0  ;;  %v3937_v14 = vld [vmem:[%s6271_s1 + $0x158] sm:$0xff]  }
  0x49   :  { %v4920_v7 = vsel %vm45_vm0, %v3527_v32, 0.0  ;;  %v3522_v8 = vunpack.c.l.bf16 %v3930_v25  ;;  %v3523_v9 = vunpack.c.h.bf16 %v3930_v25  ;;  %v2579_v17 = vsel %vm45_vm0, %v3539_v61, 0.0 }
  0x4a   :  { %4137 = vperm.xlu2 %4025, %v4136_v27   ;;  %4132 = vperm.xlu1 %4014, %v4131_v55   ;;  %v2511_v26 = vrot.slane %v2510_v16, 4  ;;  %v4161_v27 = vpack.i.bf16 %v3503_v4, %v3502_v58  ;;  %v2541_v31 = vadd.f32 %v2540_v21, %v2539_v29  ;;  %v4196_v58 = vpack.i.bf16 %v3531_v44, %v3530_v43 }
  0x4b   :  { %4127 = vperm.xlu0 %4003, %v4126_v6   ;;  %v4181_v6 = vpack.i.bf16 %v3519_v15, %v3518_v13  ;;  %v2575_v4 = vsel %vm45_vm0, %v3535_v54, 0.0  ;;  %v2556_v19 = vsel %vm45_vm0, %v3522_v8, 0.0  ;;  %v3543_v21 = vunpack.c.h.bf16 %v3935_v60 }
  0x4c   :  { %v2512_v55 = vadd.f32 %v2511_v26, %v2510_v16  ;;  %v2543_v40 = vadd.f32 %v2542_v63, %v2541_v31  ;;  %v3542_v16 = vunpack.c.l.bf16 %v3935_v60  ;;  %v3554_v23 = vunpack.c.l.bf16 %v4917_v3  ;;  %v4975_v60 = vld [vmem:[%s6270_s0 + $0x58] sm:$0xff]  }
  0x4d   :  { %v3550_v29 = vunpack.c.l.bf16 %v3937_v14  ;;  %v4191_v31 = vpack.i.bf16 %v3527_v32, %v3526_v50  ;;  %v4186_v33 = vpack.i.bf16 %v3523_v9, %v3522_v8  ;;  %v2982_v25 = vunpack.c.l.bf16 %v4950_v0 }
  0x4e   :  { %v2513_v56 = vrot.slane %v2512_v55, 2  ;;  %v2545_v38 = vadd.f32 %v2544_v36, %v2543_v40  ;;  %v2560_v36 = vsel %vm45_vm0, %v3526_v50, 0.0  ;;  %v4945_v40 = vld [vmem:[%s6270_s0] sm:$0xff]   ;;  %v2593_v8 = vsel %vm45_vm0, %v3554_v23, 0.0 }
  0x50   :  { %v2514_v45 = vadd.f32 %v2513_v56, %v2512_v55  ;;  %v3551_v55 = vunpack.c.h.bf16 %v3937_v14  ;;  %v2558_v56 = vsel %vm45_vm0, %v3523_v9, 0.0  ;;  %v4992_v14 = vld [vmem:[%s6270_s0 + $0x10] sm:$0xff]  }
  0x52   :  { %4152 = vperm.xlu2 %4025, %v4151_v49   ;;  %4147 = vperm.xlu1 %4014, %v4146_v52   ;;  %v4896_v49 = vsel %vm45_vm0, %v3531_v44, 0.0  ;;  %v2515_v52 = vrot.slane %v2514_v45, 1  ;;  %v4960_v24 = vpack.i.bf16 %v3551_v55, %v3550_v29  ;;  %v2591_v9 = vsel %vm45_vm0, %v3551_v55, 0.0 }
  0x53   :  { %4142 = vperm.xlu0 %4003, %v4141_v10   ;;  %v2547_v10 = vadd.f32 %v2546_v42, %v2545_v38  ;;  %v4955_v42 = vld [vmem:[%s6270_s0 + $0x40] sm:$0xff]  }
  0x54   :  { %v2516_v1 = vadd.f32 %v2515_v52, %v2514_v45  ;;  %v2963_v52 = vunpack.c.h.bf16 %v4945_v40 }
  0x55   :  { %v2549_v2 = vadd.f32 %v2548_v41, %v2547_v10  ;;  %v4201_v41 = vpack.i.bf16 %v3535_v54, %v3534_v53  ;;  %v2983_v53 = vunpack.c.h.bf16 %v4950_v0  ;;  %v2994_v54 = vunpack.c.l.bf16 %v4955_v42  ;;  %v5093_v0 = vld [vmem:[%s6271_s1 + $0x1a8] sm:$0xff]  }
  0x56   :  { %v4926_v13 = vsel %vm2384_vm1, %v2516_v1, %v2459_v34  ;;  %v2995_v1 = vunpack.c.h.bf16 %v4955_v42 }
  0x57   :  { %v2551_v15 = vadd.f32 %v2550_v37, %v2549_v2 }
  0x59   :  { %v2553_v26 = vadd.f32 %v2552_v57, %v2551_v15  ;;  %v4211_v57 = vpack.i.bf16 %v3543_v21, %v3542_v16 }
  0x5a   :  { %4167 = vperm.xlu2 %4025, %v4166_v12   ;;  %4162 = vperm.xlu1 %4014, %v4161_v27   ;;  %v2576_v12 = vadd.f32 %v2575_v4, %v2574_v5  ;;  %v2581_v27 = vsel %vm45_vm0, %v3542_v16, 0.0  ;;  %v2589_v4 = vsel %vm45_vm0, %v3550_v29, 0.0  ;;  %v3940_v5 = vld [vmem:[%s6271_s1 + $0x170] sm:$0xff]   ;;  %v2970_v29 = vunpack.c.l.bf16 %v4992_v14 }
  0x5b   :  { %4157 = vperm.xlu0 %4003, %v4156_v28   ;;  %v3555_v28 = vunpack.c.h.bf16 %v4917_v3  ;;  %v2555_v34 = vadd.f32 %v4868_v35, %v2553_v26  ;;  %v4206_v35 = vpack.i.bf16 %v3539_v61, %v3538_v39  ;;  %v2962_v39 = vunpack.c.l.bf16 %v4945_v40  ;;  %v3941_v61 = vld [vmem:[%s6271_s1 + $0x178] sm:$0xff]   ;;  %v5167_v40 = vld [vmem:[%s6270_s0 + $0x50] sm:$0xff]  }
  0x5c   :  { %v2578_v22 = vadd.f32 %v2577_v62, %v2576_v12  ;;  %v3563_v26 = vunpack.c.h.bf16 %v3940_v5 }
  0x5d   :  { %v2557_v51 = vadd.f32 %v2556_v19, %v2555_v34  ;;  %v4958_v44 = vpack.i.bf16 %v3555_v28, %v3554_v23  ;;  %v2595_v2 = vsel %vm45_vm0, %v3555_v28, 0.0  ;;  %v3939_v19 = vld [vmem:[%s6271_s1 + $0x168] sm:$0xff]   ;;  %v3562_v23 = vunpack.c.l.bf16 %v3940_v5 }
  0x5e   :  { %v2580_v63 = vadd.f32 %v2579_v17, %v2578_v22  ;;  %v3006_v17 = vunpack.c.l.bf16 %v4975_v60  ;;  %v3567_v22 = vunpack.c.h.bf16 %v3941_v61  ;;  %v3007_v28 = vunpack.c.h.bf16 %v4975_v60 }
  0x5f   :  { %v2559_v50 = vadd.f32 %v2558_v56, %v2557_v51  ;;  %v3558_v55 = vunpack.c.l.bf16 %v3939_v19  ;;  %v2603_v34 = vsel %vm45_vm0, %v3563_v26, 0.0  ;;  %v2601_v56 = vsel %vm45_vm0, %v3562_v23, 0.0  ;;  %v3942_v51 = vld [vmem:[%s6271_s1 + $0x180] sm:$0xff]  }
  0x60   :  { %v2582_v37 = vadd.f32 %v2581_v27, %v2580_v63 }
  0x61   :  { %v2561_v62 = vadd.f32 %v2560_v36, %v2559_v50 }
  0x62   :  { %4182 = vperm.xlu2 %4025, %v4181_v6   ;;  %4177 = vperm.xlu1 %4014, %v4176_v30   ;;  %v3546_v6 = vunpack.c.l.bf16 %v3936_v18  ;;  %v3547_v30 = vunpack.c.h.bf16 %v3936_v18  ;;  %v3566_v18 = vunpack.c.l.bf16 %v3941_v61 }
  0x63   :  { %4172 = vperm.xlu0 %4003, %v4171_v11   ;;  %v2583_v11 = vsel %vm45_vm0, %v3543_v21, 0.0  ;;  %v2563_v16 = vadd.f32 %v4920_v7, %v2561_v62  ;;  %v5053_v62 = vld [vmem:[%s6270_s0 + $0x8] sm:$0xff]  }
  0x64   :  { %v4932_v20 = vpop.permute.xlu2 %4027  ;;  %v2585_v43 = vsel %vm45_vm0, %v3546_v6, 0.0  ;;  %v4962_v45 = vpack.i.bf16 %v3547_v30, %v3546_v6  ;;  %v2584_v38 = vadd.f32 %v2583_v11, %v2582_v37  ;;  %v2587_v32 = vsel %vm45_vm0, %v3547_v30, 0.0 }
  0x65   :  { %v4029_v3 = vunpack.i.l.bf16 %v4932_v20  ;;  %v4030_v15 = vunpack.i.h.bf16 %v4932_v20  ;;  %v2565_v27 = vadd.f32 %v4905_v59, %v2563_v16  ;;  %v2971_v20 = vunpack.c.h.bf16 %v4992_v14 }
  0x66   :  { %v3559_v6 = vunpack.c.h.bf16 %v3939_v19  ;;  %v5022_v11 = vpack.i.bf16 %v3563_v26, %v3562_v23  ;;  %v2597_v37 = vsel %vm45_vm0, %v3558_v55, 0.0  ;;  %v2966_v26 = vunpack.c.l.bf16 %v5053_v62 }
  0x67   :  { %v5006_v7 = vmul.f32 %v4029_v3, %v2978_v46  ;;  %v5010_v30 = vmul.f32 %v4030_v15, %v2979_v48  ;;  %v2567_v59 = vadd.f32 %v4896_v49, %v2565_v27  ;;  %v5019_v46 = vpack.i.bf16 %v3567_v22, %v3566_v18  ;;  %v3943_v48 = vld [vmem:[%s6271_s1 + $0x188] sm:$0xff]   ;;  %v5073_v27 = vld [vmem:[%s6270_s0 + $0x38] sm:$0xff]  }
  0x68   :  { %v3574_v5 = vunpack.c.l.bf16 %v3943_v48  ;;  %v3575_v3 = vunpack.c.h.bf16 %v3943_v48 }
  0x69   :  { %v2568_v49 = vrot.slane %v2567_v59, 4 }
  0x6a   :  { %4197 = vperm.xlu2 %4025, %v4196_v58   ;;  %4192 = vperm.xlu1 %4014, %v4191_v31   ;;  %v2586_v58 = vadd.f32 %v2585_v43, %v2584_v38  ;;  %v5014_v31 = vsel %vm45_vm0, %v3567_v22, 0.0  ;;  %v5038_v38 = vpack.i.bf16 %v3559_v6, %v3558_v55 }
  0x6b   :  { %4187 = vperm.xlu0 %4003, %v4186_v33   ;;  %v5017_v33 = vsel %vm45_vm0, %v3566_v18, 0.0  ;;  %v2569_v61 = vadd.f32 %v2568_v49, %v2567_v59  ;;  %v5085_v59 = vpack.i.bf16 %v3575_v3, %v3574_v5 }
  0x6c   :  { %v4967_v10 = vpop.permute.xlu2 %4032  ;;  %v2588_v12 = vadd.f32 %v2587_v32, %v2586_v58  ;;  %v5043_v32 = vld [vmem:[%s6270_s0 + $0x70] sm:$0xff]   ;;  %v5048_v58 = vld [vmem:[%s6270_s0 + $0x18] sm:$0xff]  }
  0x6d   :  { %v3018_v15 = vunpack.c.l.bf16 %v5043_v32  ;;  %v2974_v18 = vunpack.c.l.bf16 %v5048_v58 }
  0x6e   :  { %v2590_v21 = vadd.f32 %v2589_v4, %v2588_v12  ;;  %v3579_v4 = vunpack.c.h.bf16 %v3944_v47  ;;  %v5058_v12 = vld [vmem:[%s6270_s0 + $0x88] sm:$0xff]  }
  0x70   :  { %v2592_v63 = vadd.f32 %v2591_v9, %v2590_v21  ;;  %v3571_v9 = vunpack.c.h.bf16 %v3942_v51  ;;  %v2570_v21 = vrot.slane %v2569_v61, 2  ;;  %v5098_v49 = vsel %vm45_vm0, %v3579_v4, 0.0 }
  0x72   :  { %4212 = vperm.xlu2 %4025, %v4211_v57   ;;  %4207 = vperm.xlu1 %4014, %v4206_v35   ;;  %v2594_v36 = vadd.f32 %v2593_v8, %v2592_v63  ;;  %v2599_v57 = vsel %vm45_vm0, %v3559_v6, 0.0  ;;  %v4035_v35 = vunpack.i.h.bf16 %v4967_v10  ;;  %v3570_v8 = vunpack.c.l.bf16 %v3942_v51 }
  0x73   :  { %4202 = vperm.xlu0 %4003, %v4201_v41   ;;  %v4034_v41 = vunpack.i.l.bf16 %v4967_v10  ;;  %v3578_v10 = vunpack.c.l.bf16 %v3944_v47  ;;  %v5105_v51 = vsel %vm45_vm0, %v3575_v3, 0.0 }
  0x74   :  { %v4048_v43 = vpop.permute.xlu2 %4047  ;;  %v2596_v50 = vadd.f32 %v2595_v2, %v2594_v36  ;;  %v5077_v63 = vmul.f32 %v4035_v35, %v2983_v53  ;;  %v5087_v36 = vpack.i.bf16 %v3571_v9, %v3570_v8  ;;  %v2613_v35 = vsel %vm45_vm0, %v3574_v5, 0.0 }
  0x75   :  { %v5066_v22 = vmul.f32 %v4034_v41, %v2982_v25  ;;  %v2967_v25 = vunpack.c.h.bf16 %v5053_v62  ;;  %v5082_v55 = vpack.i.bf16 %v3579_v4, %v3578_v10  ;;  %v5111_v41 = vld [vmem:[%s6270_s0 + $0x30] sm:$0xff]   ;;  %v3590_v4 = vunpack.c.l.bf16 %v5093_v0 }
  0x76   :  { %v2598_v2 = vadd.f32 %v2597_v37, %v2596_v50  ;;  %v5102_v37 = vsel %vm45_vm0, %v3578_v10, 0.0  ;;  %v2611_v5 = vsel %vm45_vm0, %v3571_v9, 0.0 }
  0x78   :  { %v2600_v23 = vadd.f32 %v2599_v57, %v2598_v2  ;;  %v2571_v57 = vadd.f32 %v2570_v21, %v2569_v61  ;;  %v3591_v2 = vunpack.c.h.bf16 %v5093_v0  ;;  %v3946_v61 = vld [vmem:[%s6271_s1 + $0x1a0] sm:$0xff]   ;;  %v2609_v21 = vsel %vm45_vm0, %v3570_v8, 0.0 }
  0x7a   :  { %4227 = vperm.xlu2 %4025, %v4958_v44   ;;  %4222 = vperm.xlu1 %4014, %v4960_v24   ;;  %v2602_v6 = vadd.f32 %v2601_v56, %v2600_v23  ;;  %v4050_v24 = vunpack.i.h.bf16 %v4048_v43  ;;  %v2572_v8 = vrot.slane %v2571_v57, 1  ;;  %v3586_v44 = vunpack.c.l.bf16 %v3946_v61 }
  0x7b   :  { %4217 = vperm.xlu0 %4003, %v4962_v45   ;;  %v4049_v45 = vunpack.i.l.bf16 %v4048_v43  ;;  %v3587_v56 = vunpack.c.h.bf16 %v3946_v61 }
  0x7c   :  { %v5095_v53 = vpop.permute.xlu1 %4016  ;;  %v2604_v50 = vadd.f32 %v2603_v34, %v2602_v6  ;;  %v5118_v10 = vpop.permute.xlu2 %4062  ;;  %v5126_v34 = vld [vmem:[%s6271_s1 + $0x198] sm:$0xff]   ;;  %v5134_v47 = vmul.f32 %v4050_v24, %v2995_v1 }
  0x7d   :  { %v4006_v48 = vpop.permute.xlu0 %4005  ;;  %v5130_v6 = vmul.f32 %v4049_v45, %v2994_v54  ;;  %v5143_v54 = vld [vmem:[%s6270_s0 + $0xa0] sm:$0xff]   ;;  %v2634_v45 = vsel %vm45_vm0, %v3590_v4, 0.0  ;;  %v3583_v61 = vunpack.c.h.bf16 %v5126_v34  ;;  %v5169_v23 = vpack.i.bf16 %v3587_v56, %v3586_v44 }
  0x7e   :  { %v4007_v43 = vunpack.i.l.bf16 %v4006_v48  ;;  %v4008_v3 = vunpack.i.h.bf16 %v4006_v48  ;;  %v2606_v48 = vadd.f32 %v5017_v33, %v2604_v50  ;;  %v5152_v33 = vpack.i.bf16 %v3591_v2, %v3590_v4 }
  0x7f   :  { %v2632_v50 = vsel %vm45_vm0, %v3587_v56, 0.0  ;;  %v4018_v9 = vunpack.i.l.bf16 %v5095_v53 }
  0x80   :  { %v1920_v42 = vmul.f32 %v4007_v43, %v2962_v39  ;;  %v2608_v1 = vadd.f32 %v5014_v31, %v2606_v48  ;;  %v1921_v24 = vmul.f32 %v4008_v3, %v2963_v52  ;;  %v2631_v39 = vsel %vm45_vm0, %v3586_v44, 0.0 }
  0x81   :  { %v2633_v31 = vadd.f32 %v2632_v50, %v2631_v39  ;;  %v3042_v48 = vunpack.c.l.bf16 %v5143_v54  ;;  %v2573_v52 = vadd.f32 %v2572_v8, %v2571_v57  ;;  %v3002_v44 = vunpack.c.l.bf16 %v5167_v40 }
  0x82   :  { %4242 = vperm.xlu2 %4025, %v5019_v46   ;;  %4237 = vperm.xlu1 %4014, %v5022_v11   ;;  %v3582_v46 = vunpack.c.l.bf16 %v5126_v34  ;;  %v2610_v43 = vadd.f32 %v2609_v21, %v2608_v1  ;;  %v3043_v21 = vunpack.c.h.bf16 %v5143_v54  ;;  %v5178_v34 = vld [vmem:[%s6270_s0 + $0x48] sm:$0xff]   ;;  %v4019_v1 = vunpack.i.h.bf16 %v5095_v53 }
  0x83   :  { %4232 = vperm.xlu0 %4003, %v5038_v38   ;;  %v5172_v19 = vadd.f32 %v2634_v45, %v2633_v31  ;;  %v2128_v50 = vadd.f32 %v1921_v24, %v1920_v42  ;;  %v3003_v8 = vunpack.c.h.bf16 %v5167_v40  ;;  %v5188_v45 = vld [vmem:[%s6271_s1 + $0x1c0] sm:$0xff]   ;;  %v4065_v24 = vunpack.i.h.bf16 %v5118_v10  ;;  %v3955_v40 = vld [vmem:[%s6271_s1 + $0x1e8] sm:$0xff]  }
  0x84   :  { %v5160_v11 = vpop.permute.xlu1 %4021  ;;  %v2612_v16 = vadd.f32 %v2611_v5, %v2610_v43  ;;  %v4261_v5 = vpack.i.bf16 %v3583_v61, %v3582_v46  ;;  %v4078_v39 = vpop.permute.xlu2 %4077  ;;  %v1924_v62 = vmul.f32 %v4018_v9, %v2970_v29  ;;  %v3602_v31 = vunpack.c.l.bf16 %v5188_v45 }
  0x85   :  { %v4011_v38 = vpop.permute.xlu0 %4010  ;;  %v4024_v9 = vunpack.i.h.bf16 %v5160_v11 }
  0x86   :  { %v4013_v4 = vunpack.i.h.bf16 %v4011_v38  ;;  %v4012_v3 = vunpack.i.l.bf16 %v4011_v38  ;;  %v2614_v56 = vadd.f32 %v2613_v35, %v2612_v16  ;;  %v2998_v16 = vunpack.c.l.bf16 %v5178_v34  ;;  %v5201_v35 = vld [vmem:[%s6271_s1 + $0x1b8] sm:$0xff]  }
  0x87   :  { %v4064_v38 = vunpack.i.l.bf16 %v5118_v10  ;;  %v3948_v10 = vld [vmem:[%s6271_s1 + $0x1b0] sm:$0xff]   ;;  %v3598_v14 = vunpack.c.l.bf16 %v5201_v35 }
  0x88   :  { %v1922_v57 = vmul.f32 %v4012_v3, %v2966_v26  ;;  %v1923_v53 = vmul.f32 %v4013_v4, %v2967_v25  ;;  %v5195_v26 = vsel %vm2386_vm2, %v2573_v52, %v4926_v13  ;;  %v2616_v25 = vadd.f32 %v5105_v51, %v2614_v56 }
  0x89   :  { %v1925_v13 = vmul.f32 %v4019_v1, %v2971_v20  ;;  %v3599_v20 = vunpack.c.h.bf16 %v5201_v35  ;;  %v4079_v51 = vunpack.i.l.bf16 %v4078_v39  ;;  %v2621_v3 = vsel %vm45_vm0, %v3582_v46, 0.0 }
  0x8a   :  { %v2129_v42 = vadd.f32 %v2128_v50, %v1922_v57  ;;  %4257 = vperm.xlu2 %4025, %v5082_v55   ;;  %4252 = vperm.xlu1 %4014, %v5085_v59   ;;  %v4023_v55 = vunpack.i.l.bf16 %v5160_v11  ;;  %v2618_v59 = vadd.f32 %v5102_v37, %v2616_v25  ;;  %v4080_v1 = vunpack.i.h.bf16 %v4078_v39 }
  0x8b   :  { %4247 = vperm.xlu0 %4003, %v5087_v36   ;;  %v3603_v36 = vunpack.c.h.bf16 %v5188_v45  ;;  %v3594_v57 = vunpack.c.l.bf16 %v3948_v10  ;;  %v3595_v56 = vunpack.c.h.bf16 %v3948_v10  ;;  %v2623_v25 = vsel %vm45_vm0, %v3583_v61, 0.0 }
  0x8c   :  { %v2130_v43 = vadd.f32 %v2129_v42, %v1923_v53  ;;  %v5217_v52 = vpop.permute.xlu1 %4042  ;;  %v2620_v50 = vadd.f32 %v5098_v49, %v2618_v59  ;;  %v1926_v37 = vmul.f32 %v4023_v55, %v2974_v18  ;;  %v2636_v42 = vsel %vm45_vm0, %v3591_v2, 0.0  ;;  %v5246_v18 = vld [vmem:[%s6270_s0 + $0x68] sm:$0xff]   ;;  %v5276_v55 = vpop.permute.xlu2 %4092 }
  0x8d   :  { %v5219_v29 = vpop.permute.xlu0 %4037  ;;  %v5236_v11 = vmul.f32 %v4064_v38, %v3006_v17  ;;  %v5240_v46 = vmul.f32 %v4065_v24, %v3007_v28  ;;  %v2999_v39 = vunpack.c.h.bf16 %v5178_v34  ;;  %v5250_v0 = vmul.f32 %v4079_v51, %v3018_v15  ;;  %v5262_v28 = vld [vmem:[%s6270_s0 + $0x60] sm:$0xff]  }
  0x8e   :  { %v2131_v4 = vadd.f32 %v2130_v43, %v1924_v62  ;;  %v2622_v49 = vadd.f32 %v2621_v3, %v2620_v50  ;;  %v6277_v2 = vunpack.c.h.bf16 %v5048_v58  ;;  %v4286_v60 = vpack.i.bf16 %v3603_v36, %v3602_v31  ;;  %v5274_v62 = vld [vmem:[%s6271_s1 + $0x1d8] sm:$0xff]  }
  0x8f   :  { %v6278_v24 = vunpack.c.h.bf16 %v5043_v32  ;;  %v2638_v38 = vsel %vm45_vm0, %v3594_v57, 0.0  ;;  %v4281_v32 = vpack.i.bf16 %v3599_v20, %v3598_v14  ;;  %v4276_v43 = vpack.i.bf16 %v3595_v56, %v3594_v57 }
  0x90   :  { %v2132_v53 = vadd.f32 %v2131_v4, %v1925_v13  ;;  %v1927_v17 = vmul.f32 %v4024_v9, %v6277_v2  ;;  %v2624_v58 = vadd.f32 %v2623_v25, %v2622_v49  ;;  %v3015_v51 = vunpack.c.h.bf16 %v5246_v18  ;;  %v5297_v25 = vld [vmem:[%s6271_s1 + $0x1d0] sm:$0xff]   ;;  %v5306_v2 = vld [vmem:[%s6271_s1 + $0x1c8] sm:$0xff]  }
  0x91   :  { %v5266_v15 = vmul.f32 %v4080_v1, %v6278_v24  ;;  %v3010_v9 = vunpack.c.l.bf16 %v5262_v28  ;;  %v2640_v3 = vsel %vm45_vm0, %v3595_v56, 0.0  ;;  %v3011_v1 = vunpack.c.h.bf16 %v5262_v28 }
  0x92   :  { %v2133_v61 = vadd.f32 %v2132_v53, %v1926_v37  ;;  %4272 = vperm.xlu2 %4025, %v5152_v33   ;;  %4267 = vperm.xlu1 %4014, %v5169_v23   ;;  %v2637_v33 = vadd.f32 %v2636_v42, %v5172_v19  ;;  %v3014_v23 = vunpack.c.l.bf16 %v5246_v18  ;;  %v2625_v10 = vrot.slane %v2624_v58, 4 }
  0x93   :  { %4262 = vperm.xlu0 %4003, %v4261_v5   ;;  %v3614_v50 = vunpack.c.l.bf16 %v5274_v62  ;;  %v4095_v57 = vunpack.i.h.bf16 %v5276_v55  ;;  %v4094_v37 = vunpack.i.l.bf16 %v5276_v55  ;;  %v4044_v53 = vunpack.i.l.bf16 %v5217_v52 }
  0x94   :  { %v2134_v13 = vadd.f32 %v2133_v61, %v1927_v17  ;;  %v5281_v5 = vpop.permute.xlu1 %4057  ;;  %v2639_v59 = vadd.f32 %v2638_v38, %v2637_v33  ;;  %v2626_v42 = vadd.f32 %v2625_v10, %v2624_v58  ;;  %v4039_v56 = vunpack.i.l.bf16 %v5219_v29 }
  0x95   :  { %v5283_v19 = vpop.permute.xlu0 %4052  ;;  %v2642_v18 = vsel %vm45_vm0, %v3598_v14, 0.0  ;;  %v4045_v17 = vunpack.i.h.bf16 %v5217_v52  ;;  %v3615_v58 = vunpack.c.h.bf16 %v5274_v62  ;;  %v3611_v14 = vunpack.c.h.bf16 %v5297_v25  ;;  %v3809_v62 = vld [vmem:[%s6270_s0 + $0x90] sm:$0xff]  }
  0x96   :  { %v2135_v4 = vadd.f32 %v2134_v13, %v5006_v7  ;;  %v4040_v7 = vunpack.i.h.bf16 %v5219_v29  ;;  %v2627_v61 = vrot.slane %v2626_v42, 2  ;;  %v2641_v24 = vadd.f32 %v2640_v3, %v2639_v59 }
  0x97   :  { %v3610_v29 = vunpack.c.l.bf16 %v5297_v25  ;;  %v3606_v52 = vunpack.c.l.bf16 %v5306_v2  ;;  %v3607_v55 = vunpack.c.h.bf16 %v5306_v2  ;;  %v6279_v10 = vunpack.c.l.bf16 %v5073_v27 }
  0x98   :  { %v2136_v49 = vadd.f32 %v2135_v4, %v5010_v30  ;;  %v2644_v30 = vsel %vm45_vm0, %v3599_v20, 0.0  ;;  %v2628_v38 = vadd.f32 %v2627_v61, %v2626_v42  ;;  %v2643_v13 = vadd.f32 %v2642_v18, %v2641_v24 }
  0x99   :  { %v6281_v20 = vunpack.c.h.bf16 %v5111_v41  ;;  %v4296_v61 = vpack.i.bf16 %v3611_v14, %v3610_v29  ;;  %v4291_v24 = vpack.i.bf16 %v3607_v55, %v3606_v52  ;;  %v2650_v34 = vsel %vm45_vm0, %v3606_v52, 0.0 }
  0x9a   :  { %v2137_v33 = vadd.f32 %v2136_v49, %v5066_v22  ;;  %4287 = vperm.xlu2 %4025, %v4286_v60   ;;  %4282 = vperm.xlu1 %4014, %v4281_v32   ;;  %v1934_v22 = vmul.f32 %v4044_v53, %v6279_v10  ;;  %v6280_v60 = vunpack.c.l.bf16 %v5111_v41  ;;  %v2629_v3 = vrot.slane %v2628_v38, 1 }
  0x9b   :  { %4277 = vperm.xlu0 %4003, %v4276_v43   ;;  %v1933_v59 = vmul.f32 %v4040_v7, %v6281_v20  ;;  %v4060_v32 = vunpack.i.h.bf16 %v5281_v5  ;;  %v2645_v42 = vadd.f32 %v2644_v30, %v2643_v13  ;;  %v4301_v53 = vpack.i.bf16 %v3615_v58, %v3614_v50 }
  0x9c   :  { %v1932_v35 = vmul.f32 %v4039_v56, %v6280_v60  ;;  %v2138_v4 = vadd.f32 %v2137_v33, %v5077_v63  ;;  %v4073_v43 = vpop.permute.xlu1 %4072  ;;  %v4059_v56 = vunpack.i.l.bf16 %v5281_v5  ;;  %v2630_v7 = vadd.f32 %v2629_v3, %v2628_v38  ;;  %v5341_v33 = vld [vmem:[%s6271_s1 + $0x1f0] sm:$0xff]  }
  0x9d   :  { %v5326_v49 = vpop.permute.xlu0 %4067  ;;  %v4075_v2 = vunpack.i.h.bf16 %v4073_v43  ;;  %v4074_v41 = vunpack.i.l.bf16 %v4073_v43  ;;  %v4055_v63 = vunpack.i.h.bf16 %v5283_v19  ;;  %v4054_v13 = vunpack.i.l.bf16 %v5283_v19 }
  0x9e   :  { %v2139_v18 = vadd.f32 %v2138_v4, %v1932_v35  ;;  %v6282_v38 = vunpack.c.l.bf16 %v5058_v12  ;;  %v6283_v35 = vunpack.c.h.bf16 %v5073_v27  ;;  %v5352_v4 = vsel %vm2388_vm3, %v2630_v7, %v5195_v26  ;;  %v3806_v27 = vld [vmem:[%s6270_s0 + $0x78] sm:$0xff]  }
  0x9f   :  { %v1946_v5 = vmul.f32 %v4074_v41, %v3014_v23  ;;  %v1947_v10 = vmul.f32 %v4075_v2, %v3015_v51  ;;  %v2646_v3 = vsel %vm45_vm0, %v3602_v31, 0.0  ;;  %v5360_v23 = vld [vmem:[%s6270_s0 + $0x80] sm:$0xff]   ;;  %v3626_v19 = vunpack.c.l.bf16 %v5341_v33 }
  0xa0   :  { %v2140_v30 = vadd.f32 %v2139_v18, %v1933_v59  ;;  %v5346_v60 = vmul.f32 %v4094_v37, %v6282_v38  ;;  %v1935_v20 = vmul.f32 %v4045_v17, %v6283_v35  ;;  %v3627_v26 = vunpack.c.h.bf16 %v5341_v33 }
  0xa1   :  { %v2159_v43 = vadd.f32 %v1947_v10, %v1946_v5  ;;  %v6284_v51 = vunpack.c.h.bf16 %v5058_v12  ;;  %v1940_v31 = vmul.f32 %v4059_v56, %v3002_v44  ;;  %v1941_v17 = vmul.f32 %v4060_v32, %v3003_v8 }
  0xa2   :  { %v2141_v59 = vadd.f32 %v2140_v30, %v1934_v22  ;;  %4302 = vperm.xlu2 %4025, %v4301_v53   ;;  %v2648_v22 = vsel %vm45_vm0, %v3603_v36, 0.0  ;;  %4297 = vperm.xlu1 %4014, %v4296_v61   ;;  %v1938_v18 = vmul.f32 %v4054_v13, %v2998_v16  ;;  %v1939_v12 = vmul.f32 %v4055_v63, %v2999_v39 }
  0xa3   :  { %v5369_v37 = vmul.f32 %v4095_v57, %v6284_v51  ;;  %4292 = vperm.xlu0 %4003, %v4291_v24   ;;  %v2160_v57 = vadd.f32 %v2159_v43, %v5250_v0  ;;  %v2647_v44 = vadd.f32 %v2646_v3, %v2645_v42  ;;  %v3026_v45 = vunpack.c.l.bf16 %v5360_v23  ;;  %v3954_v0 = vld [vmem:[%s6271_s1 + $0x1e0] sm:$0xff]  }
  0xa4   :  { %v2142_v53 = vadd.f32 %v2141_v59, %v1935_v20  ;;  %v4088_v8 = vpop.permute.xlu1 %4087  ;;  %v3022_v32 = vunpack.c.l.bf16 %v3806_v27  ;;  %v3023_v56 = vunpack.c.h.bf16 %v3806_v27  ;;  %v4070_v16 = vunpack.i.h.bf16 %v5326_v49 }
  0xa5   :  { %v4083_v36 = vpop.permute.xlu0 %4082  ;;  %v4316_v39 = vpack.i.bf16 %v3627_v26, %v3626_v19  ;;  %v4069_v42 = vunpack.i.l.bf16 %v5326_v49  ;;  %v2649_v41 = vadd.f32 %v2648_v22, %v2647_v44  ;;  %v3622_v7 = vunpack.c.l.bf16 %v3955_v40 }
  0xa6   :  { %v2143_v2 = vadd.f32 %v2142_v53, %v5130_v6  ;;  %v3623_v63 = vunpack.c.h.bf16 %v3955_v40  ;;  %v2652_v61 = vsel %vm45_vm0, %v3607_v55, 0.0  ;;  %v4085_v24 = vunpack.i.h.bf16 %v4083_v36 }
  0xa7   :  { %v4084_v52 = vunpack.i.l.bf16 %v4083_v36  ;;  %v2654_v30 = vsel %vm45_vm0, %v3610_v29, 0.0  ;;  %v2651_v13 = vadd.f32 %v2650_v34, %v2649_v41  ;;  %v3618_v5 = vunpack.c.l.bf16 %v3954_v0  ;;  %v5439_v41 = vld [vmem:[%s6271_s1 + $0x200] sm:$0xff]  }
  0xa8   :  { %v2144_v6 = vadd.f32 %v2143_v2, %v5134_v47  ;;  %v3619_v10 = vunpack.c.h.bf16 %v3954_v0  ;;  %v4089_v35 = vunpack.i.l.bf16 %v4088_v8  ;;  %v2161_v49 = vadd.f32 %v2160_v57, %v5266_v15 }
  0xa9   :  { %v1950_v20 = vmul.f32 %v4084_v52, %v3022_v32  ;;  %v2656_v47 = vsel %vm45_vm0, %v3611_v14, 0.0  ;;  %v2653_v55 = vadd.f32 %v2652_v61, %v2651_v13  ;;  %v4090_v3 = vunpack.i.h.bf16 %v4088_v8 }
  0xaa   :  { %v2145_v38 = vadd.f32 %v2144_v6, %v1938_v18  ;;  %4317 = vperm.xlu2 %4025, %v4316_v39   ;;  %v3027_v59 = vunpack.c.h.bf16 %v5360_v23  ;;  %v1951_v27 = vmul.f32 %v4085_v24, %v3023_v56  ;;  %v4311_v51 = vpack.i.bf16 %v3623_v63, %v3622_v7 }
  0xab   :  { %v2162_v29 = vadd.f32 %v2161_v49, %v1950_v20  ;;  %v1944_v22 = vmul.f32 %v4069_v42, %v3010_v9  ;;  %v1945_v53 = vmul.f32 %v4070_v16, %v3011_v1  ;;  %v2655_v15 = vadd.f32 %v2654_v30, %v2653_v55  ;;  %v3810_v1 = vld [vmem:[%s6270_s0 + $0x98] sm:$0xff]  }
  0xac   :  { %v2146_v43 = vadd.f32 %v2145_v38, %v1939_v12  ;;  %v4306_v18 = vpack.i.bf16 %v3619_v10, %v3618_v5  ;;  %v2658_v25 = vsel %vm45_vm0, %v3614_v50, 0.0  ;;  %v1952_v14 = vmul.f32 %v4089_v35, %v3026_v45  ;;  %4312 = vperm.xlu1 %4014, %v4311_v51   ;;  %v5415_v23 = vpop.permute.xlu1 %4102  ;;  %v3957_v35 = vld [vmem:[%s6271_s1 + $0x1f8] sm:$0xff]  }
  0xad   :  { %v2163_v40 = vadd.f32 %v2162_v29, %v1951_v27  ;;  %v2660_v12 = vsel %vm45_vm0, %v3615_v58, 0.0  ;;  %v2657_v9 = vadd.f32 %v2656_v47, %v2655_v15  ;;  %v1953_v44 = vmul.f32 %v4090_v3, %v3027_v59  ;;  %v4108_v58 = vpop.permute.xlu2 %4107 }
  0xae   :  { %v2147_v57 = vadd.f32 %v2146_v43, %v1940_v31  ;;  %v2668_v28 = vsel %vm45_vm0, %v3623_v63, 0.0  ;;  %4307 = vperm.xlu0 %4003, %v4306_v18   ;;  %v4098_v31 = vpop.permute.xlu0 %4097  ;;  %v2666_v45 = vsel %vm45_vm0, %v3622_v7, 0.0  ;;  %v2664_v36 = vsel %vm45_vm0, %v3619_v10, 0.0 }
  0xaf   :  { %v2164_v8 = vadd.f32 %v2163_v40, %v1952_v14  ;;  %v2659_v32 = vadd.f32 %v2658_v25, %v2657_v9  ;;  %v2662_v56 = vsel %vm45_vm0, %v3618_v5, 0.0  ;;  %v4105_v2 = vunpack.i.h.bf16 %v5415_v23  ;;  %v5458_v25 = vld [vmem:[%s6270_s0 + $0xb8] sm:$0xff]  }
  0xb0   :  { %v2148_v50 = vadd.f32 %v2147_v57, %v1941_v17  ;;  %v4104_v16 = vunpack.i.l.bf16 %v5415_v23  ;;  %v3959_v17 = vld [vmem:[%s6271_s1 + $0x208] sm:$0xff]   ;;  %v3038_v0 = vunpack.c.l.bf16 %v3810_v1  ;;  %v4099_v42 = vunpack.i.l.bf16 %v4098_v31 }
  0xb1   :  { %v2165_v39 = vadd.f32 %v2164_v8, %v1953_v44  ;;  %v2661_v7 = vadd.f32 %v2660_v12, %v2659_v32  ;;  %v4100_v63 = vunpack.i.h.bf16 %v4098_v31  ;;  %v3034_v6 = vunpack.c.l.bf16 %v3809_v62  ;;  %v5466_v44 = vld [vmem:[%s6270_s0 + $0xd0] sm:$0xff]  }
  0xb2   :  { %v2149_v34 = vadd.f32 %v2148_v50, %v5236_v11  ;;  %v3035_v61 = vunpack.c.h.bf16 %v3809_v62  ;;  %v3638_v30 = vunpack.c.l.bf16 %v3959_v17  ;;  %v3639_v13 = vunpack.c.h.bf16 %v3959_v17 }
  0xb3   :  { %v2166_v52 = vadd.f32 %v2165_v39, %v5346_v60  ;;  %v2663_v5 = vadd.f32 %v2662_v56, %v2661_v7  ;;  %v3039_v11 = vunpack.c.h.bf16 %v3810_v1  ;;  %v1956_v10 = vmul.f32 %v4099_v42, %v3034_v6  ;;  %v3961_v42 = vld [vmem:[%s6271_s1 + $0x218] sm:$0xff]  }
  0xb4   :  { %v2150_v24 = vadd.f32 %v2149_v34, %v5240_v46  ;;  %v3634_v38 = vunpack.c.l.bf16 %v5439_v41  ;;  %v2689_v47 = vsel %vm45_vm0, %v3639_v13, 0.0  ;;  %v4331_v55 = vpack.i.bf16 %v3639_v13, %v3638_v30  ;;  %v4118_v17 = vpop.permute.xlu1 %4117  ;;  %v3813_v34 = vld [vmem:[%s6270_s0 + $0xb0] sm:$0xff]  }
  0xb5   :  { %v2167_v49 = vadd.f32 %v2166_v52, %v5369_v37  ;;  %v2665_v46 = vadd.f32 %v2664_v36, %v2663_v5  ;;  %v1957_v3 = vmul.f32 %v4100_v63, %v3035_v61  ;;  %v2688_v60 = vsel %vm45_vm0, %v3638_v30, 0.0  ;;  %v4123_v23 = vpop.permute.xlu2 %4122  ;;  %v3812_v36 = vld [vmem:[%s6270_s0 + $0xa8] sm:$0xff]  }
  0xb6   :  { %v2151_v20 = vadd.f32 %v2150_v24, %v1944_v22  ;;  %v3635_v59 = vunpack.c.h.bf16 %v5439_v41  ;;  %v5453_v29 = vadd.f32 %v2689_v47, %v2688_v60  ;;  %4332 = vperm.xlu2 %4025, %v4331_v55   ;;  %v3630_v51 = vunpack.c.l.bf16 %v3957_v35 }
  0xb7   :  { %v2168_v27 = vadd.f32 %v2167_v49, %v1956_v10  ;;  %v4110_v15 = vunpack.i.h.bf16 %v4108_v58  ;;  %v2667_v22 = vadd.f32 %v2666_v45, %v2665_v46  ;;  %v3631_v37 = vunpack.c.h.bf16 %v3957_v35 }
  0xb8   :  { %v5451_v43 = vadd.f32 %v2151_v20, %v1945_v53  ;;  %v4326_v18 = vpack.i.bf16 %v3635_v59, %v3634_v38  ;;  %v4109_v57 = vunpack.i.l.bf16 %v4108_v58  ;;  %v2670_v53 = vsel %vm45_vm0, %v3626_v19, 0.0 }
  0xb9   :  { %v1958_v14 = vmul.f32 %v4104_v16, %v3038_v0  ;;  %v2169_v40 = vadd.f32 %v2168_v27, %v1957_v3  ;;  %v2669_v12 = vadd.f32 %v2668_v28, %v2667_v22  ;;  %v4321_v9 = vpack.i.bf16 %v3631_v37, %v3630_v51  ;;  %v4113_v28 = vpop.permute.xlu0 %4112 }
  0xba   :  { %4327 = vperm.xlu1 %4014, %v4326_v18   ;;  %v2672_v1 = vsel %vm45_vm0, %v3627_v26, 0.0  ;;  %v1959_v31 = vmul.f32 %v4105_v2, %v3039_v11  ;;  %v3054_v8 = vunpack.c.l.bf16 %v5458_v25  ;;  %v3055_v19 = vunpack.c.h.bf16 %v5458_v25 }
  0xbb   :  { %v2170_v50 = vadd.f32 %v2169_v40, %v1958_v14  ;;  %v2671_v45 = vadd.f32 %v2670_v53, %v2669_v12  ;;  %4322 = vperm.xlu0 %4003, %v4321_v9   ;;  %v1960_v62 = vmul.f32 %v4109_v57, %v3042_v48  ;;  %v1961_v33 = vmul.f32 %v4110_v15, %v3043_v21  ;;  %v3962_v48 = vld [vmem:[%s6271_s1 + $0x220] sm:$0xff]  }
  0xbc   :  { %v2674_v58 = vsel %vm45_vm0, %v3630_v51, 0.0  ;;  %v4125_v32 = vunpack.i.h.bf16 %v4123_v23  ;;  %v4124_v56 = vunpack.i.l.bf16 %v4123_v23  ;;  %v3066_v2 = vunpack.c.l.bf16 %v5466_v44 }
  0xbd   :  { %v2171_v26 = vadd.f32 %v2170_v50, %v1959_v31  ;;  %v2673_v16 = vadd.f32 %v2672_v1, %v2671_v45  ;;  %v2678_v54 = vsel %vm45_vm0, %v3634_v38, 0.0  ;;  %v2676_v21 = vsel %vm45_vm0, %v3631_v37, 0.0  ;;  %v3960_v38 = vld [vmem:[%s6271_s1 + $0x210] sm:$0xff]   ;;  %v5497_v55 = vpop.permute.xlu2 %4137  ;;  %v4133_v50 = vpop.permute.xlu1 %4132 }
  0xbe   :  { %v4114_v39 = vunpack.i.l.bf16 %v4113_v28  ;;  %v3046_v0 = vunpack.c.l.bf16 %v3812_v36  ;;  %v4115_v7 = vunpack.i.h.bf16 %v4113_v28  ;;  %v3047_v63 = vunpack.c.h.bf16 %v3812_v36  ;;  %v3815_v36 = vld [vmem:[%s6270_s0 + $0xc0] sm:$0xff]  }
  0xbf   :  { %v2675_v41 = vadd.f32 %v2674_v58, %v2673_v16  ;;  %v2172_v6 = vadd.f32 %v2171_v26, %v1960_v62  ;;  %v4119_v61 = vunpack.i.l.bf16 %v4118_v17  ;;  %v3050_v24 = vunpack.c.l.bf16 %v3813_v34 }
  0xc0   :  { %v3650_v52 = vunpack.c.l.bf16 %v3962_v48  ;;  %v3651_v30 = vunpack.c.h.bf16 %v3962_v48  ;;  %v1962_v5 = vmul.f32 %v4114_v39, %v3046_v0  ;;  %v3646_v10 = vunpack.c.l.bf16 %v3961_v42 }
  0xc1   :  { %v2677_v13 = vadd.f32 %v2676_v21, %v2675_v41  ;;  %v2173_v11 = vadd.f32 %v2172_v6, %v1961_v33  ;;  %v2680_v35 = vsel %vm45_vm0, %v3635_v59, 0.0  ;;  %v4120_v20 = vunpack.i.h.bf16 %v4118_v17  ;;  %v3816_v17 = vld [vmem:[%s6270_s0 + $0xc8] sm:$0xff]  }
  0xc2   :  { %v3051_v49 = vunpack.c.h.bf16 %v3813_v34  ;;  %v4346_v47 = vpack.i.bf16 %v3651_v30, %v3650_v52  ;;  %v1963_v3 = vmul.f32 %v4115_v7, %v3047_v63  ;;  %v3647_v27 = vunpack.c.h.bf16 %v3961_v42  ;;  %v3964_v63 = vld [vmem:[%s6271_s1 + $0x230] sm:$0xff]   ;;  %v3963_v6 = vld [vmem:[%s6271_s1 + $0x228] sm:$0xff]  }
  0xc3   :  { %v2679_v46 = vadd.f32 %v2678_v54, %v2677_v13  ;;  %v2174_v60 = vadd.f32 %v2173_v11, %v1962_v5  ;;  %v1966_v51 = vmul.f32 %v4124_v56, %v3054_v8  ;;  %v3067_v15 = vunpack.c.h.bf16 %v5466_v44  ;;  %v4128_v8 = vpop.permute.xlu0 %4127 }
  0xc4   :  { %4347 = vperm.xlu2 %4025, %v4346_v47   ;;  %v3642_v22 = vunpack.c.l.bf16 %v3960_v38  ;;  %v3643_v18 = vunpack.c.h.bf16 %v3960_v38  ;;  %v1964_v57 = vmul.f32 %v4119_v61, %v3050_v24  ;;  %v4341_v53 = vpack.i.bf16 %v3647_v27, %v3646_v10 }
  0xc5   :  { %v2681_v37 = vadd.f32 %v2680_v35, %v2679_v46  ;;  %v2175_v25 = vadd.f32 %v2174_v60, %v1963_v3  ;;  %v1967_v59 = vmul.f32 %v4125_v32, %v3055_v19  ;;  %v1965_v9 = vmul.f32 %v4120_v20, %v3051_v49  ;;  %v5528_v61 = vpop.permute.xlu2 %4152 }
  0xc6   :  { %v2693_v14 = vsel %vm45_vm0, %v3643_v18, 0.0  ;;  %v4336_v40 = vpack.i.bf16 %v3643_v18, %v3642_v22  ;;  %v2691_v23 = vsel %vm45_vm0, %v3642_v22, 0.0  ;;  %4342 = vperm.xlu1 %4014, %v4341_v53   ;;  %v4140_v45 = vunpack.i.h.bf16 %v5497_v55 }
  0xc7   :  { %v2682_v12 = vrot.slane %v2681_v37, 4  ;;  %v2176_v1 = vadd.f32 %v2175_v25, %v1964_v57  ;;  %v2692_v31 = vadd.f32 %v2691_v23, %v5453_v29  ;;  %v4139_v28 = vunpack.i.l.bf16 %v5497_v55  ;;  %v5513_v29 = vld [vmem:[%s6271_s1 + $0x238] sm:$0xff]  }
  0xc8   :  { %v2695_v19 = vsel %vm45_vm0, %v3646_v10, 0.0  ;;  %4337 = vperm.xlu0 %4003, %v4336_v40   ;;  %v2701_v26 = vsel %vm45_vm0, %v3651_v30, 0.0  ;;  %v2699_v32 = vsel %vm45_vm0, %v3650_v52, 0.0  ;;  %v2697_v56 = vsel %vm45_vm0, %v3647_v27, 0.0 }
  0xc9   :  { %v2683_v62 = vadd.f32 %v2682_v12, %v2681_v37  ;;  %v2177_v33 = vadd.f32 %v2176_v1, %v1965_v9  ;;  %v2694_v58 = vadd.f32 %v2693_v14, %v2692_v31  ;;  %v4135_v16 = vunpack.i.h.bf16 %v4133_v50  ;;  %v5541_v37 = vld [vmem:[%s6270_s0 + $0xe8] sm:$0xff]   ;;  %v4148_v12 = vpop.permute.xlu1 %4147  ;;  %v3818_v1 = vld [vmem:[%s6270_s0 + $0xd8] sm:$0xff]  }
  0xca   :  { %v4129_v34 = vunpack.i.l.bf16 %v4128_v8  ;;  %v4130_v21 = vunpack.i.h.bf16 %v4128_v8  ;;  %v3058_v39 = vunpack.c.l.bf16 %v3815_v36  ;;  %v3059_v0 = vunpack.c.h.bf16 %v3815_v36  ;;  %v3819_v8 = vld [vmem:[%s6270_s0 + $0xe0] sm:$0xff]  }
  0xcb   :  { %v2684_v48 = vrot.slane %v2683_v62, 2  ;;  %v2696_v54 = vadd.f32 %v2695_v19, %v2694_v58  ;;  %v2178_v42 = vadd.f32 %v2177_v33, %v1966_v51  ;;  %v3662_v41 = vunpack.c.l.bf16 %v5513_v29  ;;  %v4143_v9 = vpop.permute.xlu0 %4142  ;;  %v3967_v33 = vld [vmem:[%s6271_s1 + $0x248] sm:$0xff]  }
  0xcc   :  { %v3663_v7 = vunpack.c.h.bf16 %v5513_v29  ;;  %v4134_v30 = vunpack.i.l.bf16 %v4133_v50  ;;  %v3062_v13 = vunpack.c.l.bf16 %v3816_v17  ;;  %v3063_v5 = vunpack.c.h.bf16 %v3816_v17 }
  0xcd   :  { %v2685_v24 = vadd.f32 %v2684_v48, %v2683_v62  ;;  %v2698_v52 = vadd.f32 %v2697_v56, %v2696_v54  ;;  %v1968_v11 = vmul.f32 %v4129_v34, %v3058_v39  ;;  %v2179_v10 = vadd.f32 %v2178_v42, %v1967_v59 }
  0xce   :  { %v4361_v38 = vpack.i.bf16 %v3663_v7, %v3662_v41  ;;  %v3658_v20 = vunpack.c.l.bf16 %v3964_v63  ;;  %v3659_v49 = vunpack.c.h.bf16 %v3964_v63  ;;  %v3654_v47 = vunpack.c.l.bf16 %v3963_v6  ;;  %v3966_v63 = vld [vmem:[%s6271_s1 + $0x240] sm:$0xff]  }
  0xcf   :  { %v2686_v35 = vrot.slane %v2685_v24, 1  ;;  %v1969_v55 = vmul.f32 %v4130_v21, %v3059_v0  ;;  %v2180_v46 = vadd.f32 %v2179_v10, %v1968_v11  ;;  %v3655_v3 = vunpack.c.h.bf16 %v3963_v6 }
  0xd0   :  { %4362 = vperm.xlu2 %4025, %v4361_v38   ;;  %v2700_v60 = vadd.f32 %v2699_v32, %v2698_v52  ;;  %v1972_v27 = vmul.f32 %v4139_v28, %v3066_v2  ;;  %v1973_v51 = vmul.f32 %v4140_v45, %v3067_v15  ;;  %v4356_v18 = vpack.i.bf16 %v3659_v49, %v3658_v20  ;;  %v3968_v45 = vld [vmem:[%s6271_s1 + $0x250] sm:$0xff]  }
  0xd1   :  { %v2687_v22 = vadd.f32 %v2686_v35, %v2685_v24  ;;  %v1970_v57 = vmul.f32 %v4134_v30, %v3062_v13  ;;  %v2181_v25 = vadd.f32 %v2180_v46, %v1969_v55  ;;  %v4351_v53 = vpack.i.bf16 %v3655_v3, %v3654_v47 }
  0xd2   :  { %v2702_v59 = vadd.f32 %v2701_v26, %v2700_v60  ;;  %4357 = vperm.xlu1 %4014, %v4356_v18   ;;  %v2705_v2 = vsel %vm45_vm0, %v3655_v3, 0.0  ;;  %v2703_v44 = vsel %vm45_vm0, %v3654_v47, 0.0  ;;  %v1971_v15 = vmul.f32 %v4135_v16, %v3063_v5  ;;  %v5567_v26 = vpop.permute.xlu2 %4167 }
  0xd3   :  { %v5545_v14 = vsel %vm2390_vm4, %v2687_v22, %v5352_v4  ;;  %v2182_v40 = vadd.f32 %v2181_v25, %v1970_v57  ;;  %4352 = vperm.xlu0 %4003, %v4351_v53   ;;  %v2190_v31 = vadd.f32 %v1973_v51, %v1972_v27  ;;  %v3078_v50 = vunpack.c.l.bf16 %v5541_v37  ;;  %v4158_v57 = vpop.permute.xlu0 %4157  ;;  %v3821_v25 = vld [vmem:[%s6270_s0 + $0xf0] sm:$0xff]  }
  0xd4   :  { %v2704_v23 = vadd.f32 %v2703_v44, %v2702_v59  ;;  %v2707_v4 = vsel %vm45_vm0, %v3658_v20, 0.0  ;;  %v4155_v28 = vunpack.i.h.bf16 %v5528_v61  ;;  %v2709_v36 = vsel %vm45_vm0, %v3659_v49, 0.0 }
  0xd5   :  { %v5561_v19 = vadd.f32 %v2182_v40, %v1971_v15  ;;  %v4149_v58 = vunpack.i.l.bf16 %v4148_v12  ;;  %v4145_v32 = vunpack.i.h.bf16 %v4143_v9  ;;  %v4144_v56 = vunpack.i.l.bf16 %v4143_v9  ;;  %v3971_v40 = vld [vmem:[%s6271_s1 + $0x268] sm:$0xff]  }
  0xd6   :  { %v2706_v62 = vadd.f32 %v2705_v2, %v2704_v23  ;;  %v3070_v16 = vunpack.c.l.bf16 %v3818_v1  ;;  %v3074_v34 = vunpack.c.l.bf16 %v3819_v8  ;;  %v3071_v48 = vunpack.c.h.bf16 %v3818_v1 }
  0xd7   :  { %v3674_v54 = vunpack.c.l.bf16 %v3968_v45  ;;  %v3675_v39 = vunpack.c.h.bf16 %v3968_v45  ;;  %v3670_v0 = vunpack.c.l.bf16 %v3967_v33  ;;  %v3671_v42 = vunpack.c.h.bf16 %v3967_v33  ;;  %v3822_v45 = vld [vmem:[%s6270_s0 + $0xf8] sm:$0xff]  }
  0xd8   :  { %v2708_v17 = vadd.f32 %v2707_v4, %v2706_v62  ;;  %v1974_v21 = vmul.f32 %v4144_v56, %v3070_v16  ;;  %v4154_v6 = vunpack.i.l.bf16 %v5528_v61  ;;  %v2711_v24 = vsel %vm45_vm0, %v3662_v41, 0.0  ;;  %v3823_v41 = vld [vmem:[%s6270_s0 + $0x100] sm:$0xff]  }
  0xd9   :  { %v4150_v30 = vunpack.i.h.bf16 %v4148_v12  ;;  %v3075_v13 = vunpack.c.h.bf16 %v3819_v8  ;;  %v1975_v5 = vmul.f32 %v4145_v32, %v3071_v48  ;;  %v4376_v10 = vpack.i.bf16 %v3675_v39, %v3674_v54 }
  0xda   :  { %v2710_v52 = vadd.f32 %v2709_v36, %v2708_v17  ;;  %v2191_v11 = vadd.f32 %v2190_v31, %v1974_v21  ;;  %v3079_v38 = vunpack.c.h.bf16 %v5541_v37  ;;  %v2713_v35 = vsel %vm45_vm0, %v3663_v7, 0.0  ;;  %v5590_v2 = vpop.permute.xlu2 %4182  ;;  %v4163_v31 = vpop.permute.xlu1 %4162 }
  0xdb   :  { %v4371_v20 = vpack.i.bf16 %v3671_v42, %v3670_v0  ;;  %v3666_v49 = vunpack.c.l.bf16 %v3966_v63  ;;  %v1976_v47 = vmul.f32 %v4149_v58, %v3074_v34  ;;  %4377 = vperm.xlu2 %4025, %v4376_v10   ;;  %v3667_v55 = vunpack.c.h.bf16 %v3966_v63  ;;  %v3969_v34 = vld [vmem:[%s6271_s1 + $0x258] sm:$0xff]  }
  0xdc   :  { %v2192_v61 = vadd.f32 %v2191_v11, %v1975_v5  ;;  %v2712_v46 = vadd.f32 %v2711_v24, %v2710_v52  ;;  %v1977_v60 = vmul.f32 %v4150_v30, %v3075_v13  ;;  %v1978_v22 = vmul.f32 %v4154_v6, %v3078_v50  ;;  %v3970_v50 = vld [vmem:[%s6271_s1 + $0x260] sm:$0xff]  }
  0xdd   :  { %4372 = vperm.xlu1 %4014, %v4371_v20   ;;  %v2715_v3 = vsel %vm45_vm0, %v3666_v49, 0.0  ;;  %v4366_v51 = vpack.i.bf16 %v3667_v55, %v3666_v49  ;;  %v1979_v7 = vmul.f32 %v4155_v28, %v3079_v38  ;;  %v4170_v18 = vunpack.i.h.bf16 %v5567_v26 }
  0xde   :  { %v2193_v27 = vadd.f32 %v2192_v61, %v1976_v47  ;;  %v2714_v29 = vadd.f32 %v2713_v35, %v2712_v46  ;;  %v2717_v37 = vsel %vm45_vm0, %v3667_v55, 0.0  ;;  %v4169_v53 = vunpack.i.l.bf16 %v5567_v26  ;;  %v4173_v46 = vpop.permute.xlu0 %4172 }
  0xdf   :  { %v3090_v59 = vunpack.c.l.bf16 %v3823_v41  ;;  %4367 = vperm.xlu0 %4003, %v4366_v51   ;;  %v3091_v23 = vunpack.c.h.bf16 %v3823_v41  ;;  %v2725_v12 = vsel %vm45_vm0, %v3675_v39, 0.0  ;;  %v2723_v9 = vsel %vm45_vm0, %v3674_v54, 0.0  ;;  %v3824_v41 = vld [vmem:[%s6270_s0 + $0x108] sm:$0xff]  }
  0xe0   :  { %v2194_v44 = vadd.f32 %v2193_v27, %v1977_v60  ;;  %v2716_v15 = vadd.f32 %v2715_v3, %v2714_v29  ;;  %v2719_v1 = vsel %vm45_vm0, %v3670_v0, 0.0  ;;  %v2721_v4 = vsel %vm45_vm0, %v3671_v42, 0.0 }
  0xe1   :  { %v4159_v28 = vunpack.i.l.bf16 %v4158_v57  ;;  %v3082_v36 = vunpack.c.l.bf16 %v3821_v25  ;;  %v4160_v62 = vunpack.i.h.bf16 %v4158_v57  ;;  %v3083_v33 = vunpack.c.h.bf16 %v3821_v25  ;;  %v5622_v57 = vld [vmem:[%s6271_s1 + $0x280] sm:$0xff]  }
  0xe2   :  { %v2718_v8 = vadd.f32 %v2717_v37, %v2716_v15  ;;  %v2195_v26 = vadd.f32 %v2194_v44, %v1978_v22  ;;  %v3686_v58 = vunpack.c.l.bf16 %v3971_v40  ;;  %v4164_v56 = vunpack.i.l.bf16 %v4163_v31  ;;  %v5609_v47 = vpop.permute.xlu2 %4197  ;;  %v4178_v29 = vpop.permute.xlu1 %4177 }
  0xe3   :  { %v3687_v16 = vunpack.c.h.bf16 %v3971_v40  ;;  %v3682_v17 = vunpack.c.l.bf16 %v3970_v50  ;;  %v3086_v48 = vunpack.c.l.bf16 %v3822_v45  ;;  %v1980_v54 = vmul.f32 %v4159_v28, %v3082_v36  ;;  %v3973_v40 = vld [vmem:[%s6271_s1 + $0x278] sm:$0xff]  }
  0xe4   :  { %v2720_v32 = vadd.f32 %v2719_v1, %v2718_v8  ;;  %v2196_v21 = vadd.f32 %v2195_v26, %v1979_v7  ;;  %v3683_v39 = vunpack.c.h.bf16 %v3970_v50  ;;  %v4165_v42 = vunpack.i.h.bf16 %v4163_v31  ;;  %v3972_v31 = vld [vmem:[%s6271_s1 + $0x270] sm:$0xff]   ;;  %v3826_v26 = vld [vmem:[%s6270_s0 + $0x118] sm:$0xff]  }
  0xe5   :  { %v3087_v63 = vunpack.c.h.bf16 %v3822_v45  ;;  %v4391_v6 = vpack.i.bf16 %v3687_v16, %v3686_v58  ;;  %v1981_v24 = vmul.f32 %v4160_v62, %v3083_v33  ;;  %v3678_v13 = vunpack.c.l.bf16 %v3969_v34 }
  0xe6   :  { %v2722_v0 = vadd.f32 %v2721_v4, %v2720_v32  ;;  %v2197_v52 = vadd.f32 %v2196_v21, %v1980_v54  ;;  %v4386_v30 = vpack.i.bf16 %v3683_v39, %v3682_v17  ;;  %v3679_v5 = vunpack.c.h.bf16 %v3969_v34  ;;  %v3829_v21 = vld [vmem:[%s6270_s0 + $0x130] sm:$0xff]  }
  0xe7   :  { %4392 = vperm.xlu2 %4025, %v4391_v6   ;;  %v1982_v10 = vmul.f32 %v4164_v56, %v3086_v48  ;;  %v2727_v35 = vsel %vm45_vm0, %v3678_v13, 0.0  ;;  %v1984_v20 = vmul.f32 %v4169_v53, %v3090_v59  ;;  %v1985_v49 = vmul.f32 %v4170_v18, %v3091_v23  ;;  %v3825_v59 = vld [vmem:[%s6270_s0 + $0x110] sm:$0xff]  }
  0xe8   :  { %v2724_v11 = vadd.f32 %v2723_v9, %v2722_v0  ;;  %v2198_v38 = vadd.f32 %v2197_v52, %v1981_v24  ;;  %4387 = vperm.xlu1 %4014, %v4386_v30   ;;  %v4381_v61 = vpack.i.bf16 %v3679_v5, %v3678_v13  ;;  %v4185_v3 = vunpack.i.h.bf16 %v5590_v2 }
  0xe9   :  { %v1983_v60 = vmul.f32 %v4165_v42, %v3087_v63  ;;  %v2729_v51 = vsel %vm45_vm0, %v3679_v5, 0.0  ;;  %v4184_v22 = vunpack.i.l.bf16 %v5590_v2  ;;  %v2737_v7 = vsel %vm45_vm0, %v3687_v16, 0.0  ;;  %v3828_v2 = vld [vmem:[%s6270_s0 + $0x128] sm:$0xff]  }
  0xea   :  { %v2726_v55 = vadd.f32 %v2725_v12, %v2724_v11  ;;  %v2199_v27 = vadd.f32 %v2198_v38, %v1982_v10  ;;  %v2735_v18 = vsel %vm45_vm0, %v3686_v58, 0.0  ;;  %4382 = vperm.xlu0 %4003, %v4381_v61   ;;  %v2731_v53 = vsel %vm45_vm0, %v3682_v17, 0.0  ;;  %v5648_v52 = vpop.permute.xlu2 %4212 }
  0xeb   :  { %v4174_v44 = vunpack.i.l.bf16 %v4173_v46  ;;  %v3094_v15 = vunpack.c.l.bf16 %v3824_v41  ;;  %v2733_v23 = vsel %vm45_vm0, %v3683_v39, 0.0  ;;  %v4179_v9 = vunpack.i.l.bf16 %v4178_v29 }
  0xec   :  { %v2728_v37 = vadd.f32 %v2727_v35, %v2726_v55  ;;  %v2200_v25 = vadd.f32 %v2199_v27, %v1983_v60  ;;  %v4175_v1 = vunpack.i.h.bf16 %v4173_v46  ;;  %v3095_v50 = vunpack.c.h.bf16 %v3824_v41  ;;  %v4188_v55 = vpop.permute.xlu0 %4187  ;;  %v3827_v46 = vld [vmem:[%s6270_s0 + $0x120] sm:$0xff]   ;;  %v4193_v27 = vpop.permute.xlu1 %4192 }
  0xed   :  { %v3698_v8 = vunpack.c.l.bf16 %v5622_v57  ;;  %v3699_v45 = vunpack.c.h.bf16 %v5622_v57  ;;  %v3098_v36 = vunpack.c.l.bf16 %v3825_v59  ;;  %v3694_v62 = vunpack.c.l.bf16 %v3973_v40 }
  0xee   :  { %v2730_v12 = vadd.f32 %v2729_v51, %v2728_v37  ;;  %v2201_v4 = vadd.f32 %v2200_v25, %v1984_v20  ;;  %v3695_v33 = vunpack.c.h.bf16 %v3973_v40  ;;  %v1986_v58 = vmul.f32 %v4174_v44, %v3094_v15  ;;  %v5667_v25 = vld [vmem:[%s6271_s1 + $0x2e0] sm:$0xff]  }
  0xef   :  { %v4406_v56 = vpack.i.bf16 %v3699_v45, %v3698_v8  ;;  %v3690_v16 = vunpack.c.l.bf16 %v3972_v31  ;;  %v4180_v34 = vunpack.i.h.bf16 %v4178_v29  ;;  %v3099_v48 = vunpack.c.h.bf16 %v3825_v59 }
  0xf0   :  { %v2732_v28 = vadd.f32 %v2731_v53, %v2730_v12  ;;  %v2202_v32 = vadd.f32 %v2201_v4, %v1985_v49  ;;  %v4401_v54 = vpack.i.bf16 %v3695_v33, %v3694_v62  ;;  %v1987_v39 = vmul.f32 %v4175_v1, %v3095_v50 }
  0xf1   :  { %4407 = vperm.xlu2 %4025, %v4406_v56   ;;  %v3691_v42 = vunpack.c.h.bf16 %v3972_v31  ;;  %v2745_v63 = vsel %vm45_vm0, %v3690_v16, 0.0  ;;  %v3102_v6 = vunpack.c.l.bf16 %v3826_v26  ;;  %v3103_v24 = vunpack.c.h.bf16 %v3826_v26 }
  0xf2   :  { %v2734_v17 = vadd.f32 %v2733_v23, %v2732_v28  ;;  %v2203_v0 = vadd.f32 %v2202_v32, %v1986_v58  ;;  %v1988_v13 = vmul.f32 %v4179_v9, %v3098_v36  ;;  %4402 = vperm.xlu1 %4014, %v4401_v54   ;;  %v2748_v11 = vsel %vm45_vm0, %v3694_v62, 0.0  ;;  %v5685_v62 = vld [vmem:[%s6271_s1 + $0x288] sm:$0xff]  }
  0xf3   :  { %v2746_v10 = vsel %vm45_vm0, %v3691_v42, 0.0  ;;  %v4396_v38 = vpack.i.bf16 %v3691_v42, %v3690_v16  ;;  %v4199_v35 = vunpack.i.l.bf16 %v5609_v47  ;;  %v3114_v20 = vunpack.c.l.bf16 %v3829_v21  ;;  %v5690_v16 = vpop.permute.xlu2 %4227  ;;  %v5697_v54 = vld [vmem:[%s6270_s0 + $0x148] sm:$0xff]  }
  0xf4   :  { %v2736_v30 = vadd.f32 %v2735_v18, %v2734_v17  ;;  %v2204_v5 = vadd.f32 %v2203_v0, %v1987_v39  ;;  %v2747_v61 = vadd.f32 %v2746_v10, %v2745_v63  ;;  %v1989_v41 = vmul.f32 %v4180_v34, %v3099_v48  ;;  %v4203_v10 = vpop.permute.xlu0 %4202 }
  0xf5   :  { %4397 = vperm.xlu0 %4003, %v4396_v38   ;;  %v1990_v51 = vmul.f32 %v4184_v22, %v3102_v6  ;;  %v1991_v29 = vmul.f32 %v4185_v3, %v3103_v24  ;;  %v4200_v18 = vunpack.i.h.bf16 %v5609_v47  ;;  %v2750_v59 = vsel %vm45_vm0, %v3695_v33, 0.0  ;;  %v5676_v47 = vld [vmem:[%s6271_s1 + $0x290] sm:$0xff]  }
  0xf6   :  { %v5653_v49 = vadd.f32 %v2737_v7, %v2736_v30  ;;  %v2205_v60 = vadd.f32 %v2204_v5, %v1988_v13  ;;  %v2749_v37 = vadd.f32 %v2748_v11, %v2747_v61  ;;  %v3985_v7 = vld [vmem:[%s6271_s1 + $0x2d8] sm:$0xff]   ;;  %v4189_v3 = vunpack.i.l.bf16 %v4188_v55 }
  0xf7   :  { %v3106_v22 = vunpack.c.l.bf16 %v3827_v46  ;;  %v3115_v44 = vunpack.c.h.bf16 %v3829_v21  ;;  %v5678_v15 = vmul.f32 %v4199_v35, %v3114_v20  ;;  %v4194_v40 = vunpack.i.l.bf16 %v4193_v27  ;;  %v4208_v20 = vpop.permute.xlu1 %4207 }
  0xf8   :  { %v2206_v53 = vadd.f32 %v2205_v60, %v1989_v41  ;;  %v4190_v23 = vunpack.i.h.bf16 %v4188_v55  ;;  %v3107_v12 = vunpack.c.h.bf16 %v3827_v46  ;;  %v3743_v1 = vunpack.c.h.bf16 %v3985_v7  ;;  %v3831_v60 = vld [vmem:[%s6270_s0 + $0x140] sm:$0xff]  }
  0xf9   :  { %v3746_v31 = vunpack.c.l.bf16 %v5667_v25  ;;  %v2751_v50 = vadd.f32 %v2750_v59, %v2749_v37  ;;  %v3110_v4 = vunpack.c.l.bf16 %v3828_v2  ;;  %v3706_v28 = vunpack.c.l.bf16 %v5676_v47 }
  0xfa   :  { %v2207_v9 = vadd.f32 %v2206_v53, %v1990_v51  ;;  %v3742_v36 = vunpack.c.l.bf16 %v3985_v7  ;;  %v2752_v33 = vsel %vm45_vm0, %v3698_v8, 0.0  ;;  %v1992_v26 = vmul.f32 %v4189_v3, %v3106_v22  ;;  %v5725_v7 = vld [vmem:[%s6271_s1 + $0x2f8] sm:$0xff]   ;;  %v3988_v22 = vld [vmem:[%s6271_s1 + $0x2f0] sm:$0xff]  }
  0xfb   :  { %v4421_v32 = vpack.i.bf16 %v3746_v31, %v3743_v1  ;;  %v1997_v56 = vmul.f32 %v4200_v18, %v3115_v44  ;;  %v4195_v17 = vunpack.i.h.bf16 %v4193_v27  ;;  %v3111_v34 = vunpack.c.h.bf16 %v3828_v2  ;;  %v3830_v27 = vld [vmem:[%s6270_s0 + $0x138] sm:$0xff]   ;;  %v3835_v44 = vld [vmem:[%s6270_s0 + $0x160] sm:$0xff]  }
  0xfc   :  { %v2208_v58 = vadd.f32 %v2207_v9, %v1991_v29  ;;  %v4416_v48 = vpack.i.bf16 %v3742_v36, %v3706_v28  ;;  %v1993_v21 = vmul.f32 %v4190_v23, %v3107_v12  ;;  %v3702_v8 = vunpack.c.l.bf16 %v5685_v62 }
  0xfd   :  { %4422 = vperm.xlu2 %4025, %v4421_v32   ;;  %v3703_v0 = vunpack.c.h.bf16 %v5685_v62  ;;  %v4215_v42 = vunpack.i.h.bf16 %v5648_v52  ;;  %v2754_v63 = vsel %vm45_vm0, %v3699_v45, 0.0  ;;  %v1994_v6 = vmul.f32 %v4194_v40, %v3110_v4 }
  0xfe   :  { %v2209_v39 = vadd.f32 %v2208_v58, %v1992_v26  ;;  %4417 = vperm.xlu1 %4014, %v4416_v48   ;;  %v2753_v24 = vadd.f32 %v2752_v33, %v2751_v50  ;;  %v2803_v13 = vsel %vm45_vm0, %v3743_v1, 0.0  ;;  %v2802_v5 = vsel %vm45_vm0, %v3742_v36, 0.0  ;;  %v3987_v1 = vld [vmem:[%s6271_s1 + $0x2e8] sm:$0xff]   ;;  %v5738_v33 = vpop.permute.xlu2 %4242 }
  0xff   :  { %v4411_v11 = vpack.i.bf16 %v3703_v0, %v3702_v8  ;;  %v4214_v38 = vunpack.i.l.bf16 %v5648_v52  ;;  %v3126_v35 = vunpack.c.l.bf16 %v5697_v54  ;;  %v3127_v57 = vunpack.c.h.bf16 %v5697_v54 }
 0x100   :  { %v2210_v30 = vadd.f32 %v2209_v39, %v1993_v21  ;;  %v4230_v45 = vunpack.i.h.bf16 %v5690_v16  ;;  %v4229_v61 = vunpack.i.l.bf16 %v5690_v16  ;;  %v1995_v55 = vmul.f32 %v4195_v17, %v3111_v34 }
 0x101   :  { %v2805_v41 = vsel %vm45_vm0, %v3746_v31, 0.0  ;;  %4412 = vperm.xlu0 %4003, %v4411_v11   ;;  %v2804_v51 = vadd.f32 %v2803_v13, %v2802_v5  ;;  %v2755_v29 = vadd.f32 %v2754_v63, %v2753_v24  ;;  %v2756_v18 = vsel %vm45_vm0, %v3702_v8, 0.0 }
 0x102   :  { %v2211_v46 = vadd.f32 %v2210_v30, %v1994_v6  ;;  %v4205_v37 = vunpack.i.h.bf16 %v4203_v10  ;;  %v4210_v59 = vunpack.i.h.bf16 %v4208_v20  ;;  %v4209_v2 = vunpack.i.l.bf16 %v4208_v20  ;;  %v5747_v30 = vld [vmem:[%s6270_s0 + $0x178] sm:$0xff]  }
 0x103   :  { %v4204_v3 = vunpack.i.l.bf16 %v4203_v10  ;;  %v3122_v40 = vunpack.c.l.bf16 %v3831_v60  ;;  %v3123_v23 = vunpack.c.h.bf16 %v3831_v60  ;;  %v3118_v12 = vunpack.c.l.bf16 %v3830_v27 }
 0x104   :  { %v2212_v53 = vadd.f32 %v2211_v46, %v1995_v55  ;;  %v3119_v9 = vunpack.c.h.bf16 %v3830_v27  ;;  %v3755_v50 = vunpack.c.h.bf16 %v3988_v22  ;;  %v3758_v4 = vunpack.c.l.bf16 %v5725_v7  ;;  %v4218_v46 = vpop.permute.xlu0 %4217 }
 0x105   :  { %v3751_v36 = vunpack.c.h.bf16 %v3987_v1  ;;  %v1998_v26 = vmul.f32 %v4204_v3, %v3118_v12  ;;  %v3754_v32 = vunpack.c.l.bf16 %v3988_v22  ;;  %v3747_v16 = vunpack.c.h.bf16 %v5667_v25  ;;  %v3990_v3 = vld [vmem:[%s6271_s1 + $0x300] sm:$0xff]  }
 0x106   :  { %v2213_v31 = vadd.f32 %v2212_v53, %v5678_v15  ;;  %v1999_v58 = vmul.f32 %v4205_v37, %v3119_v9  ;;  %v3138_v17 = vunpack.c.l.bf16 %v3835_v44  ;;  %v3139_v34 = vunpack.c.h.bf16 %v3835_v44  ;;  %v5780_v22 = vpop.permute.xlu2 %4257 }
 0x107   :  { %v4436_v54 = vpack.i.bf16 %v3758_v4, %v3755_v50  ;;  %v2000_v21 = vmul.f32 %v4209_v2, %v3122_v40  ;;  %v4431_v8 = vpack.i.bf16 %v3754_v32, %v3751_v36  ;;  %v3750_v15 = vunpack.c.l.bf16 %v3987_v1 }
 0x108   :  { %v5741_v48 = vadd.f32 %v2213_v31, %v1997_v56  ;;  %v2221_v39 = vadd.f32 %v1999_v58, %v1998_v26  ;;  %v2757_v63 = vadd.f32 %v2756_v18, %v2755_v29  ;;  %v2806_v6 = vadd.f32 %v2805_v41, %v2804_v51  ;;  %v3834_v29 = vld [vmem:[%s6270_s0 + $0x158] sm:$0xff]  }
 0x109   :  { %4437 = vperm.xlu2 %4025, %v4436_v54   ;;  %v2807_v24 = vsel %vm45_vm0, %v3747_v16, 0.0  ;;  %v2001_v25 = vmul.f32 %v4210_v59, %v3123_v23  ;;  %4432 = vperm.xlu1 %4014, %v4431_v8   ;;  %v2809_v56 = vsel %vm45_vm0, %v3750_v15, 0.0  ;;  %v4426_v5 = vpack.i.bf16 %v3750_v15, %v3747_v16 }
 0x10a   :  { %v2222_v13 = vadd.f32 %v2221_v39, %v2000_v21  ;;  %v2002_v11 = vmul.f32 %v4214_v38, %v3126_v35  ;;  %v2003_v10 = vmul.f32 %v4215_v42, %v3127_v57  ;;  %v2758_v20 = vsel %vm45_vm0, %v3703_v0, 0.0  ;;  %v3833_v38 = vld [vmem:[%s6270_s0 + $0x150] sm:$0xff]  }
 0x10b   :  { %v2808_v55 = vadd.f32 %v2807_v24, %v2806_v6  ;;  %v5755_v41 = vmul.f32 %v4229_v61, %v3138_v17  ;;  %v5757_v60 = vmul.f32 %v4230_v45, %v3139_v34  ;;  %v2811_v51 = vsel %vm45_vm0, %v3751_v36, 0.0  ;;  %4427 = vperm.xlu0 %4003, %v4426_v5   ;;  %v4223_v61 = vpop.permute.xlu1 %4222 }
 0x10c   :  { %v2223_v27 = vadd.f32 %v2222_v13, %v2001_v25  ;;  %v4244_v52 = vunpack.i.l.bf16 %v5738_v33  ;;  %v3150_v62 = vunpack.c.l.bf16 %v5747_v30  ;;  %v2760_v0 = vsel %vm45_vm0, %v3706_v28, 0.0  ;;  %v3977_v28 = vld [vmem:[%s6271_s1 + $0x298] sm:$0xff]   ;;  %v5789_v25 = vld [vmem:[%s6270_s0 + $0x190] sm:$0xff]  }
 0x10d   :  { %v2810_v42 = vadd.f32 %v2809_v56, %v2808_v55  ;;  %v2759_v35 = vadd.f32 %v2758_v20, %v2757_v63  ;;  %v2815_v57 = vsel %vm45_vm0, %v3755_v50, 0.0  ;;  %v2813_v45 = vsel %vm45_vm0, %v3754_v32, 0.0 }
 0x10e   :  { %v4219_v18 = vunpack.i.l.bf16 %v4218_v46  ;;  %v2817_v37 = vsel %vm45_vm0, %v3758_v4, 0.0  ;;  %v4220_v59 = vunpack.i.h.bf16 %v4218_v46  ;;  %v3130_v2 = vunpack.c.l.bf16 %v3833_v38 }
 0x10f   :  { %v2812_v53 = vadd.f32 %v2811_v51, %v2810_v42  ;;  %v3131_v44 = vunpack.c.h.bf16 %v3833_v38  ;;  %v2224_v40 = vadd.f32 %v2223_v27, %v2002_v11  ;;  %v3711_v23 = vunpack.c.h.bf16 %v3977_v28  ;;  %v3836_v42 = vld [vmem:[%s6270_s0 + $0x168] sm:$0xff]  }
 0x110   :  { %v3763_v12 = vunpack.c.h.bf16 %v3990_v3  ;;  %v4225_v1 = vunpack.i.h.bf16 %v4223_v61  ;;  %v4224_v31 = vunpack.i.l.bf16 %v4223_v61  ;;  %v3134_v50 = vunpack.c.l.bf16 %v3834_v29 }
 0x111   :  { %v2814_v9 = vadd.f32 %v2813_v45, %v2812_v53  ;;  %v3135_v4 = vunpack.c.h.bf16 %v3834_v29  ;;  %v2004_v36 = vmul.f32 %v4219_v18, %v3130_v2  ;;  %v2225_v26 = vadd.f32 %v2224_v40, %v2003_v10  ;;  %v5816_v45 = vpop.permute.xlu2 %4272 }
 0x112   :  { %v4451_v58 = vpack.i.bf16 %v3763_v12, %v3711_v23  ;;  %v3710_v32 = vunpack.c.l.bf16 %v3977_v28  ;;  %v3762_v16 = vunpack.c.l.bf16 %v3990_v3  ;;  %v3707_v17 = vunpack.c.h.bf16 %v5676_v47 }
 0x113   :  { %v3759_v34 = vunpack.c.h.bf16 %v5725_v7  ;;  %v2005_v54 = vmul.f32 %v4220_v59, %v3131_v44  ;;  %v2226_v21 = vadd.f32 %v2225_v26, %v2004_v36  ;;  %v2816_v39 = vadd.f32 %v2815_v57, %v2814_v9  ;;  %v4238_v38 = vpop.permute.xlu1 %4237  ;;  %v5814_v57 = vld [vmem:[%s6271_s1 + $0x310] sm:$0xff]  }
 0x114   :  { %4452 = vperm.xlu2 %4025, %v4451_v58   ;;  %v2761_v8 = vadd.f32 %v2760_v0, %v2759_v35  ;;  %v2739_v15 = vrot.slane %v5653_v49, 4  ;;  %v2006_v63 = vmul.f32 %v4224_v31, %v3134_v50  ;;  %v4446_v6 = vpack.i.bf16 %v3762_v16, %v3710_v32  ;;  %v4233_v0 = vpop.permute.xlu0 %4232 }
 0x115   :  { %v2819_v24 = vsel %vm45_vm0, %v3759_v34, 0.0  ;;  %v2227_v13 = vadd.f32 %v2226_v21, %v2005_v54  ;;  %v2818_v47 = vadd.f32 %v2817_v37, %v2816_v39  ;;  %v4441_v56 = vpack.i.bf16 %v3759_v34, %v3707_v17  ;;  %v3837_v37 = vld [vmem:[%s6270_s0 + $0x170] sm:$0xff]  }
 0x116   :  { %v2762_v7 = vsel %vm45_vm0, %v3707_v17, 0.0  ;;  %v4245_v5 = vunpack.i.h.bf16 %v5738_v33  ;;  %v3151_v11 = vunpack.c.h.bf16 %v5747_v30  ;;  %v2764_v10 = vsel %vm45_vm0, %v3710_v32, 0.0  ;;  %4447 = vperm.xlu1 %4014, %v4446_v6  }
 0x117   :  { %v2763_v20 = vadd.f32 %v2762_v7, %v2761_v8  ;;  %v5795_v55 = vmul.f32 %v4244_v52, %v3150_v62  ;;  %v2007_v46 = vmul.f32 %v4225_v1, %v3135_v4  ;;  %v2228_v27 = vadd.f32 %v2227_v13, %v2006_v63  ;;  %4442 = vperm.xlu0 %4003, %v4441_v56   ;;  %v5809_v62 = vld [vmem:[%s6271_s1 + $0x2a8] sm:$0xff]  }
 0x118   :  { %v2820_v51 = vadd.f32 %v2819_v24, %v2818_v47  ;;  %v5801_v33 = vadd.f32 %v2739_v15, %v5653_v49  ;;  %v4259_v30 = vunpack.i.l.bf16 %v5780_v22  ;;  %v3162_v35 = vunpack.c.l.bf16 %v5789_v25 }
 0x119   :  { %v2821_v52 = vsel %vm45_vm0, %v3762_v16, 0.0  ;;  %v2229_v49 = vadd.f32 %v2228_v27, %v2007_v46  ;;  %v2823_v61 = vsel %vm45_vm0, %v3763_v12, 0.0  ;;  %v2766_v29 = vsel %vm45_vm0, %v3711_v23, 0.0  ;;  %v3978_v23 = vld [vmem:[%s6271_s1 + $0x2a0] sm:$0xff]   ;;  %v3991_v12 = vld [vmem:[%s6271_s1 + $0x308] sm:$0xff]  }
 0x11a   :  { %v2765_v18 = vadd.f32 %v2764_v10, %v2763_v20  ;;  %v4235_v53 = vunpack.i.h.bf16 %v4233_v0  ;;  %v4234_v59 = vunpack.i.l.bf16 %v4233_v0  ;;  %v3142_v2 = vunpack.c.l.bf16 %v3836_v42  ;;  %v5851_v0 = vpop.permute.xlu2 %4287 }
 0x11b   :  { %v3143_v28 = vunpack.c.h.bf16 %v3836_v42  ;;  %v2822_v3 = vadd.f32 %v2821_v52, %v2820_v51  ;;  %v2230_v44 = vadd.f32 %v2229_v49, %v5755_v41  ;;  %v3718_v40 = vunpack.c.l.bf16 %v5809_v62  ;;  %v5836_v7 = vpop.permute.xlu1 %4252  ;;  %v3839_v51 = vld [vmem:[%s6270_s0 + $0x180] sm:$0xff]  }
 0x11c   :  { %v3770_v9 = vunpack.c.l.bf16 %v5814_v57  ;;  %v4239_v1 = vunpack.i.l.bf16 %v4238_v38  ;;  %v3146_v31 = vunpack.c.l.bf16 %v3837_v37  ;;  %v3715_v50 = vunpack.c.h.bf16 %v3978_v23  ;;  %v4248_v27 = vpop.permute.xlu0 %4247 }
 0x11d   :  { %v3767_v4 = vunpack.c.h.bf16 %v3991_v12  ;;  %v4240_v36 = vunpack.i.h.bf16 %v4238_v38  ;;  %v2010_v26 = vmul.f32 %v4234_v59, %v3142_v2  ;;  %v2231_v41 = vadd.f32 %v2230_v44, %v5757_v60 }
 0x11e   :  { %v4466_v58 = vpack.i.bf16 %v3770_v9, %v3718_v40  ;;  %v3147_v32 = vunpack.c.h.bf16 %v3837_v37  ;;  %v2011_v16 = vmul.f32 %v4235_v53, %v3143_v28  ;;  %v3714_v34 = vunpack.c.l.bf16 %v3978_v23 }
 0x11f   :  { %v4461_v17 = vpack.i.bf16 %v3767_v4, %v3715_v50  ;;  %v2232_v54 = vadd.f32 %v2231_v41, %v2010_v26  ;;  %v3766_v21 = vunpack.c.l.bf16 %v3991_v12  ;;  %v2824_v39 = vadd.f32 %v2823_v61, %v2822_v3 }
 0x120   :  { %4467 = vperm.xlu2 %4025, %v4466_v58   ;;  %v2767_v8 = vadd.f32 %v2766_v29, %v2765_v18  ;;  %v2015_v15 = vmul.f32 %v4245_v5, %v3151_v11  ;;  %v2012_v63 = vmul.f32 %v4239_v1, %v3146_v31  ;;  %v2770_v6 = vsel %vm45_vm0, %v3715_v50, 0.0  ;;  %v5844_v11 = vld [vmem:[%s6270_s0 + $0x188] sm:$0xff]   ;;  %v3980_v18 = vld [vmem:[%s6271_s1 + $0x2b0] sm:$0xff]  }
 0x121   :  { %4462 = vperm.xlu1 %4014, %v4461_v17   ;;  %v2768_v24 = vsel %vm45_vm0, %v3714_v34, 0.0  ;;  %v2233_v13 = vadd.f32 %v2232_v54, %v2011_v16  ;;  %v2825_v60 = vsel %vm45_vm0, %v3766_v21, 0.0  ;;  %v4456_v47 = vpack.i.bf16 %v3766_v21, %v3714_v34 }
 0x122   :  { %v2769_v56 = vadd.f32 %v2768_v24, %v2767_v8  ;;  %v2741_v10 = vrot.slane %v5801_v33, 2  ;;  %v4260_v20 = vunpack.i.h.bf16 %v5780_v22  ;;  %v3163_v46 = vunpack.c.h.bf16 %v5789_v25 }
 0x123   :  { %v2826_v5 = vadd.f32 %v2825_v60, %v2824_v39  ;;  %v5849_v38 = vmul.f32 %v4259_v30, %v3162_v35  ;;  %v2013_v42 = vmul.f32 %v4240_v36, %v3147_v32  ;;  %v2234_v52 = vadd.f32 %v2233_v13, %v2012_v63  ;;  %4457 = vperm.xlu0 %4003, %v4456_v47   ;;  %v3993_v30 = vld [vmem:[%s6271_s1 + $0x318] sm:$0xff]   ;;  %v5866_v35 = vld [vmem:[%s6270_s0 + $0x1a8] sm:$0xff]   ;;  %v4268_v63 = vpop.permute.xlu1 %4267  ;;  %v5884_v13 = vpop.permute.xlu2 %4302 }
 0x124   :  { %v2827_v22 = vsel %vm45_vm0, %v3767_v4, 0.0  ;;  %v2829_v25 = vsel %vm45_vm0, %v3770_v9, 0.0  ;;  %v2772_v49 = vsel %vm45_vm0, %v3718_v40, 0.0  ;;  %v2771_v61 = vadd.f32 %v2770_v6, %v2769_v56  ;;  %v3843_v6 = vld [vmem:[%s6270_s0 + $0x1a0] sm:$0xff]  }
 0x125   :  { %v4254_v29 = vunpack.i.l.bf16 %v5836_v7  ;;  %v2235_v37 = vadd.f32 %v2234_v52, %v2013_v42  ;;  %v3158_v53 = vunpack.c.l.bf16 %v5844_v11  ;;  %v4249_v59 = vunpack.i.l.bf16 %v4248_v27 }
 0x126   :  { %v3154_v2 = vunpack.c.l.bf16 %v3839_v51  ;;  %v2828_v28 = vadd.f32 %v2827_v22, %v2826_v5  ;;  %v4250_v3 = vunpack.i.h.bf16 %v4248_v27  ;;  %v3723_v44 = vunpack.c.h.bf16 %v3980_v18  ;;  %v4263_v27 = vpop.permute.xlu0 %4262 }
 0x127   :  { %v3775_v40 = vunpack.c.h.bf16 %v3993_v30  ;;  %v3155_v9 = vunpack.c.h.bf16 %v3839_v51  ;;  %v2236_v23 = vadd.f32 %v2235_v37, %v5795_v55  ;;  %v3722_v12 = vunpack.c.l.bf16 %v3980_v18  ;;  %v3842_v51 = vld [vmem:[%s6270_s0 + $0x198] sm:$0xff]  }
 0x128   :  { %v3774_v1 = vunpack.c.l.bf16 %v3993_v30  ;;  %v5870_v31 = vmul.f32 %v4260_v20, %v3163_v46  ;;  %v4274_v50 = vunpack.i.l.bf16 %v5816_v45  ;;  %v3174_v4 = vunpack.c.l.bf16 %v5866_v35 }
 0x129   :  { %v4481_v36 = vpack.i.bf16 %v3775_v40, %v3723_v44  ;;  %v4255_v26 = vunpack.i.h.bf16 %v5836_v7  ;;  %v2016_v41 = vmul.f32 %v4249_v59, %v3154_v2  ;;  %v2237_v58 = vadd.f32 %v2236_v23, %v2015_v15 }
 0x12a   :  { %v4476_v32 = vpack.i.bf16 %v3774_v1, %v3722_v12  ;;  %v3719_v16 = vunpack.c.h.bf16 %v5809_v62  ;;  %v3771_v17 = vunpack.c.h.bf16 %v5814_v57  ;;  %v2830_v55 = vadd.f32 %v2829_v25, %v2828_v28 }
 0x12b   :  { %4482 = vperm.xlu2 %4025, %v4481_v36   ;;  %v2773_v34 = vadd.f32 %v2772_v49, %v2771_v61  ;;  %v3159_v54 = vunpack.c.h.bf16 %v5844_v11  ;;  %v2018_v21 = vmul.f32 %v4254_v29, %v3158_v53  ;;  %v2017_v39 = vmul.f32 %v4250_v3, %v3155_v9  ;;  %v5894_v49 = vld [vmem:[%s6271_s1 + $0x2c0] sm:$0xff]   ;;  %v5899_v61 = vld [vmem:[%s6271_s1 + $0x328] sm:$0xff]   ;;  %v3981_v3 = vld [vmem:[%s6271_s1 + $0x2b8] sm:$0xff]  }
 0x12c   :  { %v2238_v8 = vadd.f32 %v2237_v58, %v2016_v41  ;;  %4477 = vperm.xlu1 %4014, %v4476_v32   ;;  %v2833_v15 = vsel %vm45_vm0, %v3774_v1, 0.0  ;;  %v2831_v24 = vsel %vm45_vm0, %v3771_v17, 0.0  ;;  %v4471_v62 = vpack.i.bf16 %v3771_v17, %v3719_v16 }
 0x12d   :  { %v2774_v57 = vsel %vm45_vm0, %v3719_v16, 0.0  ;;  %v2776_v47 = vsel %vm45_vm0, %v3722_v12, 0.0  ;;  %v2832_v56 = vadd.f32 %v2831_v24, %v2830_v55  ;;  %v2026_v20 = vmul.f32 %v4274_v50, %v3174_v4  ;;  %v4283_v24 = vpop.permute.xlu1 %4282 }
 0x12e   :  { %v2239_v60 = vadd.f32 %v2238_v8, %v2017_v39  ;;  %v2775_v7 = vadd.f32 %v2774_v57, %v2773_v34  ;;  %4472 = vperm.xlu0 %4003, %v4471_v62   ;;  %v4270_v46 = vunpack.i.h.bf16 %v4268_v63  ;;  %v4269_v5 = vunpack.i.l.bf16 %v4268_v63  ;;  %v5919_v8 = vpop.permute.xlu2 %4317 }
 0x12f   :  { %v3170_v11 = vunpack.c.l.bf16 %v3843_v6  ;;  %v2019_v42 = vmul.f32 %v4255_v26, %v3159_v54  ;;  %v2835_v22 = vsel %vm45_vm0, %v3775_v40, 0.0  ;;  %v3171_v25 = vunpack.c.h.bf16 %v3843_v6  ;;  %v3994_v40 = vld [vmem:[%s6271_s1 + $0x320] sm:$0xff]  }
 0x130   :  { %v2240_v52 = vadd.f32 %v2239_v60, %v2018_v21  ;;  %v2778_v29 = vsel %vm45_vm0, %v3723_v44, 0.0  ;;  %v2834_v18 = vadd.f32 %v2833_v15, %v2832_v56  ;;  %v2777_v30 = vadd.f32 %v2776_v47, %v2775_v7  ;;  %v4278_v60 = vpop.permute.xlu0 %4277  ;;  %v3845_v47 = vld [vmem:[%s6270_s0 + $0x1b0] sm:$0xff]  }
 0x131   :  { %v2024_v37 = vmul.f32 %v4269_v5, %v3170_v11  ;;  %v2025_v59 = vmul.f32 %v4270_v46, %v3171_v25  ;;  %v4264_v2 = vunpack.i.l.bf16 %v4263_v27  ;;  %v3166_v28 = vunpack.c.l.bf16 %v3842_v51  ;;  %v3846_v5 = vld [vmem:[%s6270_s0 + $0x1b8] sm:$0xff]  }
 0x132   :  { %v2241_v53 = vadd.f32 %v2240_v52, %v2019_v42  ;;  %v3730_v9 = vunpack.c.l.bf16 %v5894_v49  ;;  %v3782_v23 = vunpack.c.l.bf16 %v5899_v61  ;;  %v3727_v44 = vunpack.c.h.bf16 %v3981_v3 }
 0x133   :  { %v3779_v12 = vunpack.c.h.bf16 %v3994_v40  ;;  %v2252_v1 = vadd.f32 %v2025_v59, %v2024_v37  ;;  %v4265_v50 = vunpack.i.h.bf16 %v4263_v27  ;;  %v3167_v4 = vunpack.c.h.bf16 %v3842_v51 }
 0x134   :  { %v2242_v36 = vadd.f32 %v2241_v53, %v5849_v38  ;;  %v5914_v26 = vadd.f32 %v2741_v10, %v5801_v33  ;;  %v4275_v41 = vunpack.i.h.bf16 %v5816_v45  ;;  %v4496_v58 = vpack.i.bf16 %v3782_v23, %v3730_v9 }
 0x135   :  { %v4491_v32 = vpack.i.bf16 %v3779_v12, %v3727_v44  ;;  %v2253_v16 = vadd.f32 %v2252_v1, %v2026_v20  ;;  %v2022_v17 = vmul.f32 %v4264_v2, %v3166_v28  ;;  %v3726_v34 = vunpack.c.l.bf16 %v3981_v3  ;;  %v3847_v28 = vld [vmem:[%s6270_s0 + $0x1c0] sm:$0xff]  }
 0x136   :  { %v2243_v55 = vadd.f32 %v2242_v36, %v5870_v31  ;;  %v3175_v54 = vunpack.c.h.bf16 %v5866_v35  ;;  %4497 = vperm.xlu2 %4025, %v4496_v58   ;;  %v3778_v21 = vunpack.c.l.bf16 %v3994_v40  ;;  %v2836_v38 = vadd.f32 %v2835_v22, %v2834_v18  ;;  %v3983_v18 = vld [vmem:[%s6271_s1 + $0x2c8] sm:$0xff]  }
 0x137   :  { %4492 = vperm.xlu1 %4014, %v4491_v32   ;;  %v2779_v39 = vadd.f32 %v2778_v29, %v2777_v30  ;;  %v2023_v33 = vmul.f32 %v4265_v50, %v3167_v4  ;;  %v2780_v45 = vsel %vm45_vm0, %v3726_v34, 0.0  ;;  %v2153_v31 = vrot.slane %v5451_v43, 4  ;;  %v3996_v30 = vld [vmem:[%s6271_s1 + $0x330] sm:$0xff]  }
 0x138   :  { %v2244_v10 = vadd.f32 %v2243_v55, %v2022_v17  ;;  %v2837_v63 = vsel %vm45_vm0, %v3778_v21, 0.0  ;;  %v4486_v6 = vpack.i.bf16 %v3778_v21, %v3726_v34  ;;  %v2184_v35 = vrot.slane %v5561_v19, 4  ;;  %v5950_v17 = vpop.permute.xlu2 %4332 }
 0x139   :  { %v2781_v15 = vadd.f32 %v2780_v45, %v2779_v39  ;;  %v2782_v57 = vsel %vm45_vm0, %v3727_v44, 0.0  ;;  %v2743_v56 = vrot.slane %v5914_v26, 1  ;;  %v2027_v7 = vmul.f32 %v4275_v41, %v3175_v54  ;;  %v5961_v45 = vld [vmem:[%s6270_s0 + $0x1d8] sm:$0xff]  }
 0x13a   :  { %v5925_v62 = vadd.f32 %v2244_v10, %v2023_v33  ;;  %v4290_v20 = vunpack.i.h.bf16 %v5851_v0  ;;  %v2838_v46 = vadd.f32 %v2837_v63, %v2836_v38  ;;  %4487 = vperm.xlu0 %4003, %v4486_v6   ;;  %v2841_v11 = vsel %vm45_vm0, %v3782_v23, 0.0 }
 0x13b   :  { %v2784_v27 = vsel %vm45_vm0, %v3730_v9, 0.0  ;;  %v2839_v51 = vsel %vm45_vm0, %v3779_v12, 0.0  ;;  %v4285_v42 = vunpack.i.h.bf16 %v4283_v24  ;;  %v2783_v52 = vadd.f32 %v2782_v57, %v2781_v15 }
 0x13c   :  { %v4280_v22 = vunpack.i.h.bf16 %v4278_v60  ;;  %v4279_v25 = vunpack.i.l.bf16 %v4278_v60  ;;  %v3178_v29 = vunpack.c.l.bf16 %v3845_v47  ;;  %v4284_v37 = vunpack.i.l.bf16 %v4283_v24  ;;  %v4298_v24 = vpop.permute.xlu1 %4297 }
 0x13d   :  { %v3182_v53 = vunpack.c.l.bf16 %v3846_v5  ;;  %v3179_v59 = vunpack.c.h.bf16 %v3845_v47  ;;  %v2254_v2 = vadd.f32 %v2253_v16, %v2027_v7  ;;  %v2840_v3 = vadd.f32 %v2839_v51, %v2838_v46  ;;  %v3849_v47 = vld [vmem:[%s6270_s0 + $0x1d0] sm:$0xff]   ;;  %v4293_v7 = vpop.permute.xlu0 %4292  ;;  %v3848_v46 = vld [vmem:[%s6270_s0 + $0x1c8] sm:$0xff]  }
 0x13e   :  { %v2028_v40 = vmul.f32 %v4279_v25, %v3178_v29  ;;  %v3735_v9 = vunpack.c.h.bf16 %v3983_v18  ;;  %v3787_v23 = vunpack.c.h.bf16 %v3996_v30  ;;  %v3183_v44 = vunpack.c.h.bf16 %v3846_v5 }
 0x13f   :  { %v3734_v12 = vunpack.c.l.bf16 %v3983_v18  ;;  %v3786_v1 = vunpack.c.l.bf16 %v3996_v30  ;;  %v3731_v50 = vunpack.c.h.bf16 %v5894_v49  ;;  %v4289_v4 = vunpack.i.l.bf16 %v5851_v0 }
 0x140   :  { %v2029_v36 = vmul.f32 %v4280_v22, %v3179_v59  ;;  %v2255_v41 = vadd.f32 %v2254_v2, %v2028_v40  ;;  %v4511_v58 = vpack.i.bf16 %v3787_v23, %v3735_v9  ;;  %v3186_v32 = vunpack.c.l.bf16 %v3847_v28 }
 0x141   :  { %v3187_v16 = vunpack.c.h.bf16 %v3847_v28  ;;  %v2030_v55 = vmul.f32 %v4284_v37, %v3182_v53  ;;  %v4506_v34 = vpack.i.bf16 %v3786_v1, %v3734_v12  ;;  %v3783_v21 = vunpack.c.h.bf16 %v5899_v61  ;;  %v3997_v53 = vld [vmem:[%s6271_s1 + $0x338] sm:$0xff]  }
 0x142   :  { %v2256_v54 = vadd.f32 %v2255_v41, %v2029_v36  ;;  %4512 = vperm.xlu2 %4025, %v4511_v58   ;;  %v2842_v38 = vadd.f32 %v2841_v11, %v2840_v3  ;;  %v2785_v39 = vadd.f32 %v2784_v27, %v2783_v52  ;;  %v5954_v33 = vadd.f32 %v2153_v31, %v5451_v43  ;;  %v5985_v3 = vpop.permute.xlu2 %4347 }
 0x143   :  { %v2031_v49 = vmul.f32 %v4285_v42, %v3183_v44  ;;  %v2788_v0 = vsel %vm45_vm0, %v3734_v12, 0.0  ;;  %4507 = vperm.xlu1 %4014, %v4506_v34   ;;  %v2786_v10 = vsel %vm45_vm0, %v3731_v50, 0.0  ;;  %v2843_v6 = vsel %vm45_vm0, %v3783_v21, 0.0 }
 0x144   :  { %v2257_v63 = vadd.f32 %v2256_v54, %v2030_v55  ;;  %v4501_v61 = vpack.i.bf16 %v3783_v21, %v3731_v50  ;;  %v2787_v15 = vadd.f32 %v2786_v10, %v2785_v39  ;;  %v5965_v43 = vadd.f32 %v2184_v35, %v5561_v19  ;;  %v5991_v21 = vpop.permute.xlu1 %4312 }
 0x145   :  { %v2744_v31 = vadd.f32 %v2743_v56, %v5914_v26  ;;  %v2032_v57 = vmul.f32 %v4289_v4, %v3186_v32  ;;  %v2844_v60 = vadd.f32 %v2843_v6, %v2842_v38  ;;  %v2033_v5 = vmul.f32 %v4290_v20, %v3187_v16  ;;  %v3984_v20 = vld [vmem:[%s6271_s1 + $0x2d0] sm:$0xff]   ;;  %v4308_v10 = vpop.permute.xlu0 %4307 }
 0x146   :  { %v4304_v11 = vunpack.i.l.bf16 %v5884_v13  ;;  %v2258_v27 = vadd.f32 %v2257_v63, %v2031_v49  ;;  %v2845_v19 = vsel %vm45_vm0, %v3786_v1, 0.0  ;;  %4502 = vperm.xlu0 %4003, %v4501_v61   ;;  %v3198_v26 = vunpack.c.l.bf16 %v5961_v45 }
 0x147   :  { %v2847_v35 = vsel %vm45_vm0, %v3787_v23, 0.0  ;;  %v2790_v56 = vsel %vm45_vm0, %v3735_v9, 0.0  ;;  %v2789_v51 = vadd.f32 %v2788_v0, %v2787_v15  ;;  %v4299_v42 = vunpack.i.l.bf16 %v4298_v24 }
 0x148   :  { %v3194_v52 = vunpack.c.l.bf16 %v3849_v47  ;;  %v4294_v22 = vunpack.i.l.bf16 %v4293_v7  ;;  %v3190_v25 = vunpack.c.l.bf16 %v3848_v46  ;;  %v2846_v29 = vadd.f32 %v2845_v19, %v2844_v60  ;;  %v3851_v60 = vld [vmem:[%s6270_s0 + $0x1e0] sm:$0xff]   ;;  %v3852_v19 = vld [vmem:[%s6270_s0 + $0x1e8] sm:$0xff]  }
 0x149   :  { %v4295_v18 = vunpack.i.h.bf16 %v4293_v7  ;;  %v3191_v30 = vunpack.c.h.bf16 %v3848_v46  ;;  %v2259_v37 = vadd.f32 %v2258_v27, %v2032_v57  ;;  %v4300_v59 = vunpack.i.h.bf16 %v4298_v24 }
 0x14a   :  { %v3739_v2 = vunpack.c.h.bf16 %v3984_v20  ;;  %v3791_v28 = vunpack.c.h.bf16 %v3997_v53  ;;  %v3195_v40 = vunpack.c.h.bf16 %v3849_v47  ;;  %v2034_v9 = vmul.f32 %v4294_v22, %v3190_v25 }
 0x14b   :  { %v2260_v23 = vadd.f32 %v2259_v37, %v2033_v5  ;;  %v3738_v44 = vunpack.c.l.bf16 %v3984_v20  ;;  %v4560_v12 = vmov 0.0   ;;  %v2036_v1 = vmul.f32 %v4299_v42, %v3194_v52  ;;  %v6009_v42 = vpop.permute.xlu2 %4362 }
 0x14c   :  { %46 = vst.msk [vmem:[#allocation3] sm:$0xff] %vm45_vm0, %v4560_v12  ;;  %v4521_v50 = vpack.i.bf16 %v3791_v28, %v3739_v2  ;;  %v3790_v4 = vunpack.c.l.bf16 %v3997_v53  ;;  %v2035_v36 = vmul.f32 %v4295_v18, %v3191_v30  ;;  %v2851_v58 = vsel %vm45_vm0, %v3791_v28, 0.0  ;;  %v6018_v18 = vpop.permute.xlu1 %4327  ;;  %v3853_v30 = vld [vmem:[%s6270_s0 + $0x1f0] sm:$0xff]  }
 0x14d   :  { %v2261_v41 = vadd.f32 %v2260_v23, %v2034_v9  ;;  %v2848_v32 = vadd.f32 %v2847_v35, %v2846_v29  ;;  %v2791_v34 = vadd.f32 %v2790_v56, %v2789_v51  ;;  %v2792_v54 = vsel %vm45_vm0, %v3738_v44, 0.0  ;;  %v6023_v28 = vpop.permute.xlu0 %4322 }
 0x14e   :  { %4522 = vperm.xlu1 %4014, %v4521_v50   ;;  %v2849_v16 = vsel %vm45_vm0, %v3790_v4, 0.0  ;;  %v4516_v55 = vpack.i.bf16 %v3790_v4, %v3738_v44  ;;  %v2794_v39 = vsel %vm45_vm0, %v3739_v2, 0.0  ;;  %v5996_v0 = vsel %vm2392_vm5, %v2744_v31, %v5545_v14 }
 0x14f   :  { %v2262_v38 = vadd.f32 %v2261_v41, %v2035_v36  ;;  %v2850_v49 = vadd.f32 %v2849_v16, %v2848_v32  ;;  %v4305_v63 = vunpack.i.h.bf16 %v5884_v13  ;;  %v3199_v6 = vunpack.c.h.bf16 %v5961_v45 }
 0x150   :  { %v2793_v61 = vadd.f32 %v2792_v54, %v2791_v34  ;;  %4517 = vperm.xlu0 %4003, %v4516_v55   ;;  %v2037_v15 = vmul.f32 %v4300_v59, %v3195_v40  ;;  %v2155_v47 = vrot.slane %v5954_v33, 2  ;;  %v2186_v7 = vrot.slane %v5965_v43, 2  ;;  %v3856_v40 = vld [vmem:[%s6270_s0 + $0x208] sm:$0xff]   ;;  %v3854_v34 = vld [vmem:[%s6270_s0 + $0x1f8] sm:$0xff]  }
 0x151   :  { %v2263_v24 = vadd.f32 %v2262_v38, %v2036_v1  ;;  %v2852_v57 = vadd.f32 %v2851_v58, %v2850_v49  ;;  %v2215_v31 = vrot.slane %v5741_v48, 4  ;;  %v2038_v46 = vmul.f32 %v4304_v11, %v3198_v26 }
 0x152   :  { %v2795_v14 = vadd.f32 %v2794_v39, %v2793_v61  ;;  %v2039_v45 = vmul.f32 %v4305_v63, %v3199_v6  ;;  %v4309_v35 = vunpack.i.l.bf16 %v4308_v10  ;;  %v3202_v56 = vunpack.c.l.bf16 %v3851_v60 }
 0x153   :  { %v2264_v13 = vadd.f32 %v2263_v24, %v2037_v15  ;;  %v2853_v5 = vrot.slane %v2852_v57, 4  ;;  %v4310_v52 = vunpack.i.h.bf16 %v4308_v10  ;;  %v3203_v22 = vunpack.c.h.bf16 %v3851_v60 }
 0x154   :  { %v2796_v27 = vrot.slane %v2795_v14, 4  ;;  %v6012_v20 = vadd.f32 %v2155_v47, %v5954_v33  ;;  %v6015_v11 = vadd.f32 %v2186_v7, %v5965_v43  ;;  %v4314_v29 = vunpack.i.l.bf16 %v5991_v21  ;;  %v6040_v15 = vpop.permute.xlu1 %4342  ;;  %v2401_v47 = vld [vmem:[#allocation3] sm:$0xff] }
 0x155   :  { %v2854_v51 = vadd.f32 %v2853_v5, %v2852_v57  ;;  %v2265_v25 = vadd.f32 %v2264_v13, %v2038_v46  ;;  %v3206_v53 = vunpack.c.l.bf16 %v3852_v19  ;;  %v2040_v59 = vmul.f32 %v4309_v35, %v3202_v56 }
 0x156   :  { %v2797_v26 = vadd.f32 %v2796_v27, %v2795_v14  ;;  %v6026_v33 = vadd.f32 %v2215_v31, %v5741_v48  ;;  %v4320_v43 = vunpack.i.h.bf16 %v5919_v8  ;;  %v4315_v23 = vunpack.i.h.bf16 %v5991_v21  ;;  %v3855_v14 = vld [vmem:[%s6270_s0 + $0x200] sm:$0xff]   ;;  %v4338_v31 = vpop.permute.xlu0 %4337  ;;  %v3857_v27 = vld [vmem:[%s6270_s0 + $0x210] sm:$0xff]  }
 0x157   :  { %v2855_v37 = vrot.slane %v2854_v51, 2  ;;  %v2266_v2 = vadd.f32 %v2265_v25, %v2039_v45  ;;  %v3207_v12 = vunpack.c.h.bf16 %v3852_v19  ;;  %v2041_v1 = vmul.f32 %v4310_v52, %v3203_v22 }
 0x158   :  { %v2798_v9 = vrot.slane %v2797_v26, 2  ;;  %v4319_v4 = vunpack.i.l.bf16 %v5919_v8  ;;  %v3210_v36 = vunpack.c.l.bf16 %v3853_v30  ;;  %v4334_v41 = vunpack.i.l.bf16 %v5950_v17 }
 0x159   :  { %v2856_v44 = vadd.f32 %v2855_v37, %v2854_v51  ;;  %v2267_v50 = vadd.f32 %v2266_v2, %v2040_v59  ;;  %v3222_v58 = vunpack.c.l.bf16 %v3856_v40  ;;  %v2042_v16 = vmul.f32 %v4314_v29, %v3206_v53 }
 0x15a   :  { %v2799_v48 = vadd.f32 %v2798_v9, %v2797_v26  ;;  %v3211_v54 = vunpack.c.h.bf16 %v3853_v30  ;;  %v4335_v21 = vunpack.i.h.bf16 %v5950_v17  ;;  %v3223_v38 = vunpack.c.h.bf16 %v3856_v40  ;;  %v6043_v17 = vpop.permute.xlu2 %4377  ;;  %v3859_v40 = vld [vmem:[%s6270_s0 + $0x220] sm:$0xff]  }
 0x15b   :  { %v2857_v32 = vrot.slane %v2856_v44, 1  ;;  %v2268_v55 = vadd.f32 %v2267_v50, %v2041_v1  ;;  %v2043_v8 = vmul.f32 %v4315_v23, %v3207_v12  ;;  %v4324_v6 = vunpack.i.l.bf16 %v6023_v28 }
 0x15c   :  { %v2800_v39 = vrot.slane %v2799_v48, 1  ;;  %v3214_v61 = vunpack.c.l.bf16 %v3854_v34  ;;  %v2217_v24 = vrot.slane %v6026_v33, 2  ;;  %v2044_v57 = vmul.f32 %v4319_v4, %v3210_v36 }
 0x15d   :  { %v2858_v49 = vadd.f32 %v2857_v32, %v2856_v44  ;;  %v2269_v10 = vadd.f32 %v2268_v55, %v2042_v16  ;;  %v2050_v60 = vmul.f32 %v4334_v41, %v3222_v58  ;;  %v2051_v46 = vmul.f32 %v4335_v21, %v3223_v38  ;;  %v6068_v41 = vpop.permute.xlu1 %4357 }
 0x15e   :  { %v2801_v63 = vadd.f32 %v2800_v39, %v2799_v48  ;;  %v4325_v5 = vunpack.i.h.bf16 %v6023_v28  ;;  %v3215_v45 = vunpack.c.h.bf16 %v3854_v34  ;;  %v2045_v19 = vmul.f32 %v4320_v43, %v3211_v54  ;;  %v4353_v16 = vpop.permute.xlu0 %4352 }
 0x15f   :  { %v2270_v7 = vadd.f32 %v2269_v10, %v2043_v8  ;;  %v4329_v56 = vunpack.i.l.bf16 %v6018_v18  ;;  %v3218_v22 = vunpack.c.l.bf16 %v3855_v14  ;;  %v2046_v25 = vmul.f32 %v4324_v6, %v3214_v61  ;;  %v3860_v61 = vld [vmem:[%s6270_s0 + $0x228] sm:$0xff]  }
 0x160   :  { %v2872_v13 = vsel %vm2394_vm6, %v2801_v63, %v5996_v0  ;;  %v3858_v0 = vld [vmem:[%s6270_s0 + $0x218] sm:$0xff]   ;;  %v4339_v26 = vunpack.i.l.bf16 %v4338_v31  ;;  %v4340_v30 = vunpack.i.h.bf16 %v4338_v31  ;;  %v3226_v37 = vunpack.c.l.bf16 %v3857_v27 }
 0x161   :  { %v2873_v35 = vsel %vm2396_vm7, %v2858_v49, %v2872_v13  ;;  %v2271_v51 = vadd.f32 %v2270_v7, %v2044_v57  ;;  %v3227_v53 = vunpack.c.h.bf16 %v3857_v27  ;;  %v2283_v59 = vadd.f32 %v2051_v46, %v2050_v60 }
 0x162   :  { %v2875_v52 = vadd.f32 %v2873_v35, %v2401_v47  ;;  %v4330_v2 = vunpack.i.h.bf16 %v6018_v18  ;;  %v3219_v28 = vunpack.c.h.bf16 %v3855_v14  ;;  %v2047_v43 = vmul.f32 %v4325_v5, %v3215_v45  ;;  %v6072_v39 = vpop.permute.xlu2 %4392  ;;  %v3861_v45 = vld [vmem:[%s6270_s0 + $0x230] sm:$0xff]  }
 0x163   :  { %v2272_v29 = vadd.f32 %v2271_v51, %v2045_v19  ;;  %v4344_v23 = vunpack.i.l.bf16 %v6040_v15  ;;  %v3230_v44 = vunpack.c.l.bf16 %v3858_v0  ;;  %v2052_v12 = vmul.f32 %v4339_v26, %v3226_v37 }
 0x164   :  { %2876 = vst.msk [vmem:[#allocation3] sm:$0xff] %vm45_vm0, %v2875_v52  ;;  %v2188_v1 = vrot.slane %v6015_v11, 1  ;;  %v2218_v50 = vadd.f32 %v2217_v24, %v6026_v33  ;;  %v2048_v4 = vmul.f32 %v4329_v56, %v3218_v22  ;;  %v4345_v36 = vunpack.i.h.bf16 %v6040_v15 }
 0x165   :  { %v2273_v9 = vadd.f32 %v2272_v29, %v2046_v25  ;;  %v3231_v48 = vunpack.c.h.bf16 %v3858_v0  ;;  %v2053_v58 = vmul.f32 %v4340_v30, %v3227_v53  ;;  %v2284_v32 = vadd.f32 %v2283_v59, %v2052_v12  ;;  %v6087_v27 = vpop.permute.xlu1 %4372  ;;  %v3862_v29 = vld [vmem:[%s6270_s0 + $0x238] sm:$0xff]   ;;  %v3863_v12 = vld [vmem:[%s6270_s0 + $0x240] sm:$0xff]  }
 0x166   :  { %v2157_v55 = vrot.slane %v6012_v20, 1  ;;  %v4349_v34 = vunpack.i.l.bf16 %v5985_v3  ;;  %v3234_v54 = vunpack.c.l.bf16 %v3859_v40  ;;  %v2049_v21 = vmul.f32 %v4330_v2, %v3219_v28  ;;  %v4368_v51 = vpop.permute.xlu0 %4367 }
 0x167   :  { %v2274_v18 = vadd.f32 %v2273_v9, %v2047_v43  ;;  %v2054_v33 = vmul.f32 %v4344_v23, %v3230_v44  ;;  %v2285_v49 = vadd.f32 %v2284_v32, %v2053_v58  ;;  %v2189_v8 = vadd.f32 %v2188_v1, %v6015_v11 }
 0x168   :  { %v2246_v10 = vrot.slane %v5925_v62, 4  ;;  %v4350_v63 = vunpack.i.h.bf16 %v5985_v3  ;;  %v3235_v6 = vunpack.c.h.bf16 %v3859_v40  ;;  %v2219_v15 = vrot.slane %v2218_v50, 1 }
 0x169   :  { %v2275_v38 = vadd.f32 %v2274_v18, %v2048_v4  ;;  %v2055_v60 = vmul.f32 %v4345_v36, %v3231_v48  ;;  %v2286_v47 = vadd.f32 %v2285_v49, %v2054_v33  ;;  %v2158_v7 = vadd.f32 %v2157_v55, %v6012_v20  ;;  %v3865_v36 = vld [vmem:[%s6270_s0 + $0x250] sm:$0xff]  }
 0x16a   :  { %v2056_v31 = vmul.f32 %v4349_v34, %v3234_v54  ;;  %v4354_v46 = vunpack.i.l.bf16 %v4353_v16  ;;  %v3238_v13 = vunpack.c.l.bf16 %v3860_v61  ;;  %v2247_v3 = vadd.f32 %v2246_v10, %v5925_v62  ;;  %v6094_v37 = vpop.permute.xlu2 %4407  ;;  %v3869_v10 = vld [vmem:[%s6270_s0 + $0x270] sm:$0xff]  }
 0x16b   :  { %v2880_v24 = vld [vmem:[#allocation3] sm:$0xff]  ;;  %v6080_v57 = vadd.f32 %v2275_v38, %v2049_v21  ;;  %v2287_v11 = vadd.f32 %v2286_v47, %v2055_v60  ;;  %v2057_v5 = vmul.f32 %v4350_v63, %v3235_v6  ;;  %v2385_v19 = vsel %vm2384_vm1, %v2189_v8, %v2158_v7  ;;  %v3870_v7 = vld [vmem:[%s6270_s0 + $0x278] sm:$0xff]  }
 0x16c   :  { %v2881_v14 = vmax.f32 %v2880_v24, 1e-06  ;;  %v4355_v35 = vunpack.i.h.bf16 %v4353_v16  ;;  %v3239_v56 = vunpack.c.h.bf16 %v3860_v61  ;;  %v2220_v52 = vadd.f32 %v2219_v15, %v2218_v50 }
 0x16d   :  { %v2288_v20 = vadd.f32 %v2287_v11, %v2056_v31  ;;  %v4359_v22 = vunpack.i.l.bf16 %v6068_v41  ;;  %v3242_v25 = vunpack.c.l.bf16 %v3861_v45  ;;  %v2058_v0 = vmul.f32 %v4354_v46, %v3238_v13  ;;  %v6104_v1 = vpop.permute.xlu1 %4387  ;;  %v6131_v11 = vld [vmem:[%s6270_s0 + $0x268] sm:$0xff]  }
 0x16e   :  { %2885 = vperm.xlu2 %4025, %v2881_v14   ;;  %v2248_v26 = vrot.slane %v2247_v3, 2  ;;  %v3243_v30 = vunpack.c.h.bf16 %v3861_v45  ;;  %v4360_v53 = vunpack.i.h.bf16 %v6068_v41  ;;  %v2059_v59 = vmul.f32 %v4355_v35, %v3239_v56  ;;  %v6110_v48 = vpop.permute.xlu0 %4382 }
 0x16f   :  { %v2289_v62 = vadd.f32 %v2288_v20, %v2057_v5  ;;  %v6098_v28 = vsel %vm2386_vm2, %v2220_v52, %v2385_v19  ;;  %v4364_v43 = vunpack.i.l.bf16 %v6009_v42  ;;  %v3246_v40 = vunpack.c.l.bf16 %v3862_v29 }
 0x170   :  { %v2060_v9 = vmul.f32 %v4359_v22, %v3242_v25  ;;  %v2249_v44 = vadd.f32 %v2248_v26, %v2247_v3  ;;  %v4365_v50 = vunpack.i.h.bf16 %v6009_v42  ;;  %v3247_v4 = vunpack.c.h.bf16 %v3862_v29  ;;  %v3864_v42 = vld [vmem:[%s6270_s0 + $0x248] sm:$0xff]  }
 0x171   :  { %v2290_v2 = vadd.f32 %v2289_v62, %v2058_v0  ;;  %v2061_v41 = vmul.f32 %v4360_v53, %v3243_v30  ;;  %v2062_v58 = vmul.f32 %v4364_v43, %v3246_v40  ;;  %v4369_v16 = vunpack.i.l.bf16 %v4368_v51  ;;  %v3871_v0 = vld [vmem:[%s6270_s0 + $0x280] sm:$0xff]   ;;  %v3882_v40 = vld [vmem:[%s6270_s0 + $0x2d8] sm:$0xff]  }
 0x172   :  { %v3250_v55 = vunpack.c.l.bf16 %v3863_v12  ;;  %v2250_v34 = vrot.slane %v2249_v44, 1  ;;  %v4380_v54 = vunpack.i.h.bf16 %v6043_v17  ;;  %v3259_v21 = vunpack.c.h.bf16 %v3865_v36  ;;  %v6120_v61 = vpop.permute.xlu2 %4422 }
 0x173   :  { %v2291_v23 = vadd.f32 %v2290_v2, %v2059_v59  ;;  %v2063_v38 = vmul.f32 %v4365_v50, %v3247_v4  ;;  %v4370_v33 = vunpack.i.h.bf16 %v4368_v51  ;;  %v3251_v49 = vunpack.c.h.bf16 %v3863_v12 }
 0x174   :  { %v4379_v63 = vunpack.i.l.bf16 %v6043_v17  ;;  %v3258_v6 = vunpack.c.l.bf16 %v3865_v36  ;;  %v4374_v15 = vunpack.i.l.bf16 %v6087_v27  ;;  %v3254_v24 = vunpack.c.l.bf16 %v3864_v42 }
 0x175   :  { %v2292_v18 = vadd.f32 %v2291_v23, %v2060_v9  ;;  %v2064_v60 = vmul.f32 %v4369_v16, %v3250_v55  ;;  %v6126_v14 = vadd.f32 %v2250_v34, %v2249_v44  ;;  %v2069_v31 = vmul.f32 %v4380_v54, %v3259_v21  ;;  %v4403_v17 = vpop.permute.xlu1 %4402  ;;  %v3867_v16 = vld [vmem:[%s6270_s0 + $0x260] sm:$0xff]  }
 0x176   :  { %v3274_v46 = vunpack.c.l.bf16 %v3869_v10  ;;  %v3275_v13 = vunpack.c.h.bf16 %v3869_v10  ;;  %v4375_v3 = vunpack.i.h.bf16 %v6087_v27  ;;  %v3255_v5 = vunpack.c.h.bf16 %v3864_v42  ;;  %v4398_v35 = vpop.permute.xlu0 %4397  ;;  %v3866_v27 = vld [vmem:[%s6270_s0 + $0x258] sm:$0xff]   ;;  %v3883_v42 = vld [vmem:[%s6270_s0 + $0x2e0] sm:$0xff]  }
 0x177   :  { %v2293_v32 = vadd.f32 %v2292_v18, %v2061_v41  ;;  %v2065_v45 = vmul.f32 %v4370_v33, %v3251_v49  ;;  %v4404_v56 = vunpack.i.l.bf16 %v4403_v17  ;;  %v3278_v20 = vunpack.c.l.bf16 %v3870_v7 }
 0x178   :  { %v4400_v51 = vunpack.i.h.bf16 %v4398_v35  ;;  %v4399_v52 = vunpack.i.l.bf16 %v4398_v35  ;;  %v2068_v22 = vmul.f32 %v4379_v63, %v3258_v6  ;;  %v3270_v25 = vunpack.c.l.bf16 %v6131_v11 }
 0x179   :  { %v2294_v8 = vadd.f32 %v2293_v32, %v2062_v58  ;;  %v2066_v62 = vmul.f32 %v4374_v15, %v3254_v24  ;;  %v4405_v29 = vunpack.i.h.bf16 %v4403_v17  ;;  %v3279_v30 = vunpack.c.h.bf16 %v3870_v7 }
 0x17a   :  { %v2076_v53 = vmul.f32 %v4399_v52, %v3274_v46  ;;  %v2077_v59 = vmul.f32 %v4400_v51, %v3275_v13  ;;  %v4394_v2 = vunpack.i.l.bf16 %v6072_v39  ;;  %v3271_v43 = vunpack.c.h.bf16 %v6131_v11  ;;  %v3886_v11 = vld [vmem:[%s6270_s0 + $0x2f8] sm:$0xff]  }
 0x17b   :  { %v2295_v47 = vadd.f32 %v2294_v8, %v2063_v38  ;;  %v2067_v9 = vmul.f32 %v4375_v3, %v3255_v5  ;;  %v4409_v44 = vunpack.i.l.bf16 %v6094_v37  ;;  %v3282_v12 = vunpack.c.l.bf16 %v3871_v0  ;;  %v6156_v38 = vpop.permute.xlu2 %4437 }
 0x17c   :  { %v2078_v50 = vmul.f32 %v4404_v56, %v3278_v20  ;;  %v2314_v4 = vadd.f32 %v2077_v59, %v2076_v53  ;;  %v3283_v36 = vunpack.c.h.bf16 %v3871_v0  ;;  %v4384_v18 = vunpack.i.l.bf16 %v6110_v48 }
 0x17d   :  { %v2296_v19 = vadd.f32 %v2295_v47, %v2064_v60  ;;  %v3262_v58 = vunpack.c.l.bf16 %v3866_v27  ;;  %v3327_v32 = vunpack.c.h.bf16 %v3882_v40  ;;  %v2079_v55 = vmul.f32 %v4405_v29, %v3279_v30  ;;  %v6151_v54 = vpop.permute.xlu1 %4417 }
 0x17e   :  { %v2315_v34 = vadd.f32 %v2314_v4, %v2078_v50  ;;  %v3326_v21 = vunpack.c.l.bf16 %v3882_v40  ;;  %v4385_v33 = vunpack.i.h.bf16 %v6110_v48  ;;  %v3263_v49 = vunpack.c.h.bf16 %v3866_v27  ;;  %v4413_v63 = vpop.permute.xlu0 %4412  ;;  %v3872_v48 = vld [vmem:[%s6270_s0 + $0x288] sm:$0xff]  }
 0x17f   :  { %v2297_v26 = vadd.f32 %v2296_v19, %v2065_v45  ;;  %v4420_v10 = vunpack.i.h.bf16 %v6151_v54  ;;  %v4410_v6 = vunpack.i.h.bf16 %v6094_v37  ;;  %v2080_v15 = vmul.f32 %v4409_v44, %v3282_v12 }
 0x180   :  { %v4424_v24 = vunpack.i.l.bf16 %v6120_v61  ;;  %v2316_v60 = vadd.f32 %v2315_v34, %v2079_v55  ;;  %v4389_v47 = vunpack.i.l.bf16 %v6104_v1  ;;  %v3266_v7 = vunpack.c.l.bf16 %v3867_v16 }
 0x181   :  { %v2298_v23 = vadd.f32 %v2297_v26, %v2066_v62  ;;  %v2070_v17 = vmul.f32 %v4384_v18, %v3262_v58  ;;  %v4425_v13 = vunpack.i.h.bf16 %v6120_v61  ;;  %v3330_v3 = vunpack.c.l.bf16 %v3883_v42  ;;  %v3884_v61 = vld [vmem:[%s6270_s0 + $0x2e8] sm:$0xff]  }
 0x182   :  { %v2102_v5 = vmul.f32 %v4420_v10, %v3326_v21  ;;  %v2317_v45 = vadd.f32 %v2316_v60, %v2080_v15  ;;  %v4390_v37 = vunpack.i.h.bf16 %v6104_v1  ;;  %v3267_v19 = vunpack.c.h.bf16 %v3867_v16  ;;  %v3873_v1 = vld [vmem:[%s6270_s0 + $0x290] sm:$0xff]  }
 0x183   :  { %v2299_v41 = vadd.f32 %v2298_v23, %v2067_v9  ;;  %v2071_v35 = vmul.f32 %v4385_v33, %v3263_v49  ;;  %v2081_v20 = vmul.f32 %v4410_v6, %v3283_v36  ;;  %v2103_v51 = vmul.f32 %v4424_v24, %v3327_v32  ;;  %v3885_v32 = vld [vmem:[%s6270_s0 + $0x2f0] sm:$0xff]  }
 0x184   :  { %v4414_v52 = vunpack.i.l.bf16 %v4413_v63  ;;  %v2074_v0 = vmul.f32 %v4394_v2, %v3270_v25  ;;  %v2072_v62 = vmul.f32 %v4389_v47, %v3266_v7  ;;  %v2104_v27 = vmul.f32 %v4425_v13, %v3330_v3 }
 0x185   :  { %v2300_v8 = vadd.f32 %v2299_v41, %v2068_v22  ;;  %v3286_v22 = vunpack.c.l.bf16 %v3872_v48  ;;  %v2345_v29 = vadd.f32 %v2103_v51, %v2102_v5  ;;  %v2318_v30 = vadd.f32 %v2317_v45, %v2081_v20  ;;  %v4433_v53 = vpop.permute.xlu1 %4432  ;;  %v6177_v41 = vpop.permute.xlu2 %4452  ;;  %v3887_v51 = vld [vmem:[%s6270_s0 + $0x300] sm:$0xff]  }
 0x186   :  { %v3331_v59 = vunpack.c.h.bf16 %v3883_v42  ;;  %v2073_v40 = vmul.f32 %v4390_v37, %v3267_v19  ;;  %v4415_v23 = vunpack.i.h.bf16 %v4413_v63  ;;  %v4428_v25 = vpop.permute.xlu0 %4427  ;;  %v3334_v50 = vunpack.c.l.bf16 %v3884_v61 }
 0x187   :  { %v2301_v46 = vadd.f32 %v2300_v8, %v2069_v31  ;;  %v4395_v31 = vunpack.i.h.bf16 %v6072_v39  ;;  %v3287_v39 = vunpack.c.h.bf16 %v3872_v48  ;;  %v2082_v2 = vmul.f32 %v4414_v52, %v3286_v22 }
 0x188   :  { %v4430_v44 = vunpack.i.h.bf16 %v4428_v25  ;;  %v4429_v12 = vunpack.i.l.bf16 %v4428_v25  ;;  %v3290_v18 = vunpack.c.l.bf16 %v3873_v1  ;;  %v3335_v58 = vunpack.c.h.bf16 %v3884_v61 }
 0x189   :  { %v2302_v56 = vadd.f32 %v2301_v46, %v2070_v17  ;;  %v2075_v4 = vmul.f32 %v4395_v31, %v3271_v43  ;;  %v2319_v16 = vadd.f32 %v2318_v30, %v2082_v2  ;;  %v4434_v55 = vunpack.i.l.bf16 %v4433_v53 }
 0x18a   :  { %v2105_v34 = vmul.f32 %v4429_v12, %v3331_v59  ;;  %v2346_v21 = vadd.f32 %v2345_v29, %v2104_v27  ;;  %v4419_v33 = vunpack.i.l.bf16 %v6151_v54  ;;  %v2083_v49 = vmul.f32 %v4415_v23, %v3287_v39  ;;  %v3874_v54 = vld [vmem:[%s6270_s0 + $0x298] sm:$0xff]  }
 0x18b   :  { %v2303_v26 = vadd.f32 %v2302_v56, %v2071_v35  ;;  %v3338_v8 = vunpack.c.l.bf16 %v3885_v32  ;;  %v4435_v43 = vunpack.i.h.bf16 %v4433_v53  ;;  %v2106_v10 = vmul.f32 %v4430_v44, %v3334_v50 }
 0x18c   :  { %v2347_v63 = vadd.f32 %v2346_v21, %v2105_v34  ;;  %v6189_v6 = vsel %vm2388_vm3, %v6126_v14, %v6098_v28  ;;  %v4439_v15 = vunpack.i.l.bf16 %v6156_v38  ;;  %v3339_v24 = vunpack.c.h.bf16 %v3885_v32 }
 0x18d   :  { %v2304_v9 = vadd.f32 %v2303_v26, %v2072_v62  ;;  %v2320_v47 = vadd.f32 %v2319_v16, %v2083_v49  ;;  %v2107_v7 = vmul.f32 %v4434_v55, %v3335_v58  ;;  %v4448_v46 = vpop.permute.xlu1 %4447  ;;  %v3291_v48 = vunpack.c.h.bf16 %v3873_v1  ;;  %v4468_v26 = vpop.permute.xlu2 %4467  ;;  %v3875_v1 = vld [vmem:[%s6270_s0 + $0x2a0] sm:$0xff]   ;;  %v3876_v16 = vld [vmem:[%s6270_s0 + $0x2a8] sm:$0xff]   ;;  %v3889_v55 = vld [vmem:[%s6270_s0 + $0x310] sm:$0xff]  }
 0x18e   :  { %v2348_v17 = vadd.f32 %v2347_v63, %v2106_v10  ;;  %v4440_v13 = vunpack.i.h.bf16 %v6156_v38  ;;  %v3342_v3 = vunpack.c.l.bf16 %v3886_v11  ;;  %v2084_v5 = vmul.f32 %v4419_v33, %v3290_v18  ;;  %v4443_v14 = vpop.permute.xlu0 %4442 }
 0x18f   :  { %v2305_v36 = vadd.f32 %v2304_v9, %v2073_v40  ;;  %v3294_v28 = vunpack.c.l.bf16 %v3874_v54  ;;  %v2108_v45 = vmul.f32 %v4435_v43, %v3338_v8  ;;  %v4449_v19 = vunpack.i.l.bf16 %v4448_v46  ;;  %v3888_v40 = vld [vmem:[%s6270_s0 + $0x308] sm:$0xff]  }
 0x190   :  { %v2349_v37 = vadd.f32 %v2348_v17, %v2107_v7  ;;  %v4444_v35 = vunpack.i.l.bf16 %v4443_v14  ;;  %v2109_v56 = vmul.f32 %v4439_v15, %v3339_v24  ;;  %v3343_v20 = vunpack.c.h.bf16 %v3886_v11 }
 0x191   :  { %v2306_v42 = vadd.f32 %v2305_v36, %v2074_v0  ;;  %v4445_v22 = vunpack.i.h.bf16 %v4443_v14  ;;  %v2321_v0 = vadd.f32 %v2320_v47, %v2084_v5  ;;  %v4454_v38 = vunpack.i.l.bf16 %v6177_v41 }
 0x192   :  { %v2350_v52 = vadd.f32 %v2349_v37, %v2108_v45  ;;  %v2085_v31 = vmul.f32 %v4444_v35, %v3291_v48  ;;  %v3295_v62 = vunpack.c.h.bf16 %v3874_v54  ;;  %v4450_v61 = vunpack.i.h.bf16 %v4448_v46 }
 0x193   :  { %v6192_v60 = vadd.f32 %v2306_v42, %v2075_v4  ;;  %v3346_v27 = vunpack.c.l.bf16 %v3887_v51  ;;  %v2110_v29 = vmul.f32 %v4440_v13, %v3342_v3  ;;  %v2086_v30 = vmul.f32 %v4449_v19, %v3294_v28 }
 0x194   :  { %v2322_v53 = vadd.f32 %v2321_v0, %v2085_v31  ;;  %v2351_v59 = vadd.f32 %v2350_v52, %v2109_v56  ;;  %v2277_v9 = vrot.slane %v6080_v57, 4  ;;  %v4455_v23 = vunpack.i.h.bf16 %v6177_v41  ;;  %v3877_v56 = vld [vmem:[%s6270_s0 + $0x2b0] sm:$0xff]  }
 0x195   :  { %v3347_v39 = vunpack.c.h.bf16 %v3887_v51  ;;  %v2111_v25 = vmul.f32 %v4445_v22, %v3343_v20  ;;  %v4463_v12 = vpop.permute.xlu1 %4462  ;;  %v3298_v50 = vunpack.c.l.bf16 %v3875_v1  ;;  %v2087_v4 = vmul.f32 %v4454_v38, %v3295_v62  ;;  %v4483_v13 = vpop.permute.xlu2 %4482  ;;  %v3890_v51 = vld [vmem:[%s6270_s0 + $0x318] sm:$0xff]  }
 0x196   :  { %v2323_v2 = vadd.f32 %v2322_v53, %v2086_v30  ;;  %v2352_v44 = vadd.f32 %v2351_v59, %v2110_v29  ;;  %v2112_v36 = vmul.f32 %v4450_v61, %v3346_v27  ;;  %v3299_v18 = vunpack.c.h.bf16 %v3875_v1  ;;  %v4458_v58 = vpop.permute.xlu0 %4457 }
 0x197   :  { %v3350_v32 = vunpack.c.l.bf16 %v3888_v40  ;;  %v4464_v34 = vunpack.i.l.bf16 %v4463_v12  ;;  %v4460_v21 = vunpack.i.h.bf16 %v4458_v58  ;;  %v4459_v42 = vunpack.i.l.bf16 %v4458_v58  ;;  %v3879_v58 = vld [vmem:[%s6270_s0 + $0x2c0] sm:$0xff]  }
 0x198   :  { %v2353_v41 = vadd.f32 %v2352_v44, %v2111_v25  ;;  %v2278_v33 = vadd.f32 %v2277_v9, %v6080_v57  ;;  %v2113_v49 = vmul.f32 %v4455_v23, %v3347_v39  ;;  %v3351_v8 = vunpack.c.h.bf16 %v3888_v40 }
 0x199   :  { %v4465_v43 = vunpack.i.h.bf16 %v4463_v12  ;;  %v2088_v10 = vmul.f32 %v4459_v42, %v3298_v50  ;;  %v2324_v63 = vadd.f32 %v2323_v2, %v2087_v4  ;;  %v4470_v15 = vunpack.i.h.bf16 %v4468_v26 }
 0x19a   :  { %v2354_v11 = vadd.f32 %v2353_v41, %v2112_v36  ;;  %v4469_v24 = vunpack.i.l.bf16 %v4468_v26  ;;  %v3302_v54 = vunpack.c.l.bf16 %v3876_v16  ;;  %v3354_v47 = vunpack.c.l.bf16 %v3889_v55  ;;  %v3878_v41 = vld [vmem:[%s6270_s0 + $0x2b8] sm:$0xff]  }
 0x19b   :  { %v2089_v7 = vmul.f32 %v4464_v34, %v3299_v18  ;;  %v2114_v17 = vmul.f32 %v4460_v21, %v3350_v32  ;;  %v2325_v46 = vadd.f32 %v2324_v63, %v2088_v10  ;;  %v3303_v3 = vunpack.c.h.bf16 %v3876_v16  ;;  %v3891_v34 = vld [vmem:[%s6270_s0 + $0x320] sm:$0xff]  }
 0x19c   :  { %v2355_v48 = vadd.f32 %v2354_v11, %v2113_v49  ;;  %v2115_v5 = vmul.f32 %v4465_v43, %v3351_v8  ;;  %v3355_v45 = vunpack.c.h.bf16 %v3889_v55  ;;  %v2279_v37 = vrot.slane %v2278_v33, 2  ;;  %v3892_v11 = vld [vmem:[%s6270_s0 + $0x328] sm:$0xff]  }
 0x19d   :  { %v2326_v28 = vadd.f32 %v2325_v46, %v2089_v7  ;;  %v2090_v19 = vmul.f32 %v4469_v24, %v3302_v54  ;;  %v2116_v35 = vmul.f32 %v4470_v15, %v3354_v47  ;;  %v3306_v22 = vunpack.c.l.bf16 %v3877_v56  ;;  %v4498_v4 = vpop.permute.xlu2 %4497 }
 0x19e   :  { %v2356_v14 = vadd.f32 %v2355_v48, %v2114_v17  ;;  %v4478_v57 = vpop.permute.xlu1 %4477  ;;  %v2308_v38 = vrot.slane %v6192_v60, 4  ;;  %v3358_v61 = vunpack.c.l.bf16 %v3890_v51  ;;  %v2280_v53 = vadd.f32 %v2279_v37, %v2278_v33 }
 0x19f   :  { %v4480_v62 = vunpack.i.h.bf16 %v4478_v57  ;;  %v4479_v26 = vunpack.i.l.bf16 %v4478_v57  ;;  %v2327_v29 = vadd.f32 %v2326_v28, %v2090_v19  ;;  %v4484_v59 = vunpack.i.l.bf16 %v4483_v13 }
 0x1a0   :  { %v4473_v20 = vpop.permute.xlu0 %4472  ;;  %v2357_v52 = vadd.f32 %v2356_v14, %v2115_v5  ;;  %v3307_v40 = vunpack.c.h.bf16 %v3877_v56  ;;  %v4485_v9 = vunpack.i.h.bf16 %v4483_v13  ;;  %v3359_v23 = vunpack.c.h.bf16 %v3890_v51  ;;  %v2918_v13 = vld [vmem:[#allocation5 + $0x78] sm:$0xff] }
 0x1a1   :  { %v4475_v31 = vunpack.i.h.bf16 %v4473_v20  ;;  %v4474_v0 = vunpack.i.l.bf16 %v4473_v20  ;;  %v2092_v2 = vmul.f32 %v4479_v26, %v3306_v22  ;;  %v2118_v44 = vmul.f32 %v4480_v62, %v3358_v61  ;;  %2923 = vmatpush.msra.mxu0 %v2918_v13  ;;  %v2915_v61 = vld [vmem:[#allocation5 + $0x60] sm:$0xff] }
 0x1a2   :  { %v2358_v30 = vadd.f32 %v2357_v52, %v2116_v35  ;;  %v2309_v12 = vadd.f32 %v2308_v38, %v6192_v60  ;;  %v2093_v50 = vmul.f32 %v4484_v59, %v3307_v40  ;;  %v2281_v36 = vrot.slane %v2280_v53, 1  ;;  %v2916_v35 = vld [vmem:[#allocation5 + $0x68] sm:$0xff] }
 0x1a3   :  { %v2091_v27 = vmul.f32 %v4474_v0, %v3303_v3  ;;  %v2117_v1 = vmul.f32 %v4475_v31, %v3355_v45  ;;  %v2119_v18 = vmul.f32 %v4485_v9, %v3359_v23  ;;  %v3311_v49 = vunpack.c.h.bf16 %v3878_v41  ;;  %v2917_v3 = vld [vmem:[#allocation5 + $0x70] sm:$0xff]  ;;  %v3880_v31 = vld [vmem:[%s6270_s0 + $0x2c8] sm:$0xff]   ;;  %v2914_v9 = vld [vmem:[#allocation5 + $0x58] sm:$0xff] }
 0x1a4   :  { %v2310_v21 = vrot.slane %v2309_v12, 2  ;;  %v3363_v8 = vunpack.c.h.bf16 %v3891_v34  ;;  %v3310_v63 = vunpack.c.l.bf16 %v3878_v41  ;;  %v3362_v15 = vunpack.c.l.bf16 %v3891_v34  ;;  %2924 = vmatpush.msra.mxu0 %v2917_v3  ;;  %v3881_v41 = vld [vmem:[%s6270_s0 + $0x2d0] sm:$0xff]   ;;  %v3894_v34 = vld [vmem:[%s6270_s0 + $0x338] sm:$0xff]  }
 0x1a5   :  { %v2328_v39 = vadd.f32 %v2327_v29, %v2091_v27  ;;  %v2359_v25 = vadd.f32 %v2358_v30, %v2117_v1  ;;  %v4499_v24 = vunpack.i.l.bf16 %v4498_v4  ;;  %v3314_v54 = vunpack.c.l.bf16 %v3879_v58  ;;  %v3893_v1 = vld [vmem:[%s6270_s0 + $0x330] sm:$0xff]   ;;  %v2909_v3 = vld [vmem:[#allocation5 + $0x30] sm:$0xff] }
 0x1a6   :  { %v2282_v47 = vadd.f32 %v2281_v36, %v2280_v53  ;;  %v4500_v5 = vunpack.i.h.bf16 %v4498_v4  ;;  %v3366_v28 = vunpack.c.l.bf16 %v3892_v11  ;;  %v2311_v14 = vadd.f32 %v2310_v21, %v2309_v12  ;;  %2925 = vmatpush.msra.mxu0 %v2916_v35 }
 0x1a7   :  { %v2329_v32 = vadd.f32 %v2328_v39, %v2092_v2  ;;  %v2360_v16 = vadd.f32 %v2359_v25, %v2118_v44  ;;  %v3315_v56 = vunpack.c.h.bf16 %v3879_v58  ;;  %v3367_v20 = vunpack.c.h.bf16 %v3892_v11  ;;  %v4513_v39 = vpop.permute.xlu2 %4512 }
 0x1a8   :  { %v2312_v51 = vrot.slane %v2311_v14, 1  ;;  %v2391_v52 = vsel %vm2390_vm4, %v2282_v47, %v6189_v6  ;;  %v2096_v22 = vmul.f32 %v4499_v24, %v3314_v54  ;;  %v2122_v27 = vmul.f32 %v4500_v5, %v3366_v28  ;;  %2926 = vmatpush.msra.mxu0 %v2915_v61  ;;  %v2910_v54 = vld [vmem:[#allocation5 + $0x38] sm:$0xff] }
 0x1a9   :  { %v4493_v55 = vpop.permute.xlu1 %4492  ;;  %v2330_v46 = vadd.f32 %v2329_v32, %v2093_v50  ;;  %v2361_v48 = vadd.f32 %v2360_v16, %v2119_v18  ;;  %v3318_v29 = vunpack.c.l.bf16 %v3880_v31  ;;  %v3370_v40 = vunpack.c.l.bf16 %v3893_v1  ;;  %v2913_v50 = vld [vmem:[#allocation5 + $0x50] sm:$0xff] }
 0x1aa   :  { %v4495_v42 = vunpack.i.h.bf16 %v4493_v55  ;;  %v4494_v33 = vunpack.i.l.bf16 %v4493_v55  ;;  %v2313_v23 = vadd.f32 %v2312_v51, %v2311_v14  ;;  %2927 = vmatpush.msra.mxu0 %v2914_v9  ;;  %v4515_v58 = vunpack.i.h.bf16 %v4513_v39  ;;  %v2907_v51 = vld [vmem:[#allocation5 + $0x20] sm:$0xff] }
 0x1ab   :  { %v4514_v32 = vunpack.i.l.bf16 %v4513_v39  ;;  %v3319_v16 = vunpack.c.h.bf16 %v3880_v31  ;;  %v3371_v55 = vunpack.c.h.bf16 %v3893_v1  ;;  %v3375_v13 = vunpack.c.h.bf16 %v3894_v34  ;;  %v2906_v31 = vld [vmem:[#allocation5 + $0x18] sm:$0xff] }
 0x1ac   :  { %v4488_v60 = vpop.permute.xlu0 %4487  ;;  %v2095_v57 = vmul.f32 %v4494_v33, %v3311_v49  ;;  %v2121_v45 = vmul.f32 %v4495_v42, %v3363_v8  ;;  %v6246_v4 = vsel %vm2392_vm5, %v2313_v23, %v2391_v52  ;;  %2928 = vmatpush.msra.mxu0 %v2913_v50  ;;  %v2911_v49 = vld [vmem:[#allocation5 + $0x40] sm:$0xff] }
 0x1ad   :  { %v4490_v43 = vunpack.i.h.bf16 %v4488_v60  ;;  %v4489_v10 = vunpack.i.l.bf16 %v4488_v60  ;;  %v2912_v60 = vld [vmem:[#allocation5 + $0x48] sm:$0xff] }
 0x1ae   :  { %2929 = vmatpush.msra.mxu0 %v2912_v60 }
 0x1af   :  { %v2094_v7 = vmul.f32 %v4489_v10, %v3310_v63  ;;  %v2120_v17 = vmul.f32 %v4490_v43, %v3362_v15  ;;  %v3322_v43 = vunpack.c.l.bf16 %v3881_v41  ;;  %v3374_v10 = vunpack.c.l.bf16 %v3894_v34  ;;  %v4526_v34 = vld [vmem:[%s6273_s3] ss:$0 sm:$0xff] }
 0x1b0   :  { %v2099_v63 = vmul.f32 %v4514_v32, %v3319_v16  ;;  %v2125_v15 = vmul.f32 %v4515_v58, %v3371_v55  ;;  %2930 = vmatpush.msra.mxu0 %v2911_v49 }
 0x1b1   :  { %v2331_v37 = vadd.f32 %v2330_v46, %v2094_v7  ;;  %v2362_v19 = vadd.f32 %v2361_v48, %v2120_v17  ;;  %v3323_v7 = vunpack.c.h.bf16 %v3881_v41 }
 0x1b2   :  { %2931 = vmatpush.msra.mxu0 %v2910_v54 }
 0x1b3   :  { %v2332_v0 = vadd.f32 %v2331_v37, %v2095_v57  ;;  %v2363_v38 = vadd.f32 %v2362_v19, %v2121_v45  ;;  %v2908_v45 = vld [vmem:[#allocation5 + $0x28] sm:$0xff] }
 0x1b4   :  { %2932 = vmatpush.msra.mxu0 %v2909_v3 }
 0x1b5   :  { %v4508_v62 = vpop.permute.xlu1 %4507  ;;  %v2333_v44 = vadd.f32 %v2332_v0, %v2096_v22  ;;  %v2364_v12 = vadd.f32 %v2363_v38, %v2122_v27  ;;  %v2904_v27 = vld [vmem:[#allocation5 + $0x8] sm:$0xff] }
 0x1b6   :  { %v4510_v6 = vunpack.i.h.bf16 %v4508_v62  ;;  %v4509_v59 = vunpack.i.l.bf16 %v4508_v62  ;;  %2933 = vmatpush.msra.mxu0 %v2908_v45  ;;  %v2905_v62 = vld [vmem:[#allocation5 + $0x10] sm:$0xff] }
 0x1b8   :  { %v4503_v26 = vpop.permute.xlu0 %4502  ;;  %v2098_v21 = vmul.f32 %v4509_v59, %v3318_v29  ;;  %v2124_v42 = vmul.f32 %v4510_v6, %v3370_v40  ;;  %2934 = vmatpush.msra.mxu0 %v2907_v51 }
 0x1b9   :  { %v4505_v30 = vunpack.i.h.bf16 %v4503_v26  ;;  %v4504_v53 = vunpack.i.l.bf16 %v4503_v26 }
 0x1ba   :  { %2935 = vmatpush.msra.mxu0 %v2906_v31 }
 0x1bb   :  { %v2097_v25 = vmul.f32 %v4504_v53, %v3315_v56  ;;  %v2123_v2 = vmul.f32 %v4505_v30, %v3367_v20  ;;  %v2903_v53 = vld [vmem:[#allocation5] sm:$0xff] }
 0x1bc   :  { %2936 = vmatpush.msra.mxu0 %v2905_v62 }
 0x1bd   :  { %v2334_v36 = vadd.f32 %v2333_v44, %v2097_v25  ;;  %v2365_v18 = vadd.f32 %v2364_v12, %v2123_v2 }
 0x1be   :  { %2937 = vmatpush.msra.mxu0 %v2904_v27 }
 0x1bf   :  { %v2335_v8 = vadd.f32 %v2334_v36, %v2098_v21  ;;  %v2366_v11 = vadd.f32 %v2365_v18, %v2124_v42  ;;  %v4527_v42 = vld [vmem:[%s6274_s4] ss:$0 sm:$0xff] }
 0x1c0   :  { %v4523_v33 = vpop.permute.xlu1 %4522  ;;  %2938 = vmatpush.msra.mxu0 %v2903_v53 }
 0x1c1   :  { %v4524_v47 = vunpack.i.l.bf16 %v4523_v33  ;;  %v4525_v48 = vunpack.i.h.bf16 %v4523_v33  ;;  %v2336_v14 = vadd.f32 %v2335_v8, %v2099_v63  ;;  %v2367_v57 = vadd.f32 %v2366_v11, %v2125_v15 }
 0x1c2   :  { %v4518_v24 = vpop.permute.xlu0 %4517 }
 0x1c3   :  { %v4520_v17 = vunpack.i.h.bf16 %v4518_v24  ;;  %v4519_v46 = vunpack.i.l.bf16 %v4518_v24  ;;  %v2101_v37 = vmul.f32 %v4524_v47, %v3323_v7  ;;  %v2127_v20 = vmul.f32 %v4525_v48, %v3375_v13 }
 0x1c5   :  { %v2100_v5 = vmul.f32 %v4519_v46, %v3322_v43  ;;  %v2126_v28 = vmul.f32 %v4520_v17, %v3374_v10 }
 0x1c7   :  { %v2337_v19 = vadd.f32 %v2336_v14, %v2100_v5  ;;  %v2368_v35 = vadd.f32 %v2367_v57, %v2126_v28 }
 0x1c8   :  { %v2886_v56 = vpop.permute.xlu2 %2885 }
 0x1c9   :  { %4528 = vrcp.f32 %v2886_v56  ;;  %v2338_v52 = vadd.f32 %v2337_v19, %v2101_v37  ;;  %v2369_v22 = vadd.f32 %v2368_v35, %v2127_v20  ;;  %v2899_v23 = vand.u32 2147483648, %v2886_v56 }
 0x1ca   :  { %v2897_v44 = vand.u32 2147483647, %v2886_v56  ;;  %vm2893_vm9 = vweird.f32 %v2886_v56 }
 0x1cb   :  { %v2339_v0 = vrot.slane %v2338_v52, 4  ;;  %v2370_v38 = vrot.slane %v2369_v22, 4  ;;  %v2900_v18 = vor.u32 1.1754944e-38, %v2899_v23 }
 0x1cc   :  { %vm2898_vm11 = vcmp.eq.f32.partialorder %v2897_v44, 8.507059e+37 }
 0x1cd   :  { %v2340_v26 = vadd.f32 %v2339_v0, %v2338_v52  ;;  %v2371_v61 = vadd.f32 %v2370_v38, %v2369_v22 }
 0x1cf   :  { %v4529_v1 = vpop.eup %4528  ;;  %v2341_v29 = vrot.slane %v2340_v26, 2  ;;  %v2372_v6 = vrot.slane %v2371_v61, 2 }
 0x1d0   :  { %v2889_v30 = vmul.f32 %v4529_v1, %v2886_v56  ;;  %vm2894_vm8 = vweird.f32 %v4529_v1 }
 0x1d1   :  { %v2342_v59 = vadd.f32 %v2341_v29, %v2340_v26  ;;  %v2373_v9 = vadd.f32 %v2372_v6, %v2371_v61  ;;  %vm2895_vm10 = vmor %vm2893_vm9, %vm2894_vm8 }
 0x1d2   :  { %v2890_v40 = vsub.f32 1.0, %v2889_v30 }
 0x1d3   :  { %v2343_v39 = vrot.slane %v2342_v59, 1  ;;  %v2374_v2 = vrot.slane %v2373_v9, 1 }
 0x1d4   :  { %v2891_v25 = vmul.f32 %v4529_v1, %v2890_v40 }
 0x1d5   :  { %v2344_v12 = vadd.f32 %v2343_v39, %v2342_v59  ;;  %v2375_v50 = vadd.f32 %v2374_v2, %v2373_v9 }
 0x1d6   :  { %v2892_v36 = vadd.f32 %v4529_v1, %v2891_v25 }
 0x1d7   :  { %v2395_v58 = vsel %vm2394_vm6, %v2344_v12, %v6246_v4  ;;  %v2952_v4 = vstv %s6275_s5 }
 0x1d8   :  { %v2397_v32 = vsel %vm2396_vm7, %v2375_v50, %v2395_v58  ;;  %v2896_v16 = vsel %vm2895_vm10, %v4529_v1, %v2892_v36 }
 0x1d9   :  { %v2901_v55 = vsel %vm2898_vm11, %v2900_v18, %v2896_v16 }
 0x1da   :  { %v2902_v41 = vmul.f32 %v2901_v55, %v2397_v32 }
 0x1dc   :  { %2939 = vmatmul.f32.vlgmr.msra.gmra.mxu0 %v2902_v41 }
 0x259   :  { %v2940_v60 = vpop.f32.mrf.mxu0 }
 0x25a   :  { %v2941_v21 = vadd.f32 %v4526_v34, %v2940_v60 }
 0x25c   :  { %v2943_v33 = vmax.f32 %v2941_v21, 0.0 }
 0x25e   :  { %v2948_v49 = vmul.f32 %v4527_v42, %v2943_v33 }
 0x260   :  { %2949 = vadd.xlane.f32.xlu0 %v2948_v49 }
 0x2d3   :  { %v2950_v8 = vpop.xlane.xlu0 %2949 }
 0x2d4   :  { %v2953_v11 = vadd.f32 %v2952_v4, %v2950_v8 }
 0x2d6   :  { %2954 = vst.msk [vmem:[%s6276_s6] sm:$0xff] %vm45_vm0, %v2953_v11 }
 0x2d7   :  { %2959 = vsyncpa [#allocation6], 1 }

</bundles_post_ra>
